<compile_context>
chip_gen: v6e
topology: v6e:2x2x1
jax: 0.10.0
libtpu: 0.0.40
codegen_flags: <defaults>
</compile_context>

<pallas_src>
import functools
import math

import numpy as np
import jax
import jax.numpy as jnp
from jax import lax
from jax.experimental import pallas as pl
from jax.experimental.pallas import tpu as pltpu


def _round_up(a, b):
    return (a + b - 1) // b * b


_HEAD_PAD = 128              # lane-dense fused-head output width


# -----------------------------------------------------------------------------
# Fused kernel: 1-layer LSTM + masked additive attention + sigmoid heads
# -----------------------------------------------------------------------------
def lstm_attn_head_kernel(x_ref, len_ref, wih_ref, whh_ref, b_ref,
                          watt_ref, batt_ref, ctx_ref, hw_ref, hb_ref,
                          rep_ref, head_ref,
                          gx_ref, hall_ref,
                          *, act_dtype, unroll):
    """One tile of TS sequences (time-major inputs).

    x_ref   : (T, TS, D) bf16   time-major inputs
    len_ref : (TS, 1)    f32    valid lengths
    wih_ref : (D, 4H) bf16, whh_ref : (H, 4H) bf16, b_ref : (1, 4H) f32
    watt_ref: (H, H)  bf16, batt_ref: (1, H) f32,   ctx_ref: (1, H) f32
    hw_ref  : (H, Cpad) bf16, hb_ref : (1, Cpad) f32   fused classifier heads
    rep_ref : (TS, H)    bf16   attention-pooled representation
    head_ref: (TS, Cpad) f32    sigmoid(rep @ hw + hb)
    gx_ref  : (T*TS, 4H) scratch: hoisted input projection (time-major, flat)
    hall_ref: (T*TS, H)  bf16 scratch: all hidden states (time-major, flat)
    """
    T, TS, D = x_ref.shape
    H = whh_ref.shape[0]

    whh = whh_ref[...]                                        # (H, 4H) bf16

    # ---- hoisted input projection: ONE (T*TS, D) @ (D, 4H) MXU matmul --------
    x_flat = x_ref[...].reshape(T * TS, D)                    # clean sublane merge
    gx_ref[...] = (jnp.dot(x_flat, wih_ref[...],
                           preferred_element_type=jnp.float32)
                   + b_ref[...]).astype(gx_ref.dtype)

    # ---- serial recurrence: only h @ whh on the critical path ----------------
    def step(t, carry):
        h, c = carry                                          # h bf16, c f32
        off = pl.multiple_of(t * TS, TS)
        gates = gx_ref[pl.ds(off, TS), :] + jnp.dot(
            h, whh, preferred_element_type=jnp.float32)       # (TS, 4H) f32
        g = gates.astype(act_dtype)                           # bf16 EUP on v6e/v7x
        i_g = jax.nn.sigmoid(g[:, 0 * H:1 * H])
        f_g = jax.nn.sigmoid(g[:, 1 * H:2 * H])
        g_g = jnp.tanh(g[:, 2 * H:3 * H])
        o_g = jax.nn.sigmoid(g[:, 3 * H:4 * H])
        c_new = (f_g * c + i_g * g_g).astype(jnp.float32)     # cell state in f32
        h_new = (o_g * jnp.tanh(c_new.astype(act_dtype))).astype(jnp.bfloat16)
        hall_ref[pl.ds(off, TS), :] = h_new
        return h_new, c_new

    h0 = jnp.zeros((TS, H), jnp.bfloat16)
    c0 = jnp.zeros((TS, H), jnp.float32)
    lax.fori_loop(0, T, step, (h0, c0), unroll=unroll)

    # ---- attention: one batched matmul + lane-dense (T, TS) softmax ----------
    h_flat = hall_ref[...]                                    # (T*TS, H) bf16
    u = jnp.tanh(jnp.dot(h_flat, watt_ref[...],
                         preferred_element_type=jnp.float32) + batt_ref[...])
    scores = jnp.sum(u.reshape(T, TS, H) * ctx_ref[...], axis=-1)   # (T, TS)

    # sequence-length mask, built lane-dense with one tiny f32 transpose
    col = lax.broadcasted_iota(jnp.int32, (TS, T), 1).astype(jnp.float32)
    maskf = (col < len_ref[...]).astype(jnp.float32).T        # (T, TS)
    valid = maskf > 0.5
    scores = jnp.where(valid, scores, -1e30)
    m = jnp.max(scores, axis=0, keepdims=True)                # (1, TS)
    e = jnp.where(valid, jnp.exp(scores - m), 0.0)
    denom = jnp.sum(e, axis=0, keepdims=True)                 # (1, TS)
    # epsilon guards zero-length (padded) rows; approx recip runs on the EUP
    alpha = e * pl.reciprocal(denom + 1e-20, approx=True)     # (T, TS)

    h3 = h_flat.reshape(T, TS, H)                             # clean sublane split
    rep = jnp.sum(alpha[:, :, None] * h3, axis=0)             # (TS, H) f32
    rep_ref[...] = rep.astype(rep_ref.dtype)

    # ---- fused classifier heads: sigmoid(Linear(rep)) ------------------------
    head_ref[...] = jax.nn.sigmoid(
        jnp.dot(rep.astype(jnp.bfloat16), hw_ref[...],
                preferred_element_type=jnp.float32) + hb_ref[...])


# -----------------------------------------------------------------------------
# Hardware-aware configuration
# -----------------------------------------------------------------------------
def _device_kind():
    try:
        return jax.devices()[0].device_kind.lower()
    except Exception:
        return ""


def _working_set_bytes(T, tile_n, D, H, cpad, gx_bytes):
    four_h = 4 * H
    per_in = (T * tile_n * D * 2 + tile_n * 4
              + D * four_h * 2 + H * four_h * 2 + four_h * 4
              + H * H * 2 + 2 * H * 4 + H * cpad * 2 + cpad * 4)
    per_out = tile_n * H * 2 + tile_n * cpad * 4
    scratch = T * tile_n * four_h * gx_bytes + T * tile_n * H * 2
    return 2 * (per_in + per_out) + scratch           # inputs/outputs double-buffered


def _pick_config(n, T, D, H, cpad):
    kind = _device_kind()
    bf16_eup = ("v6" in kind) or ("v7" in kind)       # v6e / v7x have bf16 VPU/EUP
    act_dtype = jnp.bfloat16 if bf16_eup else jnp.float32
    max_tile = 256 if bf16_eup else 128               # fill 256x256 MXU on v6e/v7x
    budget = (48 << 20) if "v7" in kind else (100 << 20)   # v7x: 64 MiB VMEM / TC

    n16 = _round_up(max(n, 1), 16)                    # 16-aligned for bf16 sublanes
    if n16 <= 16:
        tile_n = 16
    elif n16 <= max_tile:
        tile_n = _round_up((n16 + 1) // 2, 16)        # >= 2 grid steps (pipeline / 2nd TC)
    else:
        tile_n = max_tile

    gx_bytes = 4
    if _working_set_bytes(T, tile_n, D, H, cpad, gx_bytes) > budget:
        gx_bytes = 2                                  # bf16 gx scratch (v7x headroom)
    while _working_set_bytes(T, tile_n, D, H, cpad, gx_bytes) > budget and tile_n > 16:
        tile_n = max(16, _round_up(tile_n // 2, 16))

    ws = _working_set_bytes(T, tile_n, D, H, cpad, gx_bytes)
    vmem_limit = int(min(max(int(ws * 1.25), 32 << 20), budget))
    gx_dtype = jnp.float32 if gx_bytes == 4 else jnp.bfloat16
    unroll = True if T <= 16 else 4                   # partial unroll for realistic T
    return tile_n, act_dtype, gx_dtype, vmem_limit, unroll


# -----------------------------------------------------------------------------
# Wrapper
# -----------------------------------------------------------------------------
def _replicated(shape):
    nd = len(shape)
    return pl.BlockSpec(shape, lambda i: (0,) * nd)


def lstm_attention_with_heads(x, lengths, p, head_w, head_b):
    """x: (N, T, D); lengths: (N,).  Returns (rep (N,H) bf16, head (N,Cpad) f32)."""
    N, T, D = x.shape
    H = p["whh"].shape[0]
    four_h = 4 * H
    cpad = head_w.shape[1]

    tile_n, act_dtype, gx_dtype, vmem_limit, unroll = _pick_config(N, T, D, H, cpad)
    n_pad = _round_up(N, tile_n)

    # bf16 cast + time-major transpose fused into one HBM pass by XLA
    x_tm = jnp.transpose(x.astype(jnp.bfloat16), (1, 0, 2))      # (T, N, D)
    if n_pad != N:
        x_tm = jnp.pad(x_tm, ((0, 0), (0, n_pad - N), (0, 0)))
    lens = jnp.zeros((n_pad, 1), jnp.float32).at[:N, 0].set(
        jnp.asarray(lengths, jnp.float32))

    kernel = pl.pallas_call(
        functools.partial(lstm_attn_head_kernel, act_dtype=act_dtype, unroll=unroll),
        out_shape=(jax.ShapeDtypeStruct((n_pad, H), jnp.bfloat16),
                   jax.ShapeDtypeStruct((n_pad, cpad), jnp.float32)),
        grid=(n_pad // tile_n,),
        in_specs=[
            pl.BlockSpec((T, tile_n, D), lambda i: (0, i, 0)),   # time-major x
            pl.BlockSpec((tile_n, 1), lambda i: (i, 0)),         # lengths
            _replicated((D, four_h)),      # wih
            _replicated((H, four_h)),      # whh
            _replicated((1, four_h)),      # b
            _replicated((H, H)),           # watt
            _replicated((1, H)),           # batt
            _replicated((1, H)),           # ctx
            _replicated((H, cpad)),        # fused head weights (bf16)
            _replicated((1, cpad)),        # fused head bias
        ],
        out_specs=(pl.BlockSpec((tile_n, H), lambda i: (i, 0)),
                   pl.BlockSpec((tile_n, cpad), lambda i: (i, 0))),
        scratch_shapes=[pltpu.VMEM((T * tile_n, four_h), gx_dtype),
                        pltpu.VMEM((T * tile_n, H), jnp.bfloat16)],
        compiler_params=pltpu.CompilerParams(
            dimension_semantics=("parallel",),
            vmem_limit_bytes=vmem_limit),
    )
    rep, head = kernel(x_tm, lens, p["wih"], p["whh"], p["b"],
                       p["watt"], p["batt"], p["ctx"], head_w, head_b)
    return rep[:N], head[:N]


def batch_reshape(rep, par_lengths_np):
    """Group sentence reps into padded (P, Lmax, H) with a single device gather."""
    par_lengths_np = np.asarray(par_lengths_np, np.int64)
    offsets = np.concatenate([[0], np.cumsum(par_lengths_np)])
    P = par_lengths_np.shape[0]
    l_max = int(par_lengths_np.max())
    S, H = rep.shape
    j = np.arange(l_max)[None, :]
    idx = offsets[:-1, None] + j                              # (P, Lmax)
    idx = np.where(j < par_lengths_np[:, None], idx, S)       # pads -> zero row
    rep_ext = jnp.concatenate([rep, jnp.zeros((1, H), rep.dtype)], axis=0)
    return jnp.take(rep_ext, jnp.asarray(idx.reshape(-1), jnp.int32),
                    axis=0).reshape(P, l_max, H)


# -----------------------------------------------------------------------------
# Deterministic parameter init (mirrors the PyTorch module)
# -----------------------------------------------------------------------------
def xavier_normal(key, out_f, in_f):
    std = math.sqrt(2.0 / (in_f + out_f))
    return std * jax.random.normal(key, (out_f, in_f), jnp.float32)


def init_lstm_attn(key, input_size, hidden):
    k = 1.0 / math.sqrt(hidden)
    ks = jax.random.split(key, 5)
    wih = jax.random.uniform(ks[0], (4 * hidden, input_size), jnp.float32, -k, k).T
    whh = jax.random.uniform(ks[1], (4 * hidden, hidden), jnp.float32, -k, k).T
    b = jax.random.uniform(ks[2], (1, 4 * hidden), jnp.float32, -k, k)
    watt = xavier_normal(ks[3], hidden, hidden).T
    batt = jnp.zeros((1, hidden), jnp.float32)
    ctx = jax.random.normal(ks[4], (1, hidden), jnp.float32) * k
    return dict(wih=wih.astype(jnp.bfloat16), whh=whh.astype(jnp.bfloat16),
                b=b, watt=watt.astype(jnp.bfloat16), batt=batt, ctx=ctx)


def init_linear(key, in_f, out_f):
    kw, kb = jax.random.split(key)
    w = xavier_normal(kw, out_f, in_f).T                      # (in, out)
    bound = 1.0 / math.sqrt(in_f)
    b = jax.random.uniform(kb, (1, out_f), jnp.float32, -bound, bound)
    return w, b


def _fuse_heads(mc_w, mc_b, bin_w, bin_b, cpad):
    w = jnp.concatenate([mc_w, bin_w], axis=1)                # (H, C)
    b = jnp.concatenate([mc_b, bin_b], axis=1)                # (1, C)
    c = w.shape[1]
    w = jnp.pad(w, ((0, 0), (0, cpad - c))).astype(jnp.bfloat16)   # bf16 MXU weights
    b = jnp.pad(b, ((0, 0), (0, cpad - c)))
    return w, b


def init_params(key, input_size, hs, hp, nb_mc, nb_bin):
    ks = jax.random.split(key, 6)
    s_mc_w, s_mc_b = init_linear(ks[2], hs, nb_mc)
    s_bin_w, s_bin_b = init_linear(ks[3], hs, nb_bin)
    p_mc_w, p_mc_b = init_linear(ks[4], hp, nb_mc)
    p_bin_w, p_bin_b = init_linear(ks[5], hp, nb_bin)
    cpad = _round_up(nb_mc + nb_bin, _HEAD_PAD)
    s_head_w, s_head_b = _fuse_heads(s_mc_w, s_mc_b, s_bin_w, s_bin_b, cpad)
    p_head_w, p_head_b = _fuse_heads(p_mc_w, p_mc_b, p_bin_w, p_bin_b, cpad)
    return dict(
        sent_lstm=init_lstm_attn(ks[0], input_size, hs),
        par_lstm=init_lstm_attn(ks[1], hs, hp),
        s_head_w=s_head_w, s_head_b=s_head_b,
        p_head_w=p_head_w, p_head_b=p_head_b,
        nb_mc=nb_mc, nb_bin=nb_bin)


# -----------------------------------------------------------------------------
# Forward pass (mirrors MLHAN_MultiLabel.forward, eval mode)
# -----------------------------------------------------------------------------
def mlhan_forward(input_values, level_1_lengths, level_2_lengths_np, params):
    nb_mc, nb_bin = params["nb_mc"], params["nb_bin"]

    sent_rep, sent_head = lstm_attention_with_heads(
        input_values, level_1_lengths, params["sent_lstm"],
        params["s_head_w"], params["s_head_b"])                    # (S,Hs),(S,Cpad)
    reshaped = batch_reshape(sent_rep, level_2_lengths_np)         # (P, Lmax, Hs)
    _, par_head = lstm_attention_with_heads(
        reshaped, np.asarray(level_2_lengths_np), params["par_lstm"],
        params["p_head_w"], params["p_head_b"])                    # (P, Cpad)

    s_mc = sent_head[:, :nb_mc]
    s_bin = sent_head[:, nb_mc:nb_mc + nb_bin]
    p_mc = par_head[:, :nb_mc]
    p_bin = par_head[:, nb_mc:nb_mc + nb_bin]
    return (s_mc, s_bin), (p_mc, p_bin)


# -----------------------------------------------------------------------------
if __name__ == "__main__":
    key = jax.random.PRNGKey(0)
    k_x, k_p = jax.random.split(key)

    D = 128         # input_size (word embedding dim) - lane aligned
    Hs = 128        # sentence_hidden_state_size       - lane aligned
    Hp = 128        # paragraph_hidden_state_size      - lane aligned
    nb_mc, nb_bin = 4, 2
    T_words = 8     # max words per sentence

    level_2 = np.array([3, 2, 3], dtype=np.int32)                  # sentences/paragraph
    S = int(level_2.sum())                                         # 8 sentences total
    level_1 = np.array([8, 5, 3, 7, 8, 2, 6, 4], dtype=np.int32)   # words/sentence

    x = jax.random.normal(k_x, (S, T_words, D), jnp.float32)
    params = init_params(k_p, D, Hs, Hp, nb_mc, nb_bin)

    (s_mc, s_bin), (p_mc, p_bin) = mlhan_forward(x, level_1, level_2, params)
    jax.block_until_ready((s_mc, s_bin, p_mc, p_bin))

    assert s_mc.shape == (S, nb_mc) and s_bin.shape == (S, nb_bin)
    assert p_mc.shape == (len(level_2), nb_mc) and p_bin.shape == (len(level_2), nb_bin)
    assert bool(jnp.all(jnp.isfinite(s_mc))) and bool(jnp.all(jnp.isfinite(p_mc)))
    assert bool(jnp.all((s_mc >= 0) & (s_mc <= 1)))
    assert bool(jnp.all((p_bin >= 0) & (p_bin <= 1)))
    print("KERNEL_OK")
</pallas_src>

<mosaic_0001>
module attributes {stable_mosaic.version = 11 : i64} {
  func.func @lstm_attn_head_kernel(%arg0: i32, %arg1: memref<8x16x128xbf16, #tpu.memory_space<vmem>>, %arg2: memref<16x1xf32, #tpu.memory_space<vmem>>, %arg3: memref<128x512xbf16, #tpu.memory_space<vmem>>, %arg4: memref<128x512xbf16, #tpu.memory_space<vmem>>, %arg5: memref<1x512xf32, #tpu.memory_space<vmem>>, %arg6: memref<128x128xbf16, #tpu.memory_space<vmem>>, %arg7: memref<1x128xf32, #tpu.memory_space<vmem>>, %arg8: memref<1x128xf32, #tpu.memory_space<vmem>>, %arg9: memref<128x128xbf16, #tpu.memory_space<vmem>>, %arg10: memref<1x128xf32, #tpu.memory_space<vmem>>, %arg11: memref<16x128xbf16, #tpu.memory_space<vmem>>, %arg12: memref<16x128xf32, #tpu.memory_space<vmem>>, %arg13: memref<128x512xf32, #tpu.memory_space<vmem>>, %arg14: memref<128x128xbf16, #tpu.memory_space<vmem>>) attributes {dimension_semantics = [#tpu.dimension_semantics<parallel>], iteration_bounds = array<i64: 1>, scalar_prefetch = 0 : i64, scratch_operands = 2 : i64, tpu.core_type = #tpu.core_type<tc>, window_params = [{transform_indices = @transform_0, window_bounds = array<i64: 8, 16, 128>}, {transform_indices = @transform_1, window_bounds = array<i64: 16, 1>}, {pipeline_mode = #tpu.pipeline_mode<synchronous>, transform_indices = @transform_2, window_bounds = array<i64: 128, 512>}, {pipeline_mode = #tpu.pipeline_mode<synchronous>, transform_indices = @transform_3, window_bounds = array<i64: 128, 512>}, {pipeline_mode = #tpu.pipeline_mode<synchronous>, transform_indices = @transform_4, window_bounds = array<i64: 1, 512>}, {pipeline_mode = #tpu.pipeline_mode<synchronous>, transform_indices = @transform_5, window_bounds = array<i64: 128, 128>}, {pipeline_mode = #tpu.pipeline_mode<synchronous>, transform_indices = @transform_6, window_bounds = array<i64: 1, 128>}, {pipeline_mode = #tpu.pipeline_mode<synchronous>, transform_indices = @transform_7, window_bounds = array<i64: 1, 128>}, {pipeline_mode = #tpu.pipeline_mode<synchronous>, transform_indices = @transform_8, window_bounds = array<i64: 128, 128>}, {pipeline_mode = #tpu.pipeline_mode<synchronous>, transform_indices = @transform_9, window_bounds = array<i64: 1, 128>}, {transform_indices = @transform_10, window_bounds = array<i64: 16, 128>}, {transform_indices = @transform_11, window_bounds = array<i64: 16, 128>}]} {
    %c0 = arith.constant 0 : index
    %c0_0 = arith.constant 0 : index
    %0 = vector.load %arg4[%c0, %c0_0] : memref<128x512xbf16, #tpu.memory_space<vmem>>, vector<128x512xbf16>
    %c0_1 = arith.constant 0 : index
    %c0_2 = arith.constant 0 : index
    %c0_3 = arith.constant 0 : index
    %1 = vector.load %arg1[%c0_1, %c0_2, %c0_3] : memref<8x16x128xbf16, #tpu.memory_space<vmem>>, vector<8x16x128xbf16>
    %2 = vector.shape_cast %1 : vector<8x16x128xbf16> to vector<128x128xbf16>
    %c0_4 = arith.constant 0 : index
    %c0_5 = arith.constant 0 : index
    %3 = vector.load %arg3[%c0_4, %c0_5] : memref<128x512xbf16, #tpu.memory_space<vmem>>, vector<128x512xbf16>
    %cst = arith.constant dense<0.000000e+00> : vector<128x512xf32>
    %4 = tpu.matmul %2, %3, %cst {dimension_numbers = #tpu.dot_dimension_numbers<[1], [0], [0], [1], [0, 0, 1, 1], [], []>} : vector<128x128xbf16>, vector<128x512xbf16>, vector<128x512xf32> -> vector<128x512xf32>
    %c0_6 = arith.constant 0 : index
    %c0_7 = arith.constant 0 : index
    %5 = vector.load %arg5[%c0_6, %c0_7] : memref<1x512xf32, #tpu.memory_space<vmem>>, vector<1x512xf32>
    %6 = vector.broadcast %5 : vector<1x512xf32> to vector<128x512xf32>
    %7 = arith.addf %4, %6 : vector<128x512xf32>
    %c0_8 = arith.constant 0 : index
    %c0_9 = arith.constant 0 : index
    %8 = vector.load %arg13[%c0_8, %c0_9] : memref<128x512xf32, #tpu.memory_space<vmem>>, vector<128x512xf32>
    tpu.vector_store %arg13[%c0_8, %c0_9], %7 {strides = array<i32>} : memref<128x512xf32, #tpu.memory_space<vmem>>, vector<128x512xf32>,
    %cst_10 = arith.constant 0.000000e+00 : bf16
    %9 = vector.broadcast %cst_10 : bf16 to vector<16x128xbf16>
    %cst_11 = arith.constant 0.000000e+00 : f32
    %10 = vector.broadcast %cst_11 : f32 to vector<16x128xf32>
    %c0_i32 = arith.constant 0 : i32
    %c16_i32 = arith.constant 16 : i32
    %11 = arith.muli %c0_i32, %c16_i32 : i32
    %12 = tpu.assume_multiple %11, 16 : i32
    %13 = arith.index_cast %12 : i32 to index
    %c0_12 = arith.constant 0 : index
    %14 = vector.load %arg13[%13, %c0_12] : memref<128x512xf32, #tpu.memory_space<vmem>>, vector<16x512xf32>
    %cst_13 = arith.constant dense<0.000000e+00> : vector<16x512xf32>
    %15 = tpu.matmul %9, %0, %cst_13 {dimension_numbers = #tpu.dot_dimension_numbers<[1], [0], [0], [1], [0, 0, 1, 1], [], []>} : vector<16x128xbf16>, vector<128x512xbf16>, vector<16x512xf32> -> vector<16x512xf32>
    %16 = arith.addf %14, %15 : vector<16x512xf32>
    %17 = vector.extract_strided_slice %16 {offsets = [0, 0], sizes = [16, 128], strides = [1, 1]} : vector<16x512xf32> to vector<16x128xf32>
    %18 = arith.negf %17 : vector<16x128xf32>
    %19 = math.exp %18 : vector<16x128xf32>
    %cst_14 = arith.constant 1.000000e+00 : f32
    %20 = vector.broadcast %cst_14 : f32 to vector<16x128xf32>
    %21 = arith.addf %20, %19 : vector<16x128xf32>
    %22 = arith.divf %20, %21 : vector<16x128xf32>
    %23 = vector.extract_strided_slice %16 {offsets = [0, 128], sizes = [16, 128], strides = [1, 1]} : vector<16x512xf32> to vector<16x128xf32>
    %24 = arith.negf %23 : vector<16x128xf32>
    %25 = math.exp %24 : vector<16x128xf32>
    %cst_15 = arith.constant 1.000000e+00 : f32
    %26 = vector.broadcast %cst_15 : f32 to vector<16x128xf32>
    %27 = arith.addf %26, %25 : vector<16x128xf32>
    %28 = arith.divf %26, %27 : vector<16x128xf32>
    %29 = vector.extract_strided_slice %16 {offsets = [0, 256], sizes = [16, 128], strides = [1, 1]} : vector<16x512xf32> to vector<16x128xf32>
    %30 = math.tanh %29 : vector<16x128xf32>
    %31 = vector.extract_strided_slice %16 {offsets = [0, 384], sizes = [16, 128], strides = [1, 1]} : vector<16x512xf32> to vector<16x128xf32>
    %32 = arith.negf %31 : vector<16x128xf32>
    %33 = math.exp %32 : vector<16x128xf32>
    %cst_16 = arith.constant 1.000000e+00 : f32
    %34 = vector.broadcast %cst_16 : f32 to vector<16x128xf32>
    %35 = arith.addf %34, %33 : vector<16x128xf32>
    %36 = arith.divf %34, %35 : vector<16x128xf32>
    %37 = arith.mulf %28, %10 : vector<16x128xf32>
    %38 = arith.mulf %22, %30 : vector<16x128xf32>
    %39 = arith.addf %37, %38 : vector<16x128xf32>
    %40 = math.tanh %39 : vector<16x128xf32>
    %41 = arith.mulf %36, %40 : vector<16x128xf32>
    %42 = arith.truncf %41 : vector<16x128xf32> to vector<16x128xbf16>
    %43 = arith.index_cast %12 : i32 to index
    %c0_17 = arith.constant 0 : index
    %44 = vector.load %arg14[%43, %c0_17] : memref<128x128xbf16, #tpu.memory_space<vmem>>, vector<16x128xbf16>
    tpu.vector_store %arg14[%43, %c0_17], %42 {strides = array<i32>} : memref<128x128xbf16, #tpu.memory_space<vmem>>, vector<16x128xbf16>,
    %c1_i32 = arith.constant 1 : i32
    %c16_i32_18 = arith.constant 16 : i32
    %45 = arith.muli %c1_i32, %c16_i32_18 : i32
    %46 = tpu.assume_multiple %45, 16 : i32
    %47 = arith.index_cast %46 : i32 to index
    %c0_19 = arith.constant 0 : index
    %48 = vector.load %arg13[%47, %c0_19] : memref<128x512xf32, #tpu.memory_space<vmem>>, vector<16x512xf32>
    %cst_20 = arith.constant dense<0.000000e+00> : vector<16x512xf32>
    %49 = tpu.matmul %42, %0, %cst_20 {dimension_numbers = #tpu.dot_dimension_numbers<[1], [0], [0], [1], [0, 0, 1, 1], [], []>} : vector<16x128xbf16>, vector<128x512xbf16>, vector<16x512xf32> -> vector<16x512xf32>
    %50 = arith.addf %48, %49 : vector<16x512xf32>
    %51 = vector.extract_strided_slice %50 {offsets = [0, 0], sizes = [16, 128], strides = [1, 1]} : vector<16x512xf32> to vector<16x128xf32>
    %52 = arith.negf %51 : vector<16x128xf32>
    %53 = math.exp %52 : vector<16x128xf32>
    %cst_21 = arith.constant 1.000000e+00 : f32
    %54 = vector.broadcast %cst_21 : f32 to vector<16x128xf32>
    %55 = arith.addf %54, %53 : vector<16x128xf32>
    %56 = arith.divf %54, %55 : vector<16x128xf32>
    %57 = vector.extract_strided_slice %50 {offsets = [0, 128], sizes = [16, 128], strides = [1, 1]} : vector<16x512xf32> to vector<16x128xf32>
    %58 = arith.negf %57 : vector<16x128xf32>
    %59 = math.exp %58 : vector<16x128xf32>
    %cst_22 = arith.constant 1.000000e+00 : f32
    %60 = vector.broadcast %cst_22 : f32 to vector<16x128xf32>
    %61 = arith.addf %60, %59 : vector<16x128xf32>
    %62 = arith.divf %60, %61 : vector<16x128xf32>
    %63 = vector.extract_strided_slice %50 {offsets = [0, 256], sizes = [16, 128], strides = [1, 1]} : vector<16x512xf32> to vector<16x128xf32>
    %64 = math.tanh %63 : vector<16x128xf32>
    %65 = vector.extract_strided_slice %50 {offsets = [0, 384], sizes = [16, 128], strides = [1, 1]} : vector<16x512xf32> to vector<16x128xf32>
    %66 = arith.negf %65 : vector<16x128xf32>
    %67 = math.exp %66 : vector<16x128xf32>
    %cst_23 = arith.constant 1.000000e+00 : f32
    %68 = vector.broadcast %cst_23 : f32 to vector<16x128xf32>
    %69 = arith.addf %68, %67 : vector<16x128xf32>
    %70 = arith.divf %68, %69 : vector<16x128xf32>
    %71 = arith.mulf %62, %39 : vector<16x128xf32>
    %72 = arith.mulf %56, %64 : vector<16x128xf32>
    %73 = arith.addf %71, %72 : vector<16x128xf32>
    %74 = math.tanh %73 : vector<16x128xf32>
    %75 = arith.mulf %70, %74 : vector<16x128xf32>
    %76 = arith.truncf %75 : vector<16x128xf32> to vector<16x128xbf16>
    %77 = arith.index_cast %46 : i32 to index
    %c0_24 = arith.constant 0 : index
    %78 = vector.load %arg14[%77, %c0_24] : memref<128x128xbf16, #tpu.memory_space<vmem>>, vector<16x128xbf16>
    tpu.vector_store %arg14[%77, %c0_24], %76 {strides = array<i32>} : memref<128x128xbf16, #tpu.memory_space<vmem>>, vector<16x128xbf16>,
    %c2_i32 = arith.constant 2 : i32
    %c16_i32_25 = arith.constant 16 : i32
    %79 = arith.muli %c2_i32, %c16_i32_25 : i32
    %80 = tpu.assume_multiple %79, 16 : i32
    %81 = arith.index_cast %80 : i32 to index
    %c0_26 = arith.constant 0 : index
    %82 = vector.load %arg13[%81, %c0_26] : memref<128x512xf32, #tpu.memory_space<vmem>>, vector<16x512xf32>
    %cst_27 = arith.constant dense<0.000000e+00> : vector<16x512xf32>
    %83 = tpu.matmul %76, %0, %cst_27 {dimension_numbers = #tpu.dot_dimension_numbers<[1], [0], [0], [1], [0, 0, 1, 1], [], []>} : vector<16x128xbf16>, vector<128x512xbf16>, vector<16x512xf32> -> vector<16x512xf32>
    %84 = arith.addf %82, %83 : vector<16x512xf32>
    %85 = vector.extract_strided_slice %84 {offsets = [0, 0], sizes = [16, 128], strides = [1, 1]} : vector<16x512xf32> to vector<16x128xf32>
    %86 = arith.negf %85 : vector<16x128xf32>
    %87 = math.exp %86 : vector<16x128xf32>
    %cst_28 = arith.constant 1.000000e+00 : f32
    %88 = vector.broadcast %cst_28 : f32 to vector<16x128xf32>
    %89 = arith.addf %88, %87 : vector<16x128xf32>
    %90 = arith.divf %88, %89 : vector<16x128xf32>
    %91 = vector.extract_strided_slice %84 {offsets = [0, 128], sizes = [16, 128], strides = [1, 1]} : vector<16x512xf32> to vector<16x128xf32>
    %92 = arith.negf %91 : vector<16x128xf32>
    %93 = math.exp %92 : vector<16x128xf32>
    %cst_29 = arith.constant 1.000000e+00 : f32
    %94 = vector.broadcast %cst_29 : f32 to vector<16x128xf32>
    %95 = arith.addf %94, %93 : vector<16x128xf32>
    %96 = arith.divf %94, %95 : vector<16x128xf32>
    %97 = vector.extract_strided_slice %84 {offsets = [0, 256], sizes = [16, 128], strides = [1, 1]} : vector<16x512xf32> to vector<16x128xf32>
    %98 = math.tanh %97 : vector<16x128xf32>
    %99 = vector.extract_strided_slice %84 {offsets = [0, 384], sizes = [16, 128], strides = [1, 1]} : vector<16x512xf32> to vector<16x128xf32>
    %100 = arith.negf %99 : vector<16x128xf32>
    %101 = math.exp %100 : vector<16x128xf32>
    %cst_30 = arith.constant 1.000000e+00 : f32
    %102 = vector.broadcast %cst_30 : f32 to vector<16x128xf32>
    %103 = arith.addf %102, %101 : vector<16x128xf32>
    %104 = arith.divf %102, %103 : vector<16x128xf32>
    %105 = arith.mulf %96, %73 : vector<16x128xf32>
    %106 = arith.mulf %90, %98 : vector<16x128xf32>
    %107 = arith.addf %105, %106 : vector<16x128xf32>
    %108 = math.tanh %107 : vector<16x128xf32>
    %109 = arith.mulf %104, %108 : vector<16x128xf32>
    %110 = arith.truncf %109 : vector<16x128xf32> to vector<16x128xbf16>
    %111 = arith.index_cast %80 : i32 to index
    %c0_31 = arith.constant 0 : index
    %112 = vector.load %arg14[%111, %c0_31] : memref<128x128xbf16, #tpu.memory_space<vmem>>, vector<16x128xbf16>
    tpu.vector_store %arg14[%111, %c0_31], %110 {strides = array<i32>} : memref<128x128xbf16, #tpu.memory_space<vmem>>, vector<16x128xbf16>,
    %c3_i32 = arith.constant 3 : i32
    %c16_i32_32 = arith.constant 16 : i32
    %113 = arith.muli %c3_i32, %c16_i32_32 : i32
    %114 = tpu.assume_multiple %113, 16 : i32
    %115 = arith.index_cast %114 : i32 to index
    %c0_33 = arith.constant 0 : index
    %116 = vector.load %arg13[%115, %c0_33] : memref<128x512xf32, #tpu.memory_space<vmem>>, vector<16x512xf32>
    %cst_34 = arith.constant dense<0.000000e+00> : vector<16x512xf32>
    %117 = tpu.matmul %110, %0, %cst_34 {dimension_numbers = #tpu.dot_dimension_numbers<[1], [0], [0], [1], [0, 0, 1, 1], [], []>} : vector<16x128xbf16>, vector<128x512xbf16>, vector<16x512xf32> -> vector<16x512xf32>
    %118 = arith.addf %116, %117 : vector<16x512xf32>
    %119 = vector.extract_strided_slice %118 {offsets = [0, 0], sizes = [16, 128], strides = [1, 1]} : vector<16x512xf32> to vector<16x128xf32>
    %120 = arith.negf %119 : vector<16x128xf32>
    %121 = math.exp %120 : vector<16x128xf32>
    %cst_35 = arith.constant 1.000000e+00 : f32
    %122 = vector.broadcast %cst_35 : f32 to vector<16x128xf32>
    %123 = arith.addf %122, %121 : vector<16x128xf32>
    %124 = arith.divf %122, %123 : vector<16x128xf32>
    %125 = vector.extract_strided_slice %118 {offsets = [0, 128], sizes = [16, 128], strides = [1, 1]} : vector<16x512xf32> to vector<16x128xf32>
    %126 = arith.negf %125 : vector<16x128xf32>
    %127 = math.exp %126 : vector<16x128xf32>
    %cst_36 = arith.constant 1.000000e+00 : f32
    %128 = vector.broadcast %cst_36 : f32 to vector<16x128xf32>
    %129 = arith.addf %128, %127 : vector<16x128xf32>
    %130 = arith.divf %128, %129 : vector<16x128xf32>
    %131 = vector.extract_strided_slice %118 {offsets = [0, 256], sizes = [16, 128], strides = [1, 1]} : vector<16x512xf32> to vector<16x128xf32>
    %132 = math.tanh %131 : vector<16x128xf32>
    %133 = vector.extract_strided_slice %118 {offsets = [0, 384], sizes = [16, 128], strides = [1, 1]} : vector<16x512xf32> to vector<16x128xf32>
    %134 = arith.negf %133 : vector<16x128xf32>
    %135 = math.exp %134 : vector<16x128xf32>
    %cst_37 = arith.constant 1.000000e+00 : f32
    %136 = vector.broadcast %cst_37 : f32 to vector<16x128xf32>
    %137 = arith.addf %136, %135 : vector<16x128xf32>
    %138 = arith.divf %136, %137 : vector<16x128xf32>
    %139 = arith.mulf %130, %107 : vector<16x128xf32>
    %140 = arith.mulf %124, %132 : vector<16x128xf32>
    %141 = arith.addf %139, %140 : vector<16x128xf32>
    %142 = math.tanh %141 : vector<16x128xf32>
    %143 = arith.mulf %138, %142 : vector<16x128xf32>
    %144 = arith.truncf %143 : vector<16x128xf32> to vector<16x128xbf16>
    %145 = arith.index_cast %114 : i32 to index
    %c0_38 = arith.constant 0 : index
    %146 = vector.load %arg14[%145, %c0_38] : memref<128x128xbf16, #tpu.memory_space<vmem>>, vector<16x128xbf16>
    tpu.vector_store %arg14[%145, %c0_38], %144 {strides = array<i32>} : memref<128x128xbf16, #tpu.memory_space<vmem>>, vector<16x128xbf16>,
    %c4_i32 = arith.constant 4 : i32
    %c16_i32_39 = arith.constant 16 : i32
    %147 = arith.muli %c4_i32, %c16_i32_39 : i32
    %148 = tpu.assume_multiple %147, 16 : i32
    %149 = arith.index_cast %148 : i32 to index
    %c0_40 = arith.constant 0 : index
    %150 = vector.load %arg13[%149, %c0_40] : memref<128x512xf32, #tpu.memory_space<vmem>>, vector<16x512xf32>
    %cst_41 = arith.constant dense<0.000000e+00> : vector<16x512xf32>
    %151 = tpu.matmul %144, %0, %cst_41 {dimension_numbers = #tpu.dot_dimension_numbers<[1], [0], [0], [1], [0, 0, 1, 1], [], []>} : vector<16x128xbf16>, vector<128x512xbf16>, vector<16x512xf32> -> vector<16x512xf32>
    %152 = arith.addf %150, %151 : vector<16x512xf32>
    %153 = vector.extract_strided_slice %152 {offsets = [0, 0], sizes = [16, 128], strides = [1, 1]} : vector<16x512xf32> to vector<16x128xf32>
    %154 = arith.negf %153 : vector<16x128xf32>
    %155 = math.exp %154 : vector<16x128xf32>
    %cst_42 = arith.constant 1.000000e+00 : f32
    %156 = vector.broadcast %cst_42 : f32 to vector<16x128xf32>
    %157 = arith.addf %156, %155 : vector<16x128xf32>
    %158 = arith.divf %156, %157 : vector<16x128xf32>
    %159 = vector.extract_strided_slice %152 {offsets = [0, 128], sizes = [16, 128], strides = [1, 1]} : vector<16x512xf32> to vector<16x128xf32>
    %160 = arith.negf %159 : vector<16x128xf32>
    %161 = math.exp %160 : vector<16x128xf32>
    %cst_43 = arith.constant 1.000000e+00 : f32
    %162 = vector.broadcast %cst_43 : f32 to vector<16x128xf32>
    %163 = arith.addf %162, %161 : vector<16x128xf32>
    %164 = arith.divf %162, %163 : vector<16x128xf32>
    %165 = vector.extract_strided_slice %152 {offsets = [0, 256], sizes = [16, 128], strides = [1, 1]} : vector<16x512xf32> to vector<16x128xf32>
    %166 = math.tanh %165 : vector<16x128xf32>
    %167 = vector.extract_strided_slice %152 {offsets = [0, 384], sizes = [16, 128], strides = [1, 1]} : vector<16x512xf32> to vector<16x128xf32>
    %168 = arith.negf %167 : vector<16x128xf32>
    %169 = math.exp %168 : vector<16x128xf32>
    %cst_44 = arith.constant 1.000000e+00 : f32
    %170 = vector.broadcast %cst_44 : f32 to vector<16x128xf32>
    %171 = arith.addf %170, %169 : vector<16x128xf32>
    %172 = arith.divf %170, %171 : vector<16x128xf32>
    %173 = arith.mulf %164, %141 : vector<16x128xf32>
    %174 = arith.mulf %158, %166 : vector<16x128xf32>
    %175 = arith.addf %173, %174 : vector<16x128xf32>
    %176 = math.tanh %175 : vector<16x128xf32>
    %177 = arith.mulf %172, %176 : vector<16x128xf32>
    %178 = arith.truncf %177 : vector<16x128xf32> to vector<16x128xbf16>
    %179 = arith.index_cast %148 : i32 to index
    %c0_45 = arith.constant 0 : index
    %180 = vector.load %arg14[%179, %c0_45] : memref<128x128xbf16, #tpu.memory_space<vmem>>, vector<16x128xbf16>
    tpu.vector_store %arg14[%179, %c0_45], %178 {strides = array<i32>} : memref<128x128xbf16, #tpu.memory_space<vmem>>, vector<16x128xbf16>,
    %c5_i32 = arith.constant 5 : i32
    %c16_i32_46 = arith.constant 16 : i32
    %181 = arith.muli %c5_i32, %c16_i32_46 : i32
    %182 = tpu.assume_multiple %181, 16 : i32
    %183 = arith.index_cast %182 : i32 to index
    %c0_47 = arith.constant 0 : index
    %184 = vector.load %arg13[%183, %c0_47] : memref<128x512xf32, #tpu.memory_space<vmem>>, vector<16x512xf32>
    %cst_48 = arith.constant dense<0.000000e+00> : vector<16x512xf32>
    %185 = tpu.matmul %178, %0, %cst_48 {dimension_numbers = #tpu.dot_dimension_numbers<[1], [0], [0], [1], [0, 0, 1, 1], [], []>} : vector<16x128xbf16>, vector<128x512xbf16>, vector<16x512xf32> -> vector<16x512xf32>
    %186 = arith.addf %184, %185 : vector<16x512xf32>
    %187 = vector.extract_strided_slice %186 {offsets = [0, 0], sizes = [16, 128], strides = [1, 1]} : vector<16x512xf32> to vector<16x128xf32>
    %188 = arith.negf %187 : vector<16x128xf32>
    %189 = math.exp %188 : vector<16x128xf32>
    %cst_49 = arith.constant 1.000000e+00 : f32
    %190 = vector.broadcast %cst_49 : f32 to vector<16x128xf32>
    %191 = arith.addf %190, %189 : vector<16x128xf32>
    %192 = arith.divf %190, %191 : vector<16x128xf32>
    %193 = vector.extract_strided_slice %186 {offsets = [0, 128], sizes = [16, 128], strides = [1, 1]} : vector<16x512xf32> to vector<16x128xf32>
    %194 = arith.negf %193 : vector<16x128xf32>
    %195 = math.exp %194 : vector<16x128xf32>
    %cst_50 = arith.constant 1.000000e+00 : f32
    %196 = vector.broadcast %cst_50 : f32 to vector<16x128xf32>
    %197 = arith.addf %196, %195 : vector<16x128xf32>
    %198 = arith.divf %196, %197 : vector<16x128xf32>
    %199 = vector.extract_strided_slice %186 {offsets = [0, 256], sizes = [16, 128], strides = [1, 1]} : vector<16x512xf32> to vector<16x128xf32>
    %200 = math.tanh %199 : vector<16x128xf32>
    %201 = vector.extract_strided_slice %186 {offsets = [0, 384], sizes = [16, 128], strides = [1, 1]} : vector<16x512xf32> to vector<16x128xf32>
    %202 = arith.negf %201 : vector<16x128xf32>
    %203 = math.exp %202 : vector<16x128xf32>
    %cst_51 = arith.constant 1.000000e+00 : f32
    %204 = vector.broadcast %cst_51 : f32 to vector<16x128xf32>
    %205 = arith.addf %204, %203 : vector<16x128xf32>
    %206 = arith.divf %204, %205 : vector<16x128xf32>
    %207 = arith.mulf %198, %175 : vector<16x128xf32>
    %208 = arith.mulf %192, %200 : vector<16x128xf32>
    %209 = arith.addf %207, %208 : vector<16x128xf32>
    %210 = math.tanh %209 : vector<16x128xf32>
    %211 = arith.mulf %206, %210 : vector<16x128xf32>
    %212 = arith.truncf %211 : vector<16x128xf32> to vector<16x128xbf16>
    %213 = arith.index_cast %182 : i32 to index
    %c0_52 = arith.constant 0 : index
    %214 = vector.load %arg14[%213, %c0_52] : memref<128x128xbf16, #tpu.memory_space<vmem>>, vector<16x128xbf16>
    tpu.vector_store %arg14[%213, %c0_52], %212 {strides = array<i32>} : memref<128x128xbf16, #tpu.memory_space<vmem>>, vector<16x128xbf16>,
    %c6_i32 = arith.constant 6 : i32
    %c16_i32_53 = arith.constant 16 : i32
    %215 = arith.muli %c6_i32, %c16_i32_53 : i32
    %216 = tpu.assume_multiple %215, 16 : i32
    %217 = arith.index_cast %216 : i32 to index
    %c0_54 = arith.constant 0 : index
    %218 = vector.load %arg13[%217, %c0_54] : memref<128x512xf32, #tpu.memory_space<vmem>>, vector<16x512xf32>
    %cst_55 = arith.constant dense<0.000000e+00> : vector<16x512xf32>
    %219 = tpu.matmul %212, %0, %cst_55 {dimension_numbers = #tpu.dot_dimension_numbers<[1], [0], [0], [1], [0, 0, 1, 1], [], []>} : vector<16x128xbf16>, vector<128x512xbf16>, vector<16x512xf32> -> vector<16x512xf32>
    %220 = arith.addf %218, %219 : vector<16x512xf32>
    %221 = vector.extract_strided_slice %220 {offsets = [0, 0], sizes = [16, 128], strides = [1, 1]} : vector<16x512xf32> to vector<16x128xf32>
    %222 = arith.negf %221 : vector<16x128xf32>
    %223 = math.exp %222 : vector<16x128xf32>
    %cst_56 = arith.constant 1.000000e+00 : f32
    %224 = vector.broadcast %cst_56 : f32 to vector<16x128xf32>
    %225 = arith.addf %224, %223 : vector<16x128xf32>
    %226 = arith.divf %224, %225 : vector<16x128xf32>
    %227 = vector.extract_strided_slice %220 {offsets = [0, 128], sizes = [16, 128], strides = [1, 1]} : vector<16x512xf32> to vector<16x128xf32>
    %228 = arith.negf %227 : vector<16x128xf32>
    %229 = math.exp %228 : vector<16x128xf32>
    %cst_57 = arith.constant 1.000000e+00 : f32
    %230 = vector.broadcast %cst_57 : f32 to vector<16x128xf32>
    %231 = arith.addf %230, %229 : vector<16x128xf32>
    %232 = arith.divf %230, %231 : vector<16x128xf32>
    %233 = vector.extract_strided_slice %220 {offsets = [0, 256], sizes = [16, 128], strides = [1, 1]} : vector<16x512xf32> to vector<16x128xf32>
    %234 = math.tanh %233 : vector<16x128xf32>
    %235 = vector.extract_strided_slice %220 {offsets = [0, 384], sizes = [16, 128], strides = [1, 1]} : vector<16x512xf32> to vector<16x128xf32>
    %236 = arith.negf %235 : vector<16x128xf32>
    %237 = math.exp %236 : vector<16x128xf32>
    %cst_58 = arith.constant 1.000000e+00 : f32
    %238 = vector.broadcast %cst_58 : f32 to vector<16x128xf32>
    %239 = arith.addf %238, %237 : vector<16x128xf32>
    %240 = arith.divf %238, %239 : vector<16x128xf32>
    %241 = arith.mulf %232, %209 : vector<16x128xf32>
    %242 = arith.mulf %226, %234 : vector<16x128xf32>
    %243 = arith.addf %241, %242 : vector<16x128xf32>
    %244 = math.tanh %243 : vector<16x128xf32>
    %245 = arith.mulf %240, %244 : vector<16x128xf32>
    %246 = arith.truncf %245 : vector<16x128xf32> to vector<16x128xbf16>
    %247 = arith.index_cast %216 : i32 to index
    %c0_59 = arith.constant 0 : index
    %248 = vector.load %arg14[%247, %c0_59] : memref<128x128xbf16, #tpu.memory_space<vmem>>, vector<16x128xbf16>
    tpu.vector_store %arg14[%247, %c0_59], %246 {strides = array<i32>} : memref<128x128xbf16, #tpu.memory_space<vmem>>, vector<16x128xbf16>,
    %c7_i32 = arith.constant 7 : i32
    %c16_i32_60 = arith.constant 16 : i32
    %249 = arith.muli %c7_i32, %c16_i32_60 : i32
    %250 = tpu.assume_multiple %249, 16 : i32
    %251 = arith.index_cast %250 : i32 to index
    %c0_61 = arith.constant 0 : index
    %252 = vector.load %arg13[%251, %c0_61] : memref<128x512xf32, #tpu.memory_space<vmem>>, vector<16x512xf32>
    %cst_62 = arith.constant dense<0.000000e+00> : vector<16x512xf32>
    %253 = tpu.matmul %246, %0, %cst_62 {dimension_numbers = #tpu.dot_dimension_numbers<[1], [0], [0], [1], [0, 0, 1, 1], [], []>} : vector<16x128xbf16>, vector<128x512xbf16>, vector<16x512xf32> -> vector<16x512xf32>
    %254 = arith.addf %252, %253 : vector<16x512xf32>
    %255 = vector.extract_strided_slice %254 {offsets = [0, 0], sizes = [16, 128], strides = [1, 1]} : vector<16x512xf32> to vector<16x128xf32>
    %256 = arith.negf %255 : vector<16x128xf32>
    %257 = math.exp %256 : vector<16x128xf32>
    %cst_63 = arith.constant 1.000000e+00 : f32
    %258 = vector.broadcast %cst_63 : f32 to vector<16x128xf32>
    %259 = arith.addf %258, %257 : vector<16x128xf32>
    %260 = arith.divf %258, %259 : vector<16x128xf32>
    %261 = vector.extract_strided_slice %254 {offsets = [0, 128], sizes = [16, 128], strides = [1, 1]} : vector<16x512xf32> to vector<16x128xf32>
    %262 = arith.negf %261 : vector<16x128xf32>
    %263 = math.exp %262 : vector<16x128xf32>
    %cst_64 = arith.constant 1.000000e+00 : f32
    %264 = vector.broadcast %cst_64 : f32 to vector<16x128xf32>
    %265 = arith.addf %264, %263 : vector<16x128xf32>
    %266 = arith.divf %264, %265 : vector<16x128xf32>
    %267 = vector.extract_strided_slice %254 {offsets = [0, 256], sizes = [16, 128], strides = [1, 1]} : vector<16x512xf32> to vector<16x128xf32>
    %268 = math.tanh %267 : vector<16x128xf32>
    %269 = vector.extract_strided_slice %254 {offsets = [0, 384], sizes = [16, 128], strides = [1, 1]} : vector<16x512xf32> to vector<16x128xf32>
    %270 = arith.negf %269 : vector<16x128xf32>
    %271 = math.exp %270 : vector<16x128xf32>
    %cst_65 = arith.constant 1.000000e+00 : f32
    %272 = vector.broadcast %cst_65 : f32 to vector<16x128xf32>
    %273 = arith.addf %272, %271 : vector<16x128xf32>
    %274 = arith.divf %272, %273 : vector<16x128xf32>
    %275 = arith.mulf %266, %243 : vector<16x128xf32>
    %276 = arith.mulf %260, %268 : vector<16x128xf32>
    %277 = arith.addf %275, %276 : vector<16x128xf32>
    %278 = math.tanh %277 : vector<16x128xf32>
    %279 = arith.mulf %274, %278 : vector<16x128xf32>
    %280 = arith.truncf %279 : vector<16x128xf32> to vector<16x128xbf16>
    %281 = arith.index_cast %250 : i32 to index
    %c0_66 = arith.constant 0 : index
    %282 = vector.load %arg14[%281, %c0_66] : memref<128x128xbf16, #tpu.memory_space<vmem>>, vector<16x128xbf16>
    tpu.vector_store %arg14[%281, %c0_66], %280 {strides = array<i32>} : memref<128x128xbf16, #tpu.memory_space<vmem>>, vector<16x128xbf16>,
    %c8_i32 = arith.constant 8 : i32
    %c0_67 = arith.constant 0 : index
    %c0_68 = arith.constant 0 : index
    %283 = vector.load %arg14[%c0_67, %c0_68] : memref<128x128xbf16, #tpu.memory_space<vmem>>, vector<128x128xbf16>
    %c0_69 = arith.constant 0 : index
    %c0_70 = arith.constant 0 : index
    %284 = vector.load %arg6[%c0_69, %c0_70] : memref<128x128xbf16, #tpu.memory_space<vmem>>, vector<128x128xbf16>
    %cst_71 = arith.constant dense<0.000000e+00> : vector<128x128xf32>
    %285 = tpu.matmul %283, %284, %cst_71 {dimension_numbers = #tpu.dot_dimension_numbers<[1], [0], [0], [1], [0, 0, 1, 1], [], []>} : vector<128x128xbf16>, vector<128x128xbf16>, vector<128x128xf32> -> vector<128x128xf32>
    %c0_72 = arith.constant 0 : index
    %c0_73 = arith.constant 0 : index
    %286 = vector.load %arg7[%c0_72, %c0_73] : memref<1x128xf32, #tpu.memory_space<vmem>>, vector<1x128xf32>
    %287 = vector.broadcast %286 : vector<1x128xf32> to vector<128x128xf32>
    %288 = arith.addf %285, %287 : vector<128x128xf32>
    %289 = math.tanh %288 : vector<128x128xf32>
    %290 = vector.shape_cast %289 : vector<128x128xf32> to vector<8x16x128xf32>
    %c0_74 = arith.constant 0 : index
    %c0_75 = arith.constant 0 : index
    %291 = vector.load %arg8[%c0_74, %c0_75] : memref<1x128xf32, #tpu.memory_space<vmem>>, vector<1x128xf32>
    %292 = vector.shape_cast %291 : vector<1x128xf32> to vector<1x1x128xf32>
    %293 = vector.broadcast %292 : vector<1x1x128xf32> to vector<8x16x128xf32>
    %294 = arith.mulf %290, %293 : vector<8x16x128xf32>
    %cst_76 = arith.constant dense<0.000000e+00> : vector<8x16xf32>
    %295 = vector.multi_reduction <add>, %294, %cst_76 [2] : vector<8x16x128xf32> to vector<8x16xf32>
    %296 = tpu.iota {dimensions = array<i32: 1>} : vector<16x8xi32>
    %297 = arith.sitofp %296 : vector<16x8xi32> to vector<16x8xf32>
    %c0_77 = arith.constant 0 : index
    %c0_78 = arith.constant 0 : index
    %298 = vector.load %arg2[%c0_77, %c0_78] : memref<16x1xf32, #tpu.memory_space<vmem>>, vector<16x1xf32>
    %299 = vector.broadcast %298 : vector<16x1xf32> to vector<16x8xf32>
    %300 = arith.cmpf olt, %297, %299 : vector<16x8xf32>
    %301 = arith.extui %300 : vector<16x8xi1> to vector<16x8xi32>
    %302 = arith.sitofp %301 : vector<16x8xi32> to vector<16x8xf32>
    %303 = tpu.transpose %302, [1, 0] : vector<16x8xf32> -> vector<8x16xf32>
    %cst_79 = arith.constant 5.000000e-01 : f32
    %304 = vector.broadcast %cst_79 : f32 to vector<8x16xf32>
    %305 = arith.cmpf ogt, %303, %304 : vector<8x16xf32>
    %cst_80 = arith.constant -1.000000e+30 : f32
    %306 = vector.broadcast %cst_80 : f32 to vector<8x16xf32>
    %307 = arith.select %305, %295, %306 : vector<8x16xi1>, vector<8x16xf32>
    %cst_81 = arith.constant dense<0xFF800000> : vector<16xf32>
    %308 = vector.multi_reduction <maximumf>, %307, %cst_81 [0] : vector<8x16xf32> to vector<16xf32>
    %309 = vector.shape_cast %308 : vector<16xf32> to vector<1x16xf32>
    %310 = vector.broadcast %309 : vector<1x16xf32> to vector<8x16xf32>
    %311 = arith.subf %307, %310 : vector<8x16xf32>
    %312 = math.exp %311 : vector<8x16xf32>
    %cst_82 = arith.constant 0.000000e+00 : f32
    %313 = vector.broadcast %cst_82 : f32 to vector<8x16xf32>
    %314 = arith.select %305, %312, %313 : vector<8x16xi1>, vector<8x16xf32>
    %cst_83 = arith.constant dense<0.000000e+00> : vector<16xf32>
    %315 = vector.multi_reduction <add>, %314, %cst_83 [0] : vector<8x16xf32> to vector<16xf32>
    %316 = vector.shape_cast %315 : vector<16xf32> to vector<1x16xf32>
    %cst_84 = arith.constant 9.99999968E-21 : f32
    %317 = vector.broadcast %cst_84 : f32 to vector<1x16xf32>
    %318 = arith.addf %316, %317 : vector<1x16xf32>
    %319 = tpu.reciprocal %318 {approx = true} : vector<1x16xf32> -> vector<1x16xf32>
    %320 = vector.broadcast %319 : vector<1x16xf32> to vector<8x16xf32>
    %321 = arith.mulf %314, %320 : vector<8x16xf32>
    %322 = vector.shape_cast %283 : vector<128x128xbf16> to vector<8x16x128xbf16>
    %323 = vector.shape_cast %321 : vector<8x16xf32> to vector<8x16x1xf32>
    %324 = arith.extf %322 : vector<8x16x128xbf16> to vector<8x16x128xf32>
    %325 = vector.broadcast %323 : vector<8x16x1xf32> to vector<8x16x128xf32>
    %326 = arith.mulf %325, %324 : vector<8x16x128xf32>
    %cst_85 = arith.constant dense<0.000000e+00> : vector<16x128xf32>
    %327 = vector.multi_reduction <add>, %326, %cst_85 [0] : vector<8x16x128xf32> to vector<16x128xf32>
    %328 = arith.truncf %327 : vector<16x128xf32> to vector<16x128xbf16>
    %c0_86 = arith.constant 0 : index
    %c0_87 = arith.constant 0 : index
    %329 = vector.load %arg11[%c0_86, %c0_87] : memref<16x128xbf16, #tpu.memory_space<vmem>>, vector<16x128xbf16>
    tpu.vector_store %arg11[%c0_86, %c0_87], %328 {strides = array<i32>} : memref<16x128xbf16, #tpu.memory_space<vmem>>, vector<16x128xbf16>,
    %330 = arith.truncf %327 : vector<16x128xf32> to vector<16x128xbf16>
    %c0_88 = arith.constant 0 : index
    %c0_89 = arith.constant 0 : index
    %331 = vector.load %arg9[%c0_88, %c0_89] : memref<128x128xbf16, #tpu.memory_space<vmem>>, vector<128x128xbf16>
    %cst_90 = arith.constant dense<0.000000e+00> : vector<16x128xf32>
    %332 = tpu.matmul %330, %331, %cst_90 {dimension_numbers = #tpu.dot_dimension_numbers<[1], [0], [0], [1], [0, 0, 1, 1], [], []>} : vector<16x128xbf16>, vector<128x128xbf16>, vector<16x128xf32> -> vector<16x128xf32>
    %c0_91 = arith.constant 0 : index
    %c0_92 = arith.constant 0 : index
    %333 = vector.load %arg10[%c0_91, %c0_92] : memref<1x128xf32, #tpu.memory_space<vmem>>, vector<1x128xf32>
    %334 = vector.broadcast %333 : vector<1x128xf32> to vector<16x128xf32>
    %335 = arith.addf %332, %334 : vector<16x128xf32>
    %336 = arith.negf %335 : vector<16x128xf32>
    %337 = math.exp %336 : vector<16x128xf32>
    %cst_93 = arith.constant 1.000000e+00 : f32
    %338 = vector.broadcast %cst_93 : f32 to vector<16x128xf32>
    %339 = arith.addf %338, %337 : vector<16x128xf32>
    %340 = arith.divf %338, %339 : vector<16x128xf32>
    %c0_94 = arith.constant 0 : index
    %c0_95 = arith.constant 0 : index
    %341 = vector.load %arg12[%c0_94, %c0_95] : memref<16x128xf32, #tpu.memory_space<vmem>>, vector<16x128xf32>
    tpu.vector_store %arg12[%c0_94, %c0_95], %340 {strides = array<i32>} : memref<16x128xf32, #tpu.memory_space<vmem>>, vector<16x128xf32>,
    return
  }
  func.func @transform_0(%arg0: i32) -> (i32, i32, i32) {
    %c0_i32 = arith.constant 0 : i32
    %c0_i32_0 = arith.constant 0 : i32
    %c0_i32_1 = arith.constant 0 : i32
    return %c0_i32, %arg0, %c0_i32_0 : i32, i32, i32
  }
  func.func @transform_1(%arg0: i32) -> (i32, i32) {
    %c0_i32 = arith.constant 0 : i32
    %c0_i32_0 = arith.constant 0 : i32
    return %arg0, %c0_i32 : i32, i32
  }
  func.func @transform_2(%arg0: i32) -> (i32, i32) {
    %c0_i32 = arith.constant 0 : i32
    %c0_i32_0 = arith.constant 0 : i32
    %c0_i32_1 = arith.constant 0 : i32
    return %c0_i32, %c0_i32_0 : i32, i32
  }
  func.func @transform_3(%arg0: i32) -> (i32, i32) {
    %c0_i32 = arith.constant 0 : i32
    %c0_i32_0 = arith.constant 0 : i32
    %c0_i32_1 = arith.constant 0 : i32
    return %c0_i32, %c0_i32_0 : i32, i32
  }
  func.func @transform_4(%arg0: i32) -> (i32, i32) {
    %c0_i32 = arith.constant 0 : i32
    %c0_i32_0 = arith.constant 0 : i32
    %c0_i32_1 = arith.constant 0 : i32
    return %c0_i32, %c0_i32_0 : i32, i32
  }
  func.func @transform_5(%arg0: i32) -> (i32, i32) {
    %c0_i32 = arith.constant 0 : i32
    %c0_i32_0 = arith.constant 0 : i32
    %c0_i32_1 = arith.constant 0 : i32
    return %c0_i32, %c0_i32_0 : i32, i32
  }
  func.func @transform_6(%arg0: i32) -> (i32, i32) {
    %c0_i32 = arith.constant 0 : i32
    %c0_i32_0 = arith.constant 0 : i32
    %c0_i32_1 = arith.constant 0 : i32
    return %c0_i32, %c0_i32_0 : i32, i32
  }
  func.func @transform_7(%arg0: i32) -> (i32, i32) {
    %c0_i32 = arith.constant 0 : i32
    %c0_i32_0 = arith.constant 0 : i32
    %c0_i32_1 = arith.constant 0 : i32
    return %c0_i32, %c0_i32_0 : i32, i32
  }
  func.func @transform_8(%arg0: i32) -> (i32, i32) {
    %c0_i32 = arith.constant 0 : i32
    %c0_i32_0 = arith.constant 0 : i32
    %c0_i32_1 = arith.constant 0 : i32
    return %c0_i32, %c0_i32_0 : i32, i32
  }
  func.func @transform_9(%arg0: i32) -> (i32, i32) {
    %c0_i32 = arith.constant 0 : i32
    %c0_i32_0 = arith.constant 0 : i32
    %c0_i32_1 = arith.constant 0 : i32
    return %c0_i32, %c0_i32_0 : i32, i32
  }
  func.func @transform_10(%arg0: i32) -> (i32, i32) {
    %c0_i32 = arith.constant 0 : i32
    %c0_i32_0 = arith.constant 0 : i32
    return %arg0, %c0_i32 : i32, i32
  }
  func.func @transform_11(%arg0: i32) -> (i32, i32) {
    %c0_i32 = arith.constant 0 : i32
    %c0_i32_0 = arith.constant 0 : i32
    return %arg0, %c0_i32 : i32, i32
  }
}

</mosaic_0001>

<bundles_post_ra>
// kernel: tpu_custom_call.1
= control target key start
LH: loop header
LB: loop body
LE: loop exit
PB: predicated region body
PF: predicated region fallthrough
CT: control target
= control target key end

     0   :  { %17 = vsyncpa [#allocation5], 0  ;;  %s4923_s0 = inlined_call_operand.hbm [shape: bf16[8,16,128], index: 0, kind: input, shape index: {}]   ;;  %s4924_s1 = inlined_call_operand.vmem [shape: f32[16,1], index: 1, kind: input, shape index: {}]   ;;  %s4925_s2 = inlined_call_operand.hbm [shape: bf16[128,512], index: 2, kind: input, shape index: {}]   ;;  %s4926_s3 = inlined_call_operand.hbm [shape: bf16[128,512], index: 3, kind: input, shape index: {}]   ;;  %s4927_s4 = inlined_call_operand.vmem [shape: f32[1,512], index: 4, kind: input, shape index: {}]   ;;  %s4928_s5 = inlined_call_operand.hbm [shape: bf16[128,128], index: 5, kind: input, shape index: {}]   ;;  %s4929_s6 = inlined_call_operand.vmem [shape: f32[1,128], index: 6, kind: input, shape index: {}]   ;;  %s4930_s7 = inlined_call_operand.vmem [shape: f32[1,128], index: 7, kind: input, shape index: {}]   ;;  %s4931_s8 = inlined_call_operand.hbm [shape: bf16[128,128], index: 8, kind: input, shape index: {}]   ;;  %s4932_s9 = inlined_call_operand.vmem [shape: f32[1,128], index: 9, kind: input, shape index: {}]   ;;  %s4933_s10 = inlined_call_operand.hbm [shape: bf16[16,128], index: 10, kind: output, shape index: {0}]   ;;  %s4934_s11 = inlined_call_operand.hbm [shape: f32[16,128], index: 11, kind: output, shape index: {1}]  }
   0x1   :  { %18 = vsyncpa [#allocation8], 0 }
   0x2   :  { %19 = vsyncpa [#allocation11], 0 }
   0x3   :  { %20 = vsyncpa [#allocation6], 0 }
   0x4   :  { %21 = vsyncpa [#allocation15], 0  ;;  %s3920_s17 = smov [#allocation7]  }
   0x5   :  { %s41_s18 = sshll.u32 %s3920_s17, 4  ;;  %s42_s18 = int_to_ptr.vmem [resolvable:$true] %s41_s18 }
   0x6   :  { %s3778_s19 = scalar_lea.vmem %s42_s18, 4096  ;;  %p3783_p1 = scmp.lt.s32.totalorder %s42_s18, %s42_s18 }
   0x7   :  { %p3779_p0 = scmp.ne.s32.totalorder %s42_s18, %s3778_s19  ;;  %p3784_p2 = scmp.lt.s32.totalorder %s3778_s19, %s3778_s19 }
   0x9   :  { %p3785_p3 = por %p3784_p2, %p3783_p1 }
   0xb   :  { %p3786_p4 = pnand %p3785_p3, %p3779_p0 }
   0xd   :  { %3789 = shalt.err (!%p3786_p4)
}
   0xe   :  { %s3921_s20 = smov 256   ;;  %s3922_s21 = smov 16  }
   0xf   :  { %47 = dma.hbm_to_vmem [thread:$0]  %s4925_s2, 4096, %s42_s18, [#allocation8], %s3921_s20, %s3921_s20, %s3922_s21  }
  0x10   :  { %s3923_s24 = smov [#allocation10]   ;;  %s3924_s26 = smov [#allocation4]  }
  0x11   :  { %s67_s25 = sshll.u32 %s3923_s24, 4  ;;  %s27_s27 = sshll.u32 %s3924_s26, 4  ;;  %s68_s25 = int_to_ptr.vmem [resolvable:$true] %s67_s25  ;;  %s28_s27 = int_to_ptr.vmem [resolvable:$true] %s27_s27 }
  0x12   :  { %s3798_s28 = scalar_lea.vmem %s68_s25, 1024  ;;  %p3803_p6 = scmp.lt.s32.totalorder %s68_s25, %s68_s25 }
  0x13   :  { %p3799_p5 = scmp.ne.s32.totalorder %s68_s25, %s3798_s28  ;;  %p3804_p7 = scmp.lt.s32.totalorder %s3798_s28, %s3798_s28 }
  0x15   :  { %p3805_p8 = por %p3804_p7, %p3803_p6 }
  0x17   :  { %p3806_p9 = pnand %p3805_p8, %p3799_p5 }
  0x19   :  { %3809 = shalt.err (!%p3806_p9)
}
  0x1a   :  { %s3925_s29 = smov 64   ;;  %s3926_s30 = smov 4  }
  0x1b   :  { %73 = dma.hbm_to_vmem [thread:$0]  %s4928_s5, 1024, %s68_s25, [#allocation11], %s3925_s29, %s3925_s29, %s3926_s30  }
  0x1c   :  { %s3818_s2 = scalar_lea.vmem %s28_s27, 1024  ;;  %p3823_p11 = scmp.lt.s32.totalorder %s28_s27, %s28_s27 }
  0x1d   :  { %p3819_p10 = scmp.ne.s32.totalorder %s28_s27, %s3818_s2  ;;  %p3824_p12 = scmp.lt.s32.totalorder %s3818_s2, %s3818_s2 }
  0x1f   :  { %p3825_p13 = por %p3824_p12, %p3823_p11 }
  0x21   :  { %p3826_p0 = pnand %p3825_p13, %p3819_p10 }
  0x23   :  { %3829 = shalt.err (!%p3826_p0)
}
  0x24   :  { %33 = dma.hbm_to_vmem [thread:$0]  %s4923_s0, 1024, %s28_s27, [#allocation5], %s3925_s29, %s3925_s29, %s3926_s30  }
  0x25   :  { %s3927_s16 = smov [#allocation9]   ;;  %s3928_s18 = smov [#allocation12]  }
  0x26   :  { %s53_s17 = sshll.u32 %s3927_s16, 4  ;;  %s83_s5 = sshll.u32 %s3928_s18, 4  ;;  %s54_s17 = int_to_ptr.vmem [resolvable:$true] %s53_s17  ;;  %s84_s5 = int_to_ptr.vmem [resolvable:$true] %s83_s5 }
  0x27   :  { %s3838_s19 = scalar_lea.vmem %s54_s17, 4096  ;;  %p3843_p2 = scmp.lt.s32.totalorder %s54_s17, %s54_s17 }
  0x28   :  { %p3839_p1 = scmp.ne.s32.totalorder %s54_s17, %s3838_s19  ;;  %p3844_p3 = scmp.lt.s32.totalorder %s3838_s19, %s3838_s19 }
  0x2a   :  { %p3845_p4 = por %p3844_p3, %p3843_p2 }
  0x2c   :  { %p3846_p5 = pnand %p3845_p4, %p3839_p1 }
  0x2e   :  { %3849 = shalt.err (!%p3846_p5)
}
  0x2f   :  { %59 = dma.hbm_to_vmem [thread:$0]  %s4926_s3, 4096, %s54_s17, [#allocation8], %s3921_s20, %s3921_s20, %s3922_s21  }
  0x30   :  { %s3858_s0 = scalar_lea.vmem %s84_s5, 1024  ;;  %p3863_p7 = scmp.lt.s32.totalorder %s84_s5, %s84_s5 }
  0x31   :  { %p3859_p6 = scmp.ne.s32.totalorder %s84_s5, %s3858_s0  ;;  %p3864_p8 = scmp.lt.s32.totalorder %s3858_s0, %s3858_s0 }
  0x33   :  { %p3865_p9 = por %p3864_p8, %p3863_p7 }
  0x35   :  { %p3866_p10 = pnand %p3865_p9, %p3859_p6 }
  0x37   :  { %3869 = shalt.err (!%p3866_p10)
}
  0x38   :  { %89 = dma.hbm_to_vmem [thread:$0]  %s4931_s8, 1024, %s84_s5, [#allocation11], %s3925_s29, %s3925_s29, %s3926_s30  }
  0x39   :  { %3910 = dma.done.wait [#allocation5], 1024  }
  0x3a   :  { %3911 = vsyncadd [#allocation5], 4294966272 }
  0x3b   :  { %3912 = dma.done.wait [#allocation8], 8192  }
  0x3c   :  { %3913 = vsyncadd [#allocation8], 4294959104 }
  0x3d   :  { %3914 = dma.done.wait [#allocation11], 2048  }
  0x3e   :  { %3915 = vsyncadd [#allocation11], 4294965248  ;;  %v4940_v0 = vmov 0   ;;  %v3302_v1 = vld [vmem:[#allocation7 + $0xe4] ss:$16 sps:$4 sm:$0xff]   ;;  %v3354_v43 = vld [vmem:[#allocation4 + $0x8] sm:$0xff]  }
  0x3f   :  { %450 = vmatprep.mubr.bf16.mxu0 %v4940_v0  ;;  %563 = vmatprep.mubr.bf16.mxu1 %v4940_v0  ;;  %v3304_v2 = vld [vmem:[#allocation7 + $0xec] ss:$16 sps:$4 sm:$0xff]   ;;  %v3306_v3 = vld [vmem:[#allocation7 + $0xe0] ss:$16 sps:$4 sm:$0xff]   ;;  %v3307_v4 = vld [vmem:[#allocation7 + $0xe8] ss:$16 sps:$4 sm:$0xff]  }
  0x40   :  { %3301 = vset.pattern.permute.xlu0 %v4940_v0  ;;  %418 = vmatprep.subr.bf16.mxu0 %v3302_v1  ;;  %v3308_v5 = vld [vmem:[#allocation7 + $0xc4] ss:$16 sps:$4 sm:$0xff]   ;;  %v3310_v6 = vld [vmem:[#allocation7 + $0xcc] ss:$16 sps:$4 sm:$0xff]   ;;  %v3312_v7 = vld [vmem:[#allocation7 + $0xc0] ss:$16 sps:$4 sm:$0xff]  }
  0x41   :  { %531 = vmatprep.subr.bf16.mxu1 %v3304_v2  ;;  %419 = vmatpush1.bf16.msra.mxu0 %v3306_v3  ;;  %v3313_v8 = vld [vmem:[#allocation7 + $0xc8] ss:$16 sps:$4 sm:$0xff]   ;;  %v3314_v9 = vld [vmem:[#allocation7 + $0xa4] ss:$16 sps:$4 sm:$0xff]   ;;  %v3316_v10 = vld [vmem:[#allocation7 + $0xac] ss:$16 sps:$4 sm:$0xff]  }
  0x42   :  { %532 = vmatpush1.bf16.msra.mxu1 %v3307_v4  ;;  %420 = vmatprep.subr.bf16.mxu0 %v3308_v5  ;;  %v3318_v11 = vld [vmem:[#allocation7 + $0xa0] ss:$16 sps:$4 sm:$0xff]   ;;  %v3319_v12 = vld [vmem:[#allocation7 + $0xa8] ss:$16 sps:$4 sm:$0xff]   ;;  %v3320_v13 = vld [vmem:[#allocation7 + $0x84] ss:$16 sps:$4 sm:$0xff]  }
  0x43   :  { %533 = vmatprep.subr.bf16.mxu1 %v3310_v6  ;;  %v3322_v14 = vld [vmem:[#allocation7 + $0x8c] ss:$16 sps:$4 sm:$0xff]   ;;  %v3324_v15 = vld [vmem:[#allocation7 + $0x80] ss:$16 sps:$4 sm:$0xff]   ;;  %v3325_v16 = vld [vmem:[#allocation7 + $0x88] ss:$16 sps:$4 sm:$0xff]  }
  0x44   :  { %v3326_v17 = vld [vmem:[#allocation7 + $0x64] ss:$16 sps:$4 sm:$0xff]   ;;  %v3328_v18 = vld [vmem:[#allocation7 + $0x6c] ss:$16 sps:$4 sm:$0xff]   ;;  %v3330_v19 = vld [vmem:[#allocation7 + $0x60] ss:$16 sps:$4 sm:$0xff]  }
  0x45   :  { %421 = vmatpush1.bf16.msra.mxu0 %v3312_v7  ;;  %v3331_v20 = vld [vmem:[#allocation7 + $0x68] ss:$16 sps:$4 sm:$0xff]   ;;  %v3332_v21 = vld [vmem:[#allocation7 + $0x44] ss:$16 sps:$4 sm:$0xff]   ;;  %v3334_v22 = vld [vmem:[#allocation7 + $0x4c] ss:$16 sps:$4 sm:$0xff]  }
  0x46   :  { %534 = vmatpush1.bf16.msra.mxu1 %v3313_v8  ;;  %422 = vmatprep.subr.bf16.mxu0 %v3314_v9  ;;  %v3336_v23 = vld [vmem:[#allocation7 + $0x40] ss:$16 sps:$4 sm:$0xff]   ;;  %v3337_v24 = vld [vmem:[#allocation7 + $0x48] ss:$16 sps:$4 sm:$0xff]   ;;  %v3338_v25 = vld [vmem:[#allocation7 + $0x24] ss:$16 sps:$4 sm:$0xff]  }
  0x47   :  { %535 = vmatprep.subr.bf16.mxu1 %v3316_v10  ;;  %v3340_v26 = vld [vmem:[#allocation7 + $0x2c] ss:$16 sps:$4 sm:$0xff]   ;;  %v3342_v27 = vld [vmem:[#allocation7 + $0x20] ss:$16 sps:$4 sm:$0xff]   ;;  %v3343_v28 = vld [vmem:[#allocation7 + $0x28] ss:$16 sps:$4 sm:$0xff]   ;;  %v4939_v10 = vlaneseq }
  0x48   :  { %v3344_v29 = vld [vmem:[#allocation7 + $0x4] ss:$16 sps:$4 sm:$0xff]   ;;  %v3346_v30 = vld [vmem:[#allocation7 + $0xc] ss:$16 sps:$4 sm:$0xff]   ;;  %v3348_v31 = vld [vmem:[#allocation7] ss:$16 sps:$4 sm:$0xff]  }
  0x49   :  { %423 = vmatpush1.bf16.msra.mxu0 %v3318_v11  ;;  %v3349_v32 = vld [vmem:[#allocation7 + $0x8] ss:$16 sps:$4 sm:$0xff]   ;;  %v4029_v33 = vld [vmem:[#allocation9 + $0xe4] ss:$16 sps:$4 sm:$0xff]   ;;  %v4031_v34 = vld [vmem:[#allocation9 + $0xec] ss:$16 sps:$4 sm:$0xff]  }
  0x4a   :  { %536 = vmatpush1.bf16.msra.mxu1 %v3319_v12  ;;  %424 = vmatprep.subr.bf16.mxu0 %v3320_v13  ;;  %v3350_v35 = vld [vmem:[#allocation4] sm:$0xff]   ;;  %v4039_v38 = vld [vmem:[#allocation9 + $0xe8] ss:$16 sps:$4 sm:$0xff]   ;;  %v4041_v39 = vld [vmem:[#allocation9 + $0xcc] ss:$16 sps:$4 sm:$0xff]   ;;  %v4180_v11 = vshrl.u32 %v4939_v10, 7 }
  0x4b   :  { %537 = vmatprep.subr.bf16.mxu1 %v3322_v14  ;;  %v4033_v36 = vld [vmem:[#allocation9 + $0xe0] ss:$16 sps:$4 sm:$0xff]   ;;  %v4036_v37 = vld [vmem:[#allocation9 + $0xc4] ss:$16 sps:$4 sm:$0xff]   ;;  %v4052_v42 = vld [vmem:[#allocation9 + $0xc8] ss:$16 sps:$4 sm:$0xff]  }
  0x4c   :  { %v4045_v40 = vld [vmem:[#allocation9 + $0xc0] ss:$16 sps:$4 sm:$0xff]   ;;  %v4049_v41 = vld [vmem:[#allocation9 + $0xa4] ss:$16 sps:$4 sm:$0xff]   ;;  %v4061_v46 = vld [vmem:[#allocation9 + $0xac] ss:$16 sps:$4 sm:$0xff]  }
  0x4d   :  { %425 = vmatpush1.bf16.msra.mxu0 %v3324_v15  ;;  %v4056_v44 = vld [vmem:[#allocation9 + $0xa0] ss:$16 sps:$4 sm:$0xff]   ;;  %v4058_v45 = vld [vmem:[#allocation9 + $0x84] ss:$16 sps:$4 sm:$0xff]   ;;  %v4064_v47 = vld [vmem:[#allocation9 + $0xa8] ss:$16 sps:$4 sm:$0xff]  }
  0x4e   :  { %538 = vmatpush1.bf16.msra.mxu1 %v3325_v16  ;;  %426 = vmatprep.subr.bf16.mxu0 %v3326_v17  ;;  %v4066_v48 = vld [vmem:[#allocation9 + $0x8c] ss:$16 sps:$4 sm:$0xff]   ;;  %v4071_v49 = vld [vmem:[#allocation9 + $0x80] ss:$16 sps:$4 sm:$0xff]   ;;  %v4073_v50 = vld [vmem:[#allocation9 + $0x64] ss:$16 sps:$4 sm:$0xff]  }
  0x4f   :  { %539 = vmatprep.subr.bf16.mxu1 %v3328_v18  ;;  %v4078_v51 = vld [vmem:[#allocation9 + $0x88] ss:$16 sps:$4 sm:$0xff]   ;;  %v3358_v52 = vld [vmem:[#allocation4 + $0x10] sm:$0xff]   ;;  %v4084_v54 = vld [vmem:[#allocation9 + $0x6c] ss:$16 sps:$4 sm:$0xff]   ;;  %4944 = vst [vmem:[#allocation21_spill] sm:$0xff] %v4180_v11 }
  0x50   :  { %v4081_v53 = vld [vmem:[#allocation9 + $0x60] ss:$16 sps:$4 sm:$0xff]   ;;  %v4087_v55 = vld [vmem:[#allocation9 + $0x44] ss:$16 sps:$4 sm:$0xff]   ;;  %v4090_v56 = vld [vmem:[#allocation9 + $0x68] ss:$16 sps:$4 sm:$0xff]  }
  0x51   :  { %427 = vmatpush1.bf16.msra.mxu0 %v3330_v19  ;;  %v4092_v57 = vld [vmem:[#allocation9 + $0x4c] ss:$16 sps:$4 sm:$0xff]   ;;  %v4094_v58 = vld [vmem:[#allocation9 + $0x40] ss:$16 sps:$4 sm:$0xff]   ;;  %v4098_v59 = vld [vmem:[#allocation9 + $0x24] ss:$16 sps:$4 sm:$0xff]  }
  0x52   :  { %540 = vmatpush1.bf16.msra.mxu1 %v3331_v20  ;;  %428 = vmatprep.subr.bf16.mxu0 %v3332_v21  ;;  %v4100_v60 = vld [vmem:[#allocation9 + $0x48] ss:$16 sps:$4 sm:$0xff]   ;;  %v4106_v62 = vld [vmem:[#allocation9 + $0x20] ss:$16 sps:$4 sm:$0xff]   ;;  %v4109_v63 = vld [vmem:[#allocation9 + $0x2c] ss:$16 sps:$4 sm:$0xff]  }
  0x53   :  { %541 = vmatprep.subr.bf16.mxu1 %v3334_v22  ;;  %v3365_v61 = vld [vmem:[#allocation4 + $0x18] sm:$0xff]   ;;  %v4111_v1 = vld [vmem:[#allocation9 + $0x4] ss:$16 sps:$4 sm:$0xff]   ;;  %v4124_v4 = vld [vmem:[#allocation9] ss:$16 sps:$4 sm:$0xff]   ;;  %v4938_v16 = vsub.s32 0, %v4180_v11 }
  0x54   :  { %v4113_v2 = vld [vmem:[#allocation9 + $0x28] ss:$16 sps:$4 sm:$0xff]   ;;  %v4116_v3 = vld [vmem:[#allocation9 + $0xc] ss:$16 sps:$4 sm:$0xff]   ;;  %v3372_v6 = vld [vmem:[#allocation4 + $0x20] sm:$0xff]   ;;  %v4936_v17 = vsub.s32 2, %v4180_v11 }
  0x55   :  { %429 = vmatpush1.bf16.msra.mxu0 %v3336_v23  ;;  %v4128_v5 = vld [vmem:[#allocation9 + $0x8] ss:$16 sps:$4 sm:$0xff]   ;;  %v3386_v8 = vld [vmem:[#allocation4 + $0x30] sm:$0xff]   ;;  %v188_v18 = vld [vmem:[%s4927_s4] sm:$0xf]  ;;  %v4937_v21 = vsub.s32 1, %v4180_v11 }
  0x56   :  { %542 = vmatpush1.bf16.msra.mxu1 %v3337_v24  ;;  %430 = vmatprep.subr.bf16.mxu0 %v3338_v25  ;;  %v3379_v7 = vld [vmem:[#allocation4 + $0x28] sm:$0xff]   ;;  %v3396_v9 = vld [vmem:[#allocation4 + $0x38] sm:$0xff]   ;;  %v4935_v22 = vsub.s32 3, %v4180_v11  ;;  %v4207_v25 = vrot.slane %v188_v18, %v4938_v16  ;;  %vm2561_vm2 = vcmask 130112   ;;  %vm2626_vm3 = vcmask 1041409  }
  0x57   :  { %543 = vmatprep.subr.bf16.mxu1 %v3340_v26  ;;  %v4211_v26 = vrot.slane %v188_v18, %v4936_v17  ;;  %vm2628_vm4 = vcmask 1042434   ;;  %vm2630_vm5 = vcmask 1043459   ;;  %vm2632_vm6 = vcmask 1044484  }
  0x58   :  { %vm2634_vm7 = vcmask 1045509   ;;  %vm2636_vm8 = vcmask 1046534   ;;  %vm2638_vm9 = vcmask 1047559   ;;  %vm2642_vm10 = vcmask 130048  }
  0x59   :  { %431 = vmatpush1.bf16.msra.mxu0 %v3342_v27  ;;  %vm3931_vm12 = vmmov 0  }
  0x5a   :  { %544 = vmatpush1.bf16.msra.mxu1 %v3343_v28  ;;  %432 = vmatprep.subr.bf16.mxu0 %v3344_v29  ;;  %v4215_v29 = vrot.slane %v188_v18, %v4937_v21 }
  0x5b   :  { %545 = vmatprep.subr.bf16.mxu1 %v3346_v30  ;;  %v4219_v30 = vrot.slane %v188_v18, %v4935_v22 }
  0x5d   :  { %433 = vmatpush1.bf16.msra.mxu0 %v3348_v31 }
  0x5e   :  { %546 = vmatpush1.bf16.msra.mxu1 %v3349_v32  ;;  %879 = vmatprep.subr.bf16.mxu0 %v4029_v33 }
  0x5f   :  { %922 = vmatprep.subr.bf16.mxu1 %v4031_v34 }
  0x60   :  { %451 = vmatmul.mubr.bf16.vlgmr.msra.gmra.mxu0 %v3350_v35 }
  0x61   :  { %564 = vmatmul.mubr.bf16.vlgmr.msra.gmra.mxu1 %v3350_v35  ;;  %880 = vmatpush1.bf16.msra.mxu0 %v4033_v36 }
  0x62   :  { %460 = vmatprep.mubr.bf16.mxu0 %v4940_v0  ;;  %573 = vmatprep.mubr.bf16.mxu1 %v4940_v0 }
  0x63   :  { %881 = vmatprep.subr.bf16.mxu0 %v4036_v37  ;;  %923 = vmatpush1.bf16.msra.mxu1 %v4039_v38 }
  0x64   :  { %924 = vmatprep.subr.bf16.mxu1 %v4041_v39 }
  0x65   :  { %882 = vmatpush1.bf16.msra.mxu0 %v4045_v40 }
  0x66   :  { %883 = vmatprep.subr.bf16.mxu0 %v4049_v41 }
  0x67   :  { %925 = vmatpush1.bf16.msra.mxu1 %v4052_v42 }
  0x68   :  { %461 = vmatmul.mubr.bf16.gmra.mxu0 %v3354_v43  ;;  %926 = vmatprep.subr.bf16.mxu1 %v4061_v46 }
  0x69   :  { %574 = vmatmul.mubr.bf16.gmra.mxu1 %v3354_v43  ;;  %470 = vmatprep.mubr.bf16.mxu0 %v4940_v0 }
  0x6a   :  { %583 = vmatprep.mubr.bf16.mxu1 %v4940_v0  ;;  %884 = vmatpush1.bf16.msra.mxu0 %v4056_v44 }
  0x6b   :  { %885 = vmatprep.subr.bf16.mxu0 %v4058_v45  ;;  %927 = vmatpush1.bf16.msra.mxu1 %v4064_v47 }
  0x6c   :  { %928 = vmatprep.subr.bf16.mxu1 %v4066_v48 }
  0x6e   :  { %886 = vmatpush1.bf16.msra.mxu0 %v4071_v49 }
  0x6f   :  { %887 = vmatprep.subr.bf16.mxu0 %v4073_v50  ;;  %929 = vmatpush1.bf16.msra.mxu1 %v4078_v51 }
  0x70   :  { %471 = vmatmul.mubr.bf16.gmra.mxu0 %v3358_v52  ;;  %930 = vmatprep.subr.bf16.mxu1 %v4084_v54 }
  0x71   :  { %584 = vmatmul.mubr.bf16.gmra.mxu1 %v3358_v52  ;;  %480 = vmatprep.mubr.bf16.mxu0 %v4940_v0 }
  0x72   :  { %593 = vmatprep.mubr.bf16.mxu1 %v4940_v0  ;;  %888 = vmatpush1.bf16.msra.mxu0 %v4081_v53 }
  0x73   :  { %889 = vmatprep.subr.bf16.mxu0 %v4087_v55  ;;  %931 = vmatpush1.bf16.msra.mxu1 %v4090_v56 }
  0x74   :  { %932 = vmatprep.subr.bf16.mxu1 %v4092_v57 }
  0x76   :  { %890 = vmatpush1.bf16.msra.mxu0 %v4094_v58 }
  0x77   :  { %891 = vmatprep.subr.bf16.mxu0 %v4098_v59  ;;  %933 = vmatpush1.bf16.msra.mxu1 %v4100_v60 }
  0x78   :  { %481 = vmatmul.mubr.bf16.gmra.mxu0 %v3365_v61  ;;  %934 = vmatprep.subr.bf16.mxu1 %v4109_v63 }
  0x79   :  { %594 = vmatmul.mubr.bf16.gmra.mxu1 %v3365_v61  ;;  %490 = vmatprep.mubr.bf16.mxu0 %v4940_v0 }
  0x7a   :  { %603 = vmatprep.mubr.bf16.mxu1 %v4940_v0  ;;  %892 = vmatpush1.bf16.msra.mxu0 %v4106_v62 }
  0x7b   :  { %893 = vmatprep.subr.bf16.mxu0 %v4111_v1  ;;  %935 = vmatpush1.bf16.msra.mxu1 %v4113_v2 }
  0x7c   :  { %936 = vmatprep.subr.bf16.mxu1 %v4116_v3 }
  0x7e   :  { %894 = vmatpush1.bf16.msra.mxu0 %v4124_v4 }
  0x7f   :  { %937 = vmatpush1.bf16.msra.mxu1 %v4128_v5  ;;  %1042 = vmatprep.subr.bf16.mxu0 %v4029_v33 }
  0x80   :  { %491 = vmatmul.mubr.bf16.gmra.mxu0 %v3372_v6  ;;  %1085 = vmatprep.subr.bf16.mxu1 %v4031_v34 }
  0x81   :  { %604 = vmatmul.mubr.bf16.gmra.mxu1 %v3372_v6  ;;  %500 = vmatprep.mubr.bf16.mxu0 %v4940_v0 }
  0x82   :  { %613 = vmatprep.mubr.bf16.mxu1 %v4940_v0 }
  0x88   :  { %501 = vmatmul.mubr.bf16.gmra.mxu0 %v3379_v7 }
  0x89   :  { %614 = vmatmul.mubr.bf16.gmra.mxu1 %v3379_v7  ;;  %510 = vmatprep.mubr.bf16.mxu0 %v4940_v0 }
  0x8a   :  { %623 = vmatprep.mubr.bf16.mxu1 %v4940_v0 }
  0x90   :  { %511 = vmatmul.mubr.bf16.gmra.mxu0 %v3386_v8 }
  0x91   :  { %624 = vmatmul.mubr.bf16.gmra.mxu1 %v3386_v8  ;;  %520 = vmatprep.mubr.bf16.mxu0 %v4940_v0 }
  0x92   :  { %633 = vmatprep.mubr.bf16.mxu1 %v4940_v0 }
  0x98   :  { %521 = vmatmul.mubr.bf16.gmra.mxu0 %v3396_v9 }
  0x99   :  { %634 = vmatmul.mubr.bf16.gmra.mxu1 %v3396_v9  ;;  %911 = vmatprep.mubr.bf16.mxu0 %v4940_v0 }
  0x9a   :  { %954 = vmatprep.mubr.bf16.mxu1 %v4940_v0 }
  0xa0   :  { %912 = vmatmul.mubr.bf16.vlgmr.msra.gmra.mxu0 %v4940_v0 }
  0xa1   :  { %955 = vmatmul.mubr.bf16.vlgmr.msra.gmra.mxu1 %v4940_v0  ;;  %1043 = vmatpush1.bf16.msra.mxu0 %v4033_v36 }
  0xa2   :  { %1086 = vmatpush1.bf16.msra.mxu1 %v4039_v38  ;;  %1044 = vmatprep.subr.bf16.mxu0 %v4036_v37 }
  0xa3   :  { %1087 = vmatprep.subr.bf16.mxu1 %v4041_v39  ;;  %1074 = vmatprep.mubr.bf16.mxu0 %v4940_v0 }
  0xa4   :  { %1117 = vmatprep.mubr.bf16.mxu1 %v4940_v0 }
  0xa5   :  { %1045 = vmatpush1.bf16.msra.mxu0 %v4045_v40 }
  0xa6   :  { %1088 = vmatpush1.bf16.msra.mxu1 %v4052_v42  ;;  %1046 = vmatprep.subr.bf16.mxu0 %v4049_v41 }
  0xa7   :  { %1089 = vmatprep.subr.bf16.mxu1 %v4061_v46 }
  0xa9   :  { %1047 = vmatpush1.bf16.msra.mxu0 %v4056_v44 }
  0xaa   :  { %1090 = vmatpush1.bf16.msra.mxu1 %v4064_v47  ;;  %1048 = vmatprep.subr.bf16.mxu0 %v4058_v45 }
  0xab   :  { %1091 = vmatprep.subr.bf16.mxu1 %v4066_v48 }
  0xad   :  { %1049 = vmatpush1.bf16.msra.mxu0 %v4071_v49 }
  0xae   :  { %1092 = vmatpush1.bf16.msra.mxu1 %v4078_v51  ;;  %1050 = vmatprep.subr.bf16.mxu0 %v4073_v50 }
  0xaf   :  { %1093 = vmatprep.subr.bf16.mxu1 %v4084_v54 }
  0xb1   :  { %1051 = vmatpush1.bf16.msra.mxu0 %v4081_v53 }
  0xb2   :  { %1094 = vmatpush1.bf16.msra.mxu1 %v4090_v56  ;;  %1052 = vmatprep.subr.bf16.mxu0 %v4087_v55 }
  0xb3   :  { %1095 = vmatprep.subr.bf16.mxu1 %v4092_v57 }
  0xb5   :  { %1053 = vmatpush1.bf16.msra.mxu0 %v4094_v58 }
  0xb6   :  { %1096 = vmatpush1.bf16.msra.mxu1 %v4100_v60  ;;  %1054 = vmatprep.subr.bf16.mxu0 %v4098_v59 }
  0xb7   :  { %1097 = vmatprep.subr.bf16.mxu1 %v4109_v63 }
  0xb9   :  { %1055 = vmatpush1.bf16.msra.mxu0 %v4106_v62 }
  0xba   :  { %1098 = vmatpush1.bf16.msra.mxu1 %v4113_v2  ;;  %1056 = vmatprep.subr.bf16.mxu0 %v4111_v1 }
  0xbb   :  { %1099 = vmatprep.subr.bf16.mxu1 %v4116_v3 }
  0xbd   :  { %1057 = vmatpush1.bf16.msra.mxu0 %v4124_v4 }
  0xbe   :  { %1100 = vmatpush1.bf16.msra.mxu1 %v4128_v5  ;;  %1206 = vmatprep.subr.bf16.mxu0 %v4029_v33 }
  0xbf   :  { %1249 = vmatprep.subr.bf16.mxu1 %v4031_v34 }
 0x120   :  { %v4182_v12 = vpop.f32.mrf.mxu0 }
 0x121   :  { %v4184_v13 = vpop.f32.mrf.mxu1 }
 0x122   :  { %v4186_v14 = vpop.f32.mrf.mxu0 }
 0x123   :  { %v4188_v15 = vpop.f32.mrf.mxu1 }
 0x124   :  { %v4195_v19 = vpop.f32.mrf.mxu0 }
 0x125   :  { %v4197_v20 = vpop.f32.mrf.mxu1 }
 0x126   :  { %v4201_v23 = vpop.f32.mrf.mxu0 }
 0x127   :  { %v4203_v24 = vpop.f32.mrf.mxu1 }
 0x128   :  { %v462_v27 = vpop.f32.mrf.mxu0 }
 0x129   :  { %v575_v28 = vpop.f32.mrf.mxu1  ;;  %v4222_v31 = vadd.f32 %v462_v27, %v4207_v25 }
 0x12a   :  { %v4225_v32 = vadd.f32 %v575_v28, %v4211_v26  ;;  %v464_v35 = vpop.f32.mrf.mxu0 }
 0x12b   :  { %v577_v43 = vpop.f32.mrf.mxu1  ;;  %v4228_v52 = vadd.f32 %v464_v35, %v4215_v29 }
 0x12c   :  { %4945 = vst [vmem:[#allocation22_spill] sm:$0xff] %v4225_v32  ;;  %v4231_v61 = vadd.f32 %v577_v43, %v4219_v30  ;;  %v466_v6 = vpop.f32.mrf.mxu0 }
 0x12d   :  { %v579_v7 = vpop.f32.mrf.mxu1  ;;  %v4234_v8 = vadd.f32 %v466_v6, %v4207_v25 }
 0x12e   :  { %v4237_v9 = vadd.f32 %v579_v7, %v4211_v26  ;;  %v468_v18 = vpop.f32.mrf.mxu0 }
 0x12f   :  { %v581_v27 = vpop.f32.mrf.mxu1  ;;  %v4240_v28 = vadd.f32 %v468_v18, %v4215_v29 }
 0x130   :  { %4946 = vst [vmem:[#allocation23_spill] sm:$0xff] %v4237_v9  ;;  %v4243_v22 = vadd.f32 %v581_v27, %v4219_v30  ;;  %v472_v35 = vpop.f32.mrf.mxu0 }
 0x131   :  { %v585_v17 = vpop.f32.mrf.mxu1  ;;  %v4246_v43 = vadd.f32 %v472_v35, %v4207_v25 }
 0x132   :  { %4947 = vst [vmem:[#allocation24_spill] sm:$0xff] %v4243_v22  ;;  %v4249_v21 = vadd.f32 %v585_v17, %v4211_v26  ;;  %v474_v6 = vpop.f32.mrf.mxu0 }
 0x133   :  { %4948 = vst [vmem:[#allocation25_spill] sm:$0xff] %v4246_v43  ;;  %v587_v16 = vpop.f32.mrf.mxu1  ;;  %v4252_v7 = vadd.f32 %v474_v6, %v4215_v29 }
 0x134   :  { %4949 = vst [vmem:[#allocation26_spill] sm:$0xff] %v4249_v21  ;;  %v4255_v10 = vadd.f32 %v587_v16, %v4219_v30  ;;  %v476_v18 = vpop.f32.mrf.mxu0 }
 0x135   :  { %4950 = vst [vmem:[#allocation27_spill] sm:$0xff] %v4252_v7  ;;  %v589_v0 = vpop.f32.mrf.mxu1  ;;  %v4258_v27 = vadd.f32 %v476_v18, %v4207_v25 }
 0x136   :  { %4951 = vst [vmem:[#allocation28_spill] sm:$0xff] %v4255_v10  ;;  %v4261_v11 = vadd.f32 %v589_v0, %v4211_v26  ;;  %v478_v35 = vpop.f32.mrf.mxu0 }
 0x137   :  { %4952 = vst [vmem:[#allocation29_spill] sm:$0xff] %v4258_v27  ;;  %v591_v43 = vpop.f32.mrf.mxu1  ;;  %v4264_v17 = vadd.f32 %v478_v35, %v4215_v29 }
 0x138   :  { %4953 = vst [vmem:[#allocation30_spill] sm:$0xff] %v4261_v11  ;;  %v4267_v21 = vadd.f32 %v591_v43, %v4219_v30  ;;  %v482_v6 = vpop.f32.mrf.mxu0 }
 0x139   :  { %4954 = vst [vmem:[#allocation31_spill] sm:$0xff] %v4264_v17  ;;  %v595_v7 = vpop.f32.mrf.mxu1  ;;  %v4270_v16 = vadd.f32 %v482_v6, %v4207_v25 }
 0x13a   :  { %4955 = vst [vmem:[#allocation32_spill] sm:$0xff] %v4267_v21  ;;  %v4273_v10 = vadd.f32 %v595_v7, %v4211_v26  ;;  %v484_v18 = vpop.f32.mrf.mxu0 }
 0x13b   :  { %4956 = vst [vmem:[#allocation33_spill] sm:$0xff] %v4270_v16  ;;  %v597_v27 = vpop.f32.mrf.mxu1  ;;  %v4276_v0 = vadd.f32 %v484_v18, %v4215_v29 }
 0x13c   :  { %4957 = vst [vmem:[#allocation34_spill] sm:$0xff] %v4273_v10  ;;  %v4279_v11 = vadd.f32 %v597_v27, %v4219_v30  ;;  %v486_v35 = vpop.f32.mrf.mxu0 }
 0x13d   :  { %4958 = vst [vmem:[#allocation35_spill] sm:$0xff] %v4276_v0  ;;  %v599_v17 = vpop.f32.mrf.mxu1  ;;  %v4282_v43 = vadd.f32 %v486_v35, %v4207_v25 }
 0x13e   :  { %4959 = vst [vmem:[#allocation36_spill] sm:$0xff] %v4279_v11  ;;  %v4285_v21 = vadd.f32 %v599_v17, %v4211_v26  ;;  %v488_v6 = vpop.f32.mrf.mxu0 }
 0x13f   :  { %4960 = vst [vmem:[#allocation37_spill] sm:$0xff] %v4282_v43  ;;  %v601_v16 = vpop.f32.mrf.mxu1  ;;  %v4288_v7 = vadd.f32 %v488_v6, %v4215_v29 }
 0x140   :  { %4961 = vst [vmem:[#allocation38_spill] sm:$0xff] %v4285_v21  ;;  %v4291_v10 = vadd.f32 %v601_v16, %v4219_v30  ;;  %v492_v18 = vpop.f32.mrf.mxu0 }
 0x141   :  { %4962 = vst [vmem:[#allocation39_spill] sm:$0xff] %v4288_v7  ;;  %v605_v0 = vpop.f32.mrf.mxu1  ;;  %v4294_v27 = vadd.f32 %v492_v18, %v4207_v25 }
 0x142   :  { %4963 = vst [vmem:[#allocation40_spill] sm:$0xff] %v4291_v10  ;;  %v4297_v11 = vadd.f32 %v605_v0, %v4211_v26  ;;  %v494_v35 = vpop.f32.mrf.mxu0 }
 0x143   :  { %4964 = vst [vmem:[#allocation41_spill] sm:$0xff] %v4294_v27  ;;  %v607_v43 = vpop.f32.mrf.mxu1  ;;  %v4300_v17 = vadd.f32 %v494_v35, %v4215_v29 }
 0x144   :  { %4965 = vst [vmem:[#allocation42_spill] sm:$0xff] %v4297_v11  ;;  %v4303_v21 = vadd.f32 %v607_v43, %v4219_v30  ;;  %v496_v6 = vpop.f32.mrf.mxu0 }
 0x145   :  { %4966 = vst [vmem:[#allocation43_spill] sm:$0xff] %v4300_v17  ;;  %v609_v7 = vpop.f32.mrf.mxu1  ;;  %v4306_v16 = vadd.f32 %v496_v6, %v4207_v25 }
 0x146   :  { %4967 = vst [vmem:[#allocation44_spill] sm:$0xff] %v4303_v21  ;;  %v4309_v10 = vadd.f32 %v609_v7, %v4211_v26  ;;  %v498_v18 = vpop.f32.mrf.mxu0 }
 0x147   :  { %4968 = vst [vmem:[#allocation45_spill] sm:$0xff] %v4306_v16  ;;  %v611_v27 = vpop.f32.mrf.mxu1  ;;  %v4312_v0 = vadd.f32 %v498_v18, %v4215_v29 }
 0x148   :  { %4969 = vst [vmem:[#allocation46_spill] sm:$0xff] %v4309_v10  ;;  %v4315_v11 = vadd.f32 %v611_v27, %v4219_v30  ;;  %v502_v35 = vpop.f32.mrf.mxu0 }
 0x149   :  { %4970 = vst [vmem:[#allocation47_spill] sm:$0xff] %v4312_v0  ;;  %v615_v17 = vpop.f32.mrf.mxu1  ;;  %v4318_v43 = vadd.f32 %v502_v35, %v4207_v25 }
 0x14a   :  { %4971 = vst [vmem:[#allocation48_spill] sm:$0xff] %v4315_v11  ;;  %v4321_v21 = vadd.f32 %v615_v17, %v4211_v26  ;;  %v504_v6 = vpop.f32.mrf.mxu0 }
 0x14b   :  { %4972 = vst [vmem:[#allocation49_spill] sm:$0xff] %v4318_v43  ;;  %v617_v16 = vpop.f32.mrf.mxu1  ;;  %v4324_v7 = vadd.f32 %v504_v6, %v4215_v29 }
 0x14c   :  { %4973 = vst [vmem:[#allocation50_spill] sm:$0xff] %v4321_v21  ;;  %v4327_v10 = vadd.f32 %v617_v16, %v4219_v30  ;;  %v506_v18 = vpop.f32.mrf.mxu0 }
 0x14d   :  { %4974 = vst [vmem:[#allocation51_spill] sm:$0xff] %v4324_v7  ;;  %v619_v0 = vpop.f32.mrf.mxu1  ;;  %v4330_v27 = vadd.f32 %v506_v18, %v4207_v25 }
 0x14e   :  { %4975 = vst [vmem:[#allocation52_spill] sm:$0xff] %v4327_v10  ;;  %v4333_v11 = vadd.f32 %v619_v0, %v4211_v26  ;;  %v508_v35 = vpop.f32.mrf.mxu0 }
 0x14f   :  { %4976 = vst [vmem:[#allocation53_spill] sm:$0xff] %v4330_v27  ;;  %v621_v43 = vpop.f32.mrf.mxu1  ;;  %v4336_v17 = vadd.f32 %v508_v35, %v4215_v29 }
 0x150   :  { %4977 = vst [vmem:[#allocation54_spill] sm:$0xff] %v4333_v11  ;;  %v4339_v21 = vadd.f32 %v621_v43, %v4219_v30  ;;  %v512_v6 = vpop.f32.mrf.mxu0 }
 0x151   :  { %4978 = vst [vmem:[#allocation55_spill] sm:$0xff] %v4336_v17  ;;  %v625_v7 = vpop.f32.mrf.mxu1  ;;  %v4342_v16 = vadd.f32 %v512_v6, %v4207_v25 }
 0x152   :  { %4979 = vst [vmem:[#allocation56_spill] sm:$0xff] %v4339_v21  ;;  %v4345_v10 = vadd.f32 %v625_v7, %v4211_v26  ;;  %v514_v18 = vpop.f32.mrf.mxu0 }
 0x153   :  { %4980 = vst [vmem:[#allocation57_spill] sm:$0xff] %v4342_v16  ;;  %v627_v27 = vpop.f32.mrf.mxu1  ;;  %v4348_v0 = vadd.f32 %v514_v18, %v4215_v29 }
 0x154   :  { %4981 = vst [vmem:[#allocation58_spill] sm:$0xff] %v4345_v10  ;;  %v4351_v11 = vadd.f32 %v627_v27, %v4219_v30  ;;  %v516_v35 = vpop.f32.mrf.mxu0 }
 0x155   :  { %4982 = vst [vmem:[#allocation59_spill] sm:$0xff] %v4348_v0  ;;  %v629_v17 = vpop.f32.mrf.mxu1  ;;  %v4354_v43 = vadd.f32 %v516_v35, %v4207_v25 }
 0x156   :  { %4983 = vst [vmem:[#allocation60_spill] sm:$0xff] %v4351_v11  ;;  %v4357_v21 = vadd.f32 %v629_v17, %v4211_v26  ;;  %v518_v6 = vpop.f32.mrf.mxu0 }
 0x157   :  { %4984 = vst [vmem:[#allocation61_spill] sm:$0xff] %v4354_v43  ;;  %v631_v16 = vpop.f32.mrf.mxu1  ;;  %v4360_v7 = vadd.f32 %v518_v6, %v4215_v29 }
 0x158   :  { %4985 = vst [vmem:[#allocation62_spill] sm:$0xff] %v4357_v21  ;;  %v4363_v10 = vadd.f32 %v631_v16, %v4219_v30  ;;  %v522_v18 = vpop.f32.mrf.mxu0 }
 0x159   :  { %4986 = vst [vmem:[#allocation63_spill] sm:$0xff] %v4360_v7  ;;  %v635_v0 = vpop.f32.mrf.mxu1  ;;  %v4366_v27 = vadd.f32 %v522_v18, %v4207_v25 }
 0x15a   :  { %4987 = vst [vmem:[#allocation64_spill] sm:$0xff] %v4363_v10  ;;  %v4369_v11 = vadd.f32 %v635_v0, %v4211_v26  ;;  %v524_v35 = vpop.f32.mrf.mxu0  ;;  %v453_v0 = vadd.f32 %v4182_v12, %v4207_v25  ;;  %v459_v12 = vadd.f32 %v4201_v23, %v4215_v29 }
 0x15b   :  { %4988 = vst [vmem:[#allocation65_spill] sm:$0xff] %v4366_v27  ;;  %v637_v43 = vpop.f32.mrf.mxu1  ;;  %v4372_v17 = vadd.f32 %v524_v35, %v4215_v29 }
 0x15c   :  { %4989 = vst [vmem:[#allocation66_spill] sm:$0xff] %v4369_v11  ;;  %v4375_v21 = vadd.f32 %v637_v43, %v4219_v30  ;;  %v526_v6 = vpop.f32.mrf.mxu0 }
 0x15d   :  { %4990 = vst [vmem:[#allocation67_spill] sm:$0xff] %v4372_v17  ;;  %v639_v7 = vpop.f32.mrf.mxu1  ;;  %v4378_v16 = vadd.f32 %v526_v6, %v4207_v25 }
 0x15e   :  { %4991 = vst [vmem:[#allocation68_spill] sm:$0xff] %v4375_v21  ;;  %v4381_v10 = vadd.f32 %v639_v7, %v4211_v26  ;;  %v528_v18 = vpop.f32.mrf.mxu0  ;;  %v455_v21 = vadd.f32 %v4186_v14, %v4215_v29  ;;  %v457_v7 = vadd.f32 %v4195_v19, %v4207_v25  ;;  %v568_v19 = vadd.f32 %v4188_v15, %v4219_v30 }
 0x15f   :  { %4992 = vst [vmem:[#allocation69_spill] sm:$0xff] %v4378_v16  ;;  %v641_v27 = vpop.f32.mrf.mxu1  ;;  %v4386_v11 = vadd.f32 %v528_v18, %v4215_v29  ;;  %v566_v25 = vadd.f32 %v4184_v13, %v4211_v26  ;;  %v570_v29 = vadd.f32 %v4197_v20, %v4211_v26 }
 0x160   :  { %4993 = vst [vmem:[#allocation70_spill] sm:$0xff] %v4381_v10  ;;  %v4389_v35 = vadd.f32 %v641_v27, %v4219_v30  ;;  %v913_v43 = vpop.f32.mrf.mxu0 }
 0x161   :  { %4994 = vst [vmem:[#allocation71_spill] sm:$0xff] %v4386_v11  ;;  %v965_v6 = vadd.f32 %v913_v43, %v453_v0  ;;  %v956_v16 = vpop.f32.mrf.mxu1 }
 0x162   :  { %4995 = vst [vmem:[#allocation72_spill] sm:$0xff] %v4389_v35  ;;  %v915_v17 = vpop.f32.mrf.mxu0 }
 0x163   :  { %v3048_v10 = vmul.f32 -1.442695, %v965_v6  ;;  %v966_v9 = vadd.f32 %v915_v17, %v455_v21  ;;  %v958_v27 = vpop.f32.mrf.mxu1 }
 0x164   :  { %v917_v22 = vpop.f32.mrf.mxu0  ;;  %v968_v21 = vadd.f32 %v958_v27, %v568_v19 }
 0x165   :  { %3438 = vpow2.f32 %v3048_v10  ;;  %v3050_v18 = vmul.f32 -1.442695, %v966_v9  ;;  %v969_v35 = vadd.f32 %v917_v22, %v457_v7  ;;  %v960_v0 = vpop.f32.mrf.mxu1  ;;  %v572_v10 = vadd.f32 %v4203_v24, %v4219_v30 }
 0x166   :  { %v919_v11 = vpop.f32.mrf.mxu0  ;;  %v967_v22 = vadd.f32 %v956_v16, %v566_v25  ;;  %v971_v17 = vadd.f32 %v960_v0, %v570_v29 }
 0x167   :  { %3440 = vpow2.f32 %v3050_v18  ;;  %v3049_v32 = vmul.f32 -1.442695, %v969_v35  ;;  %v970_v14 = vadd.f32 %v919_v11, %v459_v12  ;;  %v962_v23 = vpop.f32.mrf.mxu1  ;;  %v3052_v11 = vmul.f32 -1.442695, %v968_v21 }
 0x169   :  { %3442 = vpow2.f32 %v3049_v32  ;;  %v3051_v43 = vmul.f32 -1.442695, %v970_v14  ;;  %v972_v32 = vadd.f32 %v962_v23, %v572_v10 }
 0x16b   :  { %3444 = vpow2.f32 %v3051_v43  ;;  %v3053_v6 = vmul.f32 -1.442695, %v972_v32 }
 0x16c   :  { %3446 = vtanh.f32 %v967_v22 }
 0x16d   :  { %3448 = vpow2.f32 %v3052_v11 }
 0x172   :  { %v3439_v9 = vpop.eup %3438 }
 0x173   :  { %v979_v35 = vadd.f32 1.0, %v3439_v9 }
 0x174   :  { %v3441_v15 = vpop.eup %3440 }
 0x175   :  { %3450 = vrcp.f32 %v979_v35  ;;  %v991_v7 = vadd.f32 1.0, %v3441_v15 }
 0x176   :  { %v3443_v13 = vpop.eup %3442  ;;  %3452 = vtanh.f32 %v971_v17 }
 0x177   :  { %3454 = vrcp.f32 %v991_v7  ;;  %v980_v12 = vadd.f32 1.0, %v3443_v13  ;;  %v4996_v13 = vmov 0  }
 0x178   :  { %v3445_v24 = vpop.eup %3444  ;;  %3456 = vpow2.f32 %v3053_v6 }
 0x179   :  { %3458 = vrcp.f32 %v980_v12  ;;  %v992_v30 = vadd.f32 1.0, %v3445_v24  ;;  %v3447_v20 = vpop.eup %3446 }
 0x17a   :  { %v3449_v26 = vpop.eup %3448 }
 0x17b   :  { %3460 = vrcp.f32 %v992_v30  ;;  %v1005_v21 = vadd.f32 1.0, %v3449_v26 }
 0x17d   :  { %3462 = vrcp.f32 %v1005_v21  ;;  %v4997_v21 = vld [vmem:[#allocation22_spill] sm:$0xff] }
 0x182   :  { %v3451_v16 = vpop.eup %3450 }
 0x183   :  { %v3453_v18 = vpop.eup %3452  ;;  %v1013_v27 = vmul.f32 %v3451_v16, %v3447_v20 }
 0x184   :  { %v3455_v14 = vpop.eup %3454 }
 0x185   :  { %v3457_v0 = vpop.eup %3456  ;;  %v1011_v43 = vmul.f32 0.0, %v3455_v14 }
 0x186   :  { %v3459_v19 = vpop.eup %3458  ;;  %v1006_v22 = vadd.f32 1.0, %v3457_v0 }
 0x187   :  { %v4405_v25 = vadd.f32 %v1013_v27, %v1011_v43  ;;  %v1014_v23 = vmul.f32 %v3459_v19, %v3453_v18 }
 0x188   :  { %v3461_v10 = vpop.eup %3460 }
 0x189   :  { %v1012_v29 = vmul.f32 0.0, %v3461_v10  ;;  %3464 = vtanh.f32 %v4405_v25  ;;  %v4998_v10 = vld [vmem:[#allocation24_spill] sm:$0xff] }
 0x18a   :  { %3466 = vrcp.f32 %v1006_v22  ;;  %v3463_v32 = vpop.eup %3462 }
 0x18b   :  { %v4408_v11 = vadd.f32 %v1014_v23, %v1012_v29 }
 0x18d   :  { %3468 = vtanh.f32 %v4408_v11 }
 0x196   :  { %v3465_v9 = vpop.eup %3464 }
 0x197   :  { %v3467_v17 = vpop.eup %3466  ;;  %v1019_v15 = vmul.f32 %v3465_v9, %v3463_v32  ;;  %v4999_v32 = vld [vmem:[#allocation23_spill] sm:$0xff] }
 0x19a   :  { %v3469_v35 = vpop.eup %3468 }
 0x19b   :  { %v1020_v6 = vmul.f32 %v3469_v35, %v3467_v17 }
 0x19d   :  { %v1021_v7 = vpack.c.bf16 %v1020_v6, %v1019_v15 }
 0x19f   :  { %3167 = vst [vmem:[#allocation3] sm:$0xff] %v1021_v7   ;;  %1075 = vmatmul.mubr.bf16.vlgmr.msra.gmra.mxu0 %v1021_v7  ;;  %1118 = vmatmul.mubr.bf16.vlgmr.msra.gmra.mxu1 %v1021_v7 }
 0x1a0   :  { %1207 = vmatpush1.bf16.msra.mxu0 %v4033_v36  ;;  %1250 = vmatpush1.bf16.msra.mxu1 %v4039_v38 }
 0x1a1   :  { %1208 = vmatprep.subr.bf16.mxu0 %v4036_v37  ;;  %1251 = vmatprep.subr.bf16.mxu1 %v4041_v39 }
 0x1a2   :  { %1238 = vmatprep.mubr.bf16.mxu0 %v4996_v13  ;;  %1281 = vmatprep.mubr.bf16.mxu1 %v4996_v13 }
 0x1a4   :  { %1209 = vmatpush1.bf16.msra.mxu0 %v4045_v40  ;;  %1252 = vmatpush1.bf16.msra.mxu1 %v4052_v42 }
 0x1a5   :  { %1210 = vmatprep.subr.bf16.mxu0 %v4049_v41  ;;  %1253 = vmatprep.subr.bf16.mxu1 %v4061_v46 }
 0x1a8   :  { %1211 = vmatpush1.bf16.msra.mxu0 %v4056_v44  ;;  %1254 = vmatpush1.bf16.msra.mxu1 %v4064_v47 }
 0x1a9   :  { %1212 = vmatprep.subr.bf16.mxu0 %v4058_v45  ;;  %1255 = vmatprep.subr.bf16.mxu1 %v4066_v48 }
 0x1ac   :  { %1213 = vmatpush1.bf16.msra.mxu0 %v4071_v49  ;;  %1256 = vmatpush1.bf16.msra.mxu1 %v4078_v51 }
 0x1ad   :  { %1214 = vmatprep.subr.bf16.mxu0 %v4073_v50  ;;  %1257 = vmatprep.subr.bf16.mxu1 %v4084_v54 }
 0x1b0   :  { %1215 = vmatpush1.bf16.msra.mxu0 %v4081_v53  ;;  %1258 = vmatpush1.bf16.msra.mxu1 %v4090_v56 }
 0x1b1   :  { %1216 = vmatprep.subr.bf16.mxu0 %v4087_v55  ;;  %1259 = vmatprep.subr.bf16.mxu1 %v4092_v57 }
 0x1b4   :  { %1217 = vmatpush1.bf16.msra.mxu0 %v4094_v58  ;;  %1260 = vmatpush1.bf16.msra.mxu1 %v4100_v60 }
 0x1b5   :  { %1218 = vmatprep.subr.bf16.mxu0 %v4098_v59  ;;  %1261 = vmatprep.subr.bf16.mxu1 %v4109_v63 }
 0x1b8   :  { %1219 = vmatpush1.bf16.msra.mxu0 %v4106_v62  ;;  %1262 = vmatpush1.bf16.msra.mxu1 %v4113_v2 }
 0x1b9   :  { %1220 = vmatprep.subr.bf16.mxu0 %v4111_v1  ;;  %1263 = vmatprep.subr.bf16.mxu1 %v4116_v3 }
 0x1bc   :  { %1221 = vmatpush1.bf16.msra.mxu0 %v4124_v4  ;;  %1264 = vmatpush1.bf16.msra.mxu1 %v4128_v5 }
 0x1bd   :  { %1370 = vmatprep.subr.bf16.mxu0 %v4029_v33  ;;  %1413 = vmatprep.subr.bf16.mxu1 %v4031_v34 }
 0x25f   :  { %v1076_v36 = vpop.f32.mrf.mxu0  ;;  %v1119_v12 = vpop.f32.mrf.mxu1 }
 0x260   :  { %v1128_v37 = vadd.f32 %v1076_v36, %v4222_v31 }
 0x261   :  { %v1078_v24 = vpop.f32.mrf.mxu0  ;;  %v1121_v18 = vpop.f32.mrf.mxu1 }
 0x262   :  { %v3056_v30 = vmul.f32 -1.442695, %v1128_v37  ;;  %v1129_v20 = vadd.f32 %v1078_v24, %v4228_v52  ;;  %v1131_v31 = vadd.f32 %v1121_v18, %v4231_v61  ;;  %v1130_v52 = vadd.f32 %v1119_v12, %v4997_v21 }
 0x263   :  { %v1080_v26 = vpop.f32.mrf.mxu0  ;;  %v1123_v34 = vpop.f32.mrf.mxu1 }
 0x264   :  { %3470 = vpow2.f32 %v3056_v30  ;;  %v3058_v16 = vmul.f32 -1.442695, %v1129_v20  ;;  %v1132_v27 = vadd.f32 %v1080_v26, %v4234_v8  ;;  %v3060_v23 = vmul.f32 -1.442695, %v1131_v31 }
 0x265   :  { %v1082_v14 = vpop.f32.mrf.mxu0  ;;  %v1125_v19 = vpop.f32.mrf.mxu1  ;;  %v1134_v8 = vadd.f32 %v1123_v34, %v4999_v32 }
 0x266   :  { %3472 = vpow2.f32 %v3058_v16  ;;  %v3057_v0 = vmul.f32 -1.442695, %v1132_v27  ;;  %v1133_v33 = vadd.f32 %v1082_v14, %v4240_v28  ;;  %v1135_v22 = vadd.f32 %v1125_v19, %v4998_v10 }
 0x268   :  { %3474 = vpow2.f32 %v3057_v0  ;;  %v3059_v43 = vmul.f32 -1.442695, %v1133_v33  ;;  %v3061_v28 = vmul.f32 -1.442695, %v1135_v22 }
 0x26a   :  { %3476 = vpow2.f32 %v3059_v43 }
 0x26b   :  { %3478 = vtanh.f32 %v1130_v52 }
 0x26c   :  { %3480 = vpow2.f32 %v3060_v23 }
 0x271   :  { %v3471_v29 = vpop.eup %3470 }
 0x272   :  { %v1142_v9 = vadd.f32 1.0, %v3471_v29  ;;  %v4461_v29 = vld [vmem:[#allocation9 + $0xe0] ss:$16 sps:$4 sm:$0xff]  }
 0x273   :  { %v3473_v17 = vpop.eup %3472 }
 0x274   :  { %3482 = vrcp.f32 %v1142_v9  ;;  %v1154_v35 = vadd.f32 1.0, %v3473_v17  ;;  %v5007_v9 = vld [vmem:[#allocation30_spill] sm:$0xff] }
 0x275   :  { %v3475_v15 = vpop.eup %3474  ;;  %3484 = vtanh.f32 %v1134_v8 }
 0x276   :  { %3486 = vrcp.f32 %v1154_v35  ;;  %v1143_v61 = vadd.f32 1.0, %v3475_v15 }
 0x277   :  { %v3477_v6 = vpop.eup %3476  ;;  %3488 = vpow2.f32 %v3061_v28 }
 0x278   :  { %3490 = vrcp.f32 %v1143_v61  ;;  %v1155_v7 = vadd.f32 1.0, %v3477_v6  ;;  %v3479_v36 = vpop.eup %3478 }
 0x279   :  { %v3481_v37 = vpop.eup %3480 }
 0x27a   :  { %3492 = vrcp.f32 %v1155_v7  ;;  %v1168_v27 = vadd.f32 1.0, %v3481_v37 }
 0x27c   :  { %3494 = vrcp.f32 %v1168_v27 }
 0x281   :  { %v3483_v12 = vpop.eup %3482 }
 0x282   :  { %v3485_v24 = vpop.eup %3484  ;;  %v1176_v30 = vmul.f32 %v3483_v12, %v3479_v36 }
 0x283   :  { %v3487_v20 = vpop.eup %3486 }
 0x284   :  { %v3489_v26 = vpop.eup %3488  ;;  %v1174_v16 = vmul.f32 %v3487_v20, %v4405_v25 }
 0x285   :  { %v3491_v18 = vpop.eup %3490  ;;  %v1169_v34 = vadd.f32 1.0, %v3489_v26 }
 0x286   :  { %v4454_v14 = vadd.f32 %v1176_v30, %v1174_v16  ;;  %v1177_v0 = vmul.f32 %v3491_v18, %v3485_v24 }
 0x287   :  { %v3493_v33 = vpop.eup %3492 }
 0x288   :  { %v1175_v43 = vmul.f32 %v3493_v33, %v4408_v11  ;;  %3496 = vtanh.f32 %v4454_v14  ;;  %v4465_v11 = vld [vmem:[#allocation9 + $0xc4] ss:$16 sps:$4 sm:$0xff]  }
 0x289   :  { %3498 = vrcp.f32 %v1169_v34  ;;  %v3495_v19 = vpop.eup %3494 }
 0x28a   :  { %v4457_v31 = vadd.f32 %v1177_v0, %v1175_v43 }
 0x28c   :  { %3500 = vtanh.f32 %v4457_v31 }
 0x295   :  { %v3497_v21 = vpop.eup %3496 }
 0x296   :  { %v3499_v25 = vpop.eup %3498  ;;  %v1182_v23 = vmul.f32 %v3497_v21, %v3495_v19 }
 0x299   :  { %v3501_v52 = vpop.eup %3500 }
 0x29a   :  { %v1183_v10 = vmul.f32 %v3501_v52, %v3499_v25 }
 0x29c   :  { %v1184_v22 = vpack.c.bf16 %v1183_v10, %v1182_v23 }
 0x29e   :  { %3172 = vst [vmem:[#allocation3 + $0x8] sm:$0xff] %v1184_v22   ;;  %1239 = vmatmul.mubr.bf16.vlgmr.msra.gmra.mxu0 %v1184_v22  ;;  %1282 = vmatmul.mubr.bf16.vlgmr.msra.gmra.mxu1 %v1184_v22 }
 0x29f   :  { %1371 = vmatpush1.bf16.msra.mxu0 %v4461_v29  ;;  %1414 = vmatpush1.bf16.msra.mxu1 %v4039_v38  ;;  %v4497_v38 = vld [vmem:[#allocation9 + $0xe4] ss:$16 sps:$4 sm:$0xff]  }
 0x2a0   :  { %1372 = vmatprep.subr.bf16.mxu0 %v4465_v11  ;;  %1415 = vmatprep.subr.bf16.mxu1 %v4041_v39  ;;  %v4500_v39 = vld [vmem:[#allocation9 + $0xec] ss:$16 sps:$4 sm:$0xff]  }
 0x2a1   :  { %1402 = vmatprep.mubr.bf16.mxu0 %v4996_v13  ;;  %1445 = vmatprep.mubr.bf16.mxu1 %v4996_v13 }
 0x2a3   :  { %1373 = vmatpush1.bf16.msra.mxu0 %v4045_v40  ;;  %1416 = vmatpush1.bf16.msra.mxu1 %v4052_v42 }
 0x2a4   :  { %1374 = vmatprep.subr.bf16.mxu0 %v4049_v41  ;;  %1417 = vmatprep.subr.bf16.mxu1 %v4061_v46  ;;  %v5000_v41 = vld [vmem:[#allocation25_spill] sm:$0xff] }
 0x2a7   :  { %1375 = vmatpush1.bf16.msra.mxu0 %v4056_v44  ;;  %1418 = vmatpush1.bf16.msra.mxu1 %v4064_v47  ;;  %v5001_v47 = vld [vmem:[#allocation27_spill] sm:$0xff] }
 0x2a8   :  { %1376 = vmatprep.subr.bf16.mxu0 %v4058_v45  ;;  %1419 = vmatprep.subr.bf16.mxu1 %v4066_v48 }
 0x2ab   :  { %1377 = vmatpush1.bf16.msra.mxu0 %v4071_v49  ;;  %1420 = vmatpush1.bf16.msra.mxu1 %v4078_v51 }
 0x2ac   :  { %1378 = vmatprep.subr.bf16.mxu0 %v4073_v50  ;;  %1421 = vmatprep.subr.bf16.mxu1 %v4084_v54 }
 0x2af   :  { %1379 = vmatpush1.bf16.msra.mxu0 %v4081_v53  ;;  %1422 = vmatpush1.bf16.msra.mxu1 %v4090_v56  ;;  %v5002_v53 = vld [vmem:[#allocation29_spill] sm:$0xff] }
 0x2b0   :  { %1380 = vmatprep.subr.bf16.mxu0 %v4087_v55  ;;  %1423 = vmatprep.subr.bf16.mxu1 %v4092_v57  ;;  %v5003_v57 = vld [vmem:[#allocation31_spill] sm:$0xff] }
 0x2b3   :  { %1381 = vmatpush1.bf16.msra.mxu0 %v4094_v58  ;;  %1424 = vmatpush1.bf16.msra.mxu1 %v4100_v60 }
 0x2b4   :  { %1382 = vmatprep.subr.bf16.mxu0 %v4098_v59  ;;  %1425 = vmatprep.subr.bf16.mxu1 %v4109_v63 }
 0x2b7   :  { %1383 = vmatpush1.bf16.msra.mxu0 %v4106_v62  ;;  %1426 = vmatpush1.bf16.msra.mxu1 %v4113_v2  ;;  %v5004_v62 = vld [vmem:[#allocation28_spill] sm:$0xff]  ;;  %v5005_v2 = vld [vmem:[#allocation26_spill] sm:$0xff] }
 0x2b8   :  { %1384 = vmatprep.subr.bf16.mxu0 %v4111_v1  ;;  %1427 = vmatprep.subr.bf16.mxu1 %v4116_v3 }
 0x2bb   :  { %1385 = vmatpush1.bf16.msra.mxu0 %v4124_v4  ;;  %1428 = vmatpush1.bf16.msra.mxu1 %v4128_v5  ;;  %v5006_v5 = vld [vmem:[#allocation32_spill] sm:$0xff] }
 0x2bc   :  { %1534 = vmatprep.subr.bf16.mxu0 %v4497_v38  ;;  %1577 = vmatprep.subr.bf16.mxu1 %v4500_v39 }
 0x35e   :  { %v1240_v40 = vpop.f32.mrf.mxu0  ;;  %v1283_v44 = vpop.f32.mrf.mxu1 }
 0x35f   :  { %v1292_v42 = vadd.f32 %v1240_v40, %v5000_v41  ;;  %v1294_v3 = vadd.f32 %v1283_v44, %v5005_v2  ;;  %v4524_v44 = vld [vmem:[#allocation9 + $0xcc] ss:$16 sps:$4 sm:$0xff]   ;;  %v4583_v2 = vld [vmem:[#allocation9 + $0x24] ss:$16 sps:$4 sm:$0xff]  }
 0x360   :  { %v1242_v45 = vpop.f32.mrf.mxu0  ;;  %v1285_v51 = vpop.f32.mrf.mxu1 }
 0x361   :  { %v3064_v46 = vmul.f32 -1.442695, %v1292_v42  ;;  %v1293_v48 = vadd.f32 %v1242_v45, %v5001_v47  ;;  %v1295_v63 = vadd.f32 %v1285_v51, %v5004_v62  ;;  %v4529_v45 = vld [vmem:[#allocation9 + $0xc0] ss:$16 sps:$4 sm:$0xff]   ;;  %v4535_v47 = vld [vmem:[#allocation9 + $0xa4] ss:$16 sps:$4 sm:$0xff]  }
 0x362   :  { %v1244_v49 = vpop.f32.mrf.mxu0  ;;  %v1287_v59 = vpop.f32.mrf.mxu1  ;;  %v4547_v51 = vld [vmem:[#allocation9 + $0x84] ss:$16 sps:$4 sm:$0xff]   ;;  %v4574_v62 = vld [vmem:[#allocation9 + $0x4c] ss:$16 sps:$4 sm:$0xff]  }
 0x363   :  { %3502 = vpow2.f32 %v3064_v46  ;;  %v3066_v50 = vmul.f32 -1.442695, %v1293_v48  ;;  %v1296_v54 = vadd.f32 %v1244_v49, %v5002_v53  ;;  %v3068_v4 = vmul.f32 -1.442695, %v1295_v63  ;;  %v4532_v46 = vld [vmem:[#allocation9 + $0xc8] ss:$16 sps:$4 sm:$0xff]  }
 0x364   :  { %v1246_v55 = vpop.f32.mrf.mxu0  ;;  %v1289_v1 = vpop.f32.mrf.mxu1  ;;  %v1298_v17 = vadd.f32 %v1287_v59, %v5007_v9  ;;  %v4538_v48 = vld [vmem:[#allocation9 + $0xac] ss:$16 sps:$4 sm:$0xff]   ;;  %v4541_v49 = vld [vmem:[#allocation9 + $0xa0] ss:$16 sps:$4 sm:$0xff]   ;;  %v4568_v59 = vld [vmem:[#allocation9 + $0x68] ss:$16 sps:$4 sm:$0xff]  }
 0x365   :  { %3504 = vpow2.f32 %v3066_v50  ;;  %v3065_v56 = vmul.f32 -1.442695, %v1296_v54  ;;  %v1297_v58 = vadd.f32 %v1246_v55, %v5003_v57  ;;  %v1299_v32 = vadd.f32 %v1289_v1, %v5006_v5  ;;  %v4544_v50 = vld [vmem:[#allocation9 + $0xa8] ss:$16 sps:$4 sm:$0xff]   ;;  %v4550_v53 = vld [vmem:[#allocation9 + $0x8c] ss:$16 sps:$4 sm:$0xff]  }
 0x366   :  { %v4553_v54 = vld [vmem:[#allocation9 + $0x80] ss:$16 sps:$4 sm:$0xff]   ;;  %v4556_v55 = vld [vmem:[#allocation9 + $0x88] ss:$16 sps:$4 sm:$0xff]   ;;  %v4562_v57 = vld [vmem:[#allocation9 + $0x6c] ss:$16 sps:$4 sm:$0xff]  }
 0x367   :  { %3506 = vpow2.f32 %v3065_v56  ;;  %v3067_v60 = vmul.f32 -1.442695, %v1297_v58  ;;  %v3069_v15 = vmul.f32 -1.442695, %v1299_v32  ;;  %v4559_v56 = vld [vmem:[#allocation9 + $0x64] ss:$16 sps:$4 sm:$0xff]  }
 0x368   :  { %v4565_v58 = vld [vmem:[#allocation9 + $0x60] ss:$16 sps:$4 sm:$0xff]   ;;  %v4580_v1 = vld [vmem:[#allocation9 + $0x48] ss:$16 sps:$4 sm:$0xff]   ;;  %v4595_v32 = vld [vmem:[#allocation9 + $0x4] ss:$16 sps:$4 sm:$0xff]  }
 0x369   :  { %3508 = vpow2.f32 %v3067_v60  ;;  %v4571_v60 = vld [vmem:[#allocation9 + $0x44] ss:$16 sps:$4 sm:$0xff]   ;;  %v4577_v63 = vld [vmem:[#allocation9 + $0x40] ss:$16 sps:$4 sm:$0xff]   ;;  %v4592_v5 = vld [vmem:[#allocation9 + $0x28] ss:$16 sps:$4 sm:$0xff]  }
 0x36a   :  { %3510 = vtanh.f32 %v1294_v3  ;;  %v4586_v3 = vld [vmem:[#allocation9 + $0x2c] ss:$16 sps:$4 sm:$0xff]   ;;  %v4601_v9 = vld [vmem:[#allocation9] ss:$16 sps:$4 sm:$0xff]  }
 0x36b   :  { %3512 = vpow2.f32 %v3068_v4  ;;  %v4589_v4 = vld [vmem:[#allocation9 + $0x20] ss:$16 sps:$4 sm:$0xff]  }
 0x370   :  { %v3503_v8 = vpop.eup %3502 }
 0x371   :  { %v1306_v28 = vadd.f32 1.0, %v3503_v8  ;;  %v4598_v8 = vld [vmem:[#allocation9 + $0xc] ss:$16 sps:$4 sm:$0xff]  }
 0x372   :  { %v3505_v35 = vpop.eup %3504 }
 0x373   :  { %3514 = vrcp.f32 %v1306_v28  ;;  %v1318_v61 = vadd.f32 1.0, %v3505_v35  ;;  %v5008_v35 = vld [vmem:[#allocation33_spill] sm:$0xff] }
 0x374   :  { %v3507_v6 = vpop.eup %3506  ;;  %3516 = vtanh.f32 %v1298_v17  ;;  %v4604_v17 = vld [vmem:[#allocation9 + $0x8] ss:$16 sps:$4 sm:$0xff]  }
 0x375   :  { %3518 = vrcp.f32 %v1318_v61  ;;  %v1307_v7 = vadd.f32 1.0, %v3507_v6 }
 0x376   :  { %v3509_v36 = vpop.eup %3508  ;;  %3520 = vpow2.f32 %v3069_v15 }
 0x377   :  { %3522 = vrcp.f32 %v1307_v7  ;;  %v1319_v37 = vadd.f32 1.0, %v3509_v36  ;;  %v3511_v12 = vpop.eup %3510  ;;  %v5009_v36 = vld [vmem:[#allocation35_spill] sm:$0xff] }
 0x378   :  { %v3513_v24 = vpop.eup %3512 }
 0x379   :  { %3524 = vrcp.f32 %v1319_v37  ;;  %v1332_v33 = vadd.f32 1.0, %v3513_v24 }
 0x37b   :  { %3526 = vrcp.f32 %v1332_v33 }
 0x380   :  { %v3515_v30 = vpop.eup %3514 }
 0x381   :  { %v3517_v20 = vpop.eup %3516  ;;  %v1340_v26 = vmul.f32 %v3515_v30, %v3511_v12 }
 0x382   :  { %v3519_v16 = vpop.eup %3518 }
 0x383   :  { %v3521_v18 = vpop.eup %3520  ;;  %v1338_v27 = vmul.f32 %v3519_v16, %v4454_v14 }
 0x384   :  { %v3523_v0 = vpop.eup %3522  ;;  %v1333_v21 = vadd.f32 1.0, %v3521_v18 }
 0x385   :  { %v4512_v34 = vadd.f32 %v1340_v26, %v1338_v27  ;;  %v1341_v43 = vmul.f32 %v3523_v0, %v3517_v20  ;;  %v5010_v20 = vld [vmem:[#allocation37_spill] sm:$0xff]  ;;  %v5011_v27 = vld [vmem:[#allocation39_spill] sm:$0xff] }
 0x386   :  { %v3525_v19 = vpop.eup %3524 }
 0x387   :  { %v1339_v25 = vmul.f32 %v3525_v19, %v4457_v31  ;;  %3528 = vtanh.f32 %v4512_v34  ;;  %v4520_v31 = vld [vmem:[#allocation9 + $0xe8] ss:$16 sps:$4 sm:$0xff]   ;;  %v5012_v19 = vld [vmem:[#allocation36_spill] sm:$0xff] }
 0x388   :  { %3530 = vrcp.f32 %v1333_v21  ;;  %v3527_v23 = vpop.eup %3526 }
 0x389   :  { %v4515_v52 = vadd.f32 %v1341_v43, %v1339_v25 }
 0x38b   :  { %3532 = vtanh.f32 %v4515_v52 }
 0x394   :  { %v3529_v10 = vpop.eup %3528 }
 0x395   :  { %v3531_v14 = vpop.eup %3530  ;;  %v1346_v40 = vmul.f32 %v3529_v10, %v3527_v23  ;;  %v5013_v23 = vld [vmem:[#allocation34_spill] sm:$0xff] }
 0x398   :  { %v3533_v22 = vpop.eup %3532 }
 0x399   :  { %v1347_v41 = vmul.f32 %v3533_v22, %v3531_v14  ;;  %v5014_v22 = vld [vmem:[#allocation40_spill] sm:$0xff] }
 0x39b   :  { %v1348_v42 = vpack.c.bf16 %v1347_v41, %v1346_v40 }
 0x39d   :  { %3177 = vst [vmem:[#allocation3 + $0x10] sm:$0xff] %v1348_v42   ;;  %1403 = vmatmul.mubr.bf16.vlgmr.msra.gmra.mxu0 %v1348_v42  ;;  %1446 = vmatmul.mubr.bf16.vlgmr.msra.gmra.mxu1 %v1348_v42  ;;  %v5015_v42 = vld [vmem:[#allocation38_spill] sm:$0xff] }
 0x39e   :  { %1535 = vmatpush1.bf16.msra.mxu0 %v4461_v29  ;;  %1578 = vmatpush1.bf16.msra.mxu1 %v4520_v31 }
 0x39f   :  { %1536 = vmatprep.subr.bf16.mxu0 %v4465_v11  ;;  %1579 = vmatprep.subr.bf16.mxu1 %v4524_v44 }
 0x3a0   :  { %1566 = vmatprep.mubr.bf16.mxu0 %v4996_v13  ;;  %1609 = vmatprep.mubr.bf16.mxu1 %v4996_v13 }
 0x3a2   :  { %1537 = vmatpush1.bf16.msra.mxu0 %v4529_v45  ;;  %1580 = vmatpush1.bf16.msra.mxu1 %v4532_v46 }
 0x3a3   :  { %1538 = vmatprep.subr.bf16.mxu0 %v4535_v47  ;;  %1581 = vmatprep.subr.bf16.mxu1 %v4538_v48 }
 0x3a6   :  { %1539 = vmatpush1.bf16.msra.mxu0 %v4541_v49  ;;  %1582 = vmatpush1.bf16.msra.mxu1 %v4544_v50 }
 0x3a7   :  { %1540 = vmatprep.subr.bf16.mxu0 %v4547_v51  ;;  %1583 = vmatprep.subr.bf16.mxu1 %v4550_v53 }
 0x3aa   :  { %1541 = vmatpush1.bf16.msra.mxu0 %v4553_v54  ;;  %1584 = vmatpush1.bf16.msra.mxu1 %v4556_v55 }
 0x3ab   :  { %1542 = vmatprep.subr.bf16.mxu0 %v4559_v56  ;;  %1585 = vmatprep.subr.bf16.mxu1 %v4562_v57 }
 0x3ae   :  { %1543 = vmatpush1.bf16.msra.mxu0 %v4565_v58  ;;  %1586 = vmatpush1.bf16.msra.mxu1 %v4568_v59 }
 0x3af   :  { %1544 = vmatprep.subr.bf16.mxu0 %v4571_v60  ;;  %1587 = vmatprep.subr.bf16.mxu1 %v4574_v62 }
 0x3b2   :  { %1545 = vmatpush1.bf16.msra.mxu0 %v4577_v63  ;;  %1588 = vmatpush1.bf16.msra.mxu1 %v4580_v1 }
 0x3b3   :  { %1546 = vmatprep.subr.bf16.mxu0 %v4583_v2  ;;  %1589 = vmatprep.subr.bf16.mxu1 %v4586_v3 }
 0x3b6   :  { %1547 = vmatpush1.bf16.msra.mxu0 %v4589_v4  ;;  %1590 = vmatpush1.bf16.msra.mxu1 %v4592_v5 }
 0x3b7   :  { %1548 = vmatprep.subr.bf16.mxu0 %v4595_v32  ;;  %1591 = vmatprep.subr.bf16.mxu1 %v4598_v8 }
 0x3ba   :  { %1549 = vmatpush1.bf16.msra.mxu0 %v4601_v9  ;;  %1592 = vmatpush1.bf16.msra.mxu1 %v4604_v17 }
 0x3bb   :  { %1698 = vmatprep.subr.bf16.mxu0 %v4497_v38  ;;  %1741 = vmatprep.subr.bf16.mxu1 %v4500_v39 }
 0x45d   :  { %v1404_v28 = vpop.f32.mrf.mxu0  ;;  %v1447_v61 = vpop.f32.mrf.mxu1 }
 0x45e   :  { %v1456_v15 = vadd.f32 %v1404_v28, %v5008_v35  ;;  %v1458_v10 = vadd.f32 %v1447_v61, %v5013_v23 }
 0x45f   :  { %v1406_v6 = vpop.f32.mrf.mxu0  ;;  %v1449_v30 = vpop.f32.mrf.mxu1 }
 0x460   :  { %v3072_v7 = vmul.f32 -1.442695, %v1456_v15  ;;  %v1457_v37 = vadd.f32 %v1406_v6, %v5009_v36  ;;  %v1459_v21 = vadd.f32 %v1449_v30, %v5012_v19 }
 0x461   :  { %v1408_v12 = vpop.f32.mrf.mxu0  ;;  %v1451_v33 = vpop.f32.mrf.mxu1 }
 0x462   :  { %3534 = vpow2.f32 %v3072_v7  ;;  %v3074_v24 = vmul.f32 -1.442695, %v1457_v37  ;;  %v1460_v26 = vadd.f32 %v1408_v12, %v5010_v20  ;;  %v3076_v14 = vmul.f32 -1.442695, %v1459_v21 }
 0x463   :  { %v1410_v16 = vpop.f32.mrf.mxu0  ;;  %v1453_v25 = vpop.f32.mrf.mxu1  ;;  %v1462_v28 = vadd.f32 %v1451_v33, %v5015_v42 }
 0x464   :  { %3536 = vpow2.f32 %v3074_v24  ;;  %v3073_v18 = vmul.f32 -1.442695, %v1460_v26  ;;  %v1461_v0 = vadd.f32 %v1410_v16, %v5011_v27  ;;  %v1463_v40 = vadd.f32 %v1453_v25, %v5014_v22 }
 0x466   :  { %3538 = vpow2.f32 %v3073_v18  ;;  %v3075_v43 = vmul.f32 -1.442695, %v1461_v0  ;;  %v3077_v6 = vmul.f32 -1.442695, %v1463_v40 }
 0x468   :  { %3540 = vpow2.f32 %v3075_v43 }
 0x469   :  { %3542 = vtanh.f32 %v1458_v10 }
 0x46a   :  { %3544 = vpow2.f32 %v3076_v14 }
 0x46f   :  { %v3535_v41 = vpop.eup %3534 }
 0x470   :  { %v1470_v35 = vadd.f32 1.0, %v3535_v41 }
 0x471   :  { %v3537_v15 = vpop.eup %3536 }
 0x472   :  { %3546 = vrcp.f32 %v1470_v35  ;;  %v1482_v7 = vadd.f32 1.0, %v3537_v15  ;;  %v5016_v15 = vld [vmem:[#allocation41_spill] sm:$0xff] }
 0x473   :  { %v3539_v36 = vpop.eup %3538  ;;  %3548 = vtanh.f32 %v1462_v28 }
 0x474   :  { %3550 = vrcp.f32 %v1482_v7  ;;  %v1471_v37 = vadd.f32 1.0, %v3539_v36 }
 0x475   :  { %v3541_v12 = vpop.eup %3540  ;;  %3552 = vpow2.f32 %v3077_v6 }
 0x476   :  { %3554 = vrcp.f32 %v1471_v37  ;;  %v1483_v61 = vadd.f32 1.0, %v3541_v12  ;;  %v3543_v24 = vpop.eup %3542  ;;  %v5017_v12 = vld [vmem:[#allocation43_spill] sm:$0xff] }
 0x477   :  { %v3545_v30 = vpop.eup %3544 }
 0x478   :  { %3556 = vrcp.f32 %v1483_v61  ;;  %v1496_v43 = vadd.f32 1.0, %v3545_v30 }
 0x47a   :  { %3558 = vrcp.f32 %v1496_v43 }
 0x47f   :  { %v3547_v20 = vpop.eup %3546 }
 0x480   :  { %v3549_v26 = vpop.eup %3548  ;;  %v1504_v16 = vmul.f32 %v3547_v20, %v3543_v24 }
 0x481   :  { %v3551_v18 = vpop.eup %3550 }
 0x482   :  { %v3553_v27 = vpop.eup %3552  ;;  %v1502_v0 = vmul.f32 %v3551_v18, %v4512_v34 }
 0x483   :  { %v3555_v33 = vpop.eup %3554  ;;  %v1497_v23 = vadd.f32 1.0, %v3553_v27 }
 0x484   :  { %v4618_v19 = vadd.f32 %v1504_v16, %v1502_v0  ;;  %v1505_v21 = vmul.f32 %v3555_v33, %v3549_v26  ;;  %v5018_v26 = vld [vmem:[#allocation45_spill] sm:$0xff]  ;;  %v5019_v0 = vld [vmem:[#allocation47_spill] sm:$0xff] }
 0x485   :  { %v3557_v25 = vpop.eup %3556 }
 0x486   :  { %v1503_v10 = vmul.f32 %v3557_v25, %v4515_v52  ;;  %3560 = vtanh.f32 %v4618_v19  ;;  %v5020_v25 = vld [vmem:[#allocation44_spill] sm:$0xff] }
 0x487   :  { %3562 = vrcp.f32 %v1497_v23  ;;  %v3559_v22 = vpop.eup %3558 }
 0x488   :  { %v4621_v14 = vadd.f32 %v1505_v21, %v1503_v10 }
 0x48a   :  { %3564 = vtanh.f32 %v4621_v14 }
 0x493   :  { %v3561_v40 = vpop.eup %3560 }
 0x494   :  { %v3563_v34 = vpop.eup %3562  ;;  %v1510_v42 = vmul.f32 %v3561_v40, %v3559_v22  ;;  %v5021_v22 = vld [vmem:[#allocation42_spill] sm:$0xff] }
 0x497   :  { %v3565_v41 = vpop.eup %3564 }
 0x498   :  { %v1511_v28 = vmul.f32 %v3565_v41, %v3563_v34  ;;  %v5022_v41 = vld [vmem:[#allocation48_spill] sm:$0xff] }
 0x49a   :  { %v1512_v35 = vpack.c.bf16 %v1511_v28, %v1510_v42 }
 0x49c   :  { %3182 = vst [vmem:[#allocation3 + $0x18] sm:$0xff] %v1512_v35   ;;  %1567 = vmatmul.mubr.bf16.vlgmr.msra.gmra.mxu0 %v1512_v35  ;;  %1610 = vmatmul.mubr.bf16.vlgmr.msra.gmra.mxu1 %v1512_v35  ;;  %v5023_v35 = vld [vmem:[#allocation46_spill] sm:$0xff] }
 0x49d   :  { %1699 = vmatpush1.bf16.msra.mxu0 %v4461_v29  ;;  %1742 = vmatpush1.bf16.msra.mxu1 %v4520_v31 }
 0x49e   :  { %1700 = vmatprep.subr.bf16.mxu0 %v4465_v11  ;;  %1743 = vmatprep.subr.bf16.mxu1 %v4524_v44 }
 0x49f   :  { %1730 = vmatprep.mubr.bf16.mxu0 %v4996_v13  ;;  %1773 = vmatprep.mubr.bf16.mxu1 %v4996_v13 }
 0x4a1   :  { %1701 = vmatpush1.bf16.msra.mxu0 %v4529_v45  ;;  %1744 = vmatpush1.bf16.msra.mxu1 %v4532_v46 }
 0x4a2   :  { %1702 = vmatprep.subr.bf16.mxu0 %v4535_v47  ;;  %1745 = vmatprep.subr.bf16.mxu1 %v4538_v48 }
 0x4a5   :  { %1703 = vmatpush1.bf16.msra.mxu0 %v4541_v49  ;;  %1746 = vmatpush1.bf16.msra.mxu1 %v4544_v50 }
 0x4a6   :  { %1704 = vmatprep.subr.bf16.mxu0 %v4547_v51  ;;  %1747 = vmatprep.subr.bf16.mxu1 %v4550_v53 }
 0x4a9   :  { %1705 = vmatpush1.bf16.msra.mxu0 %v4553_v54  ;;  %1748 = vmatpush1.bf16.msra.mxu1 %v4556_v55 }
 0x4aa   :  { %1706 = vmatprep.subr.bf16.mxu0 %v4559_v56  ;;  %1749 = vmatprep.subr.bf16.mxu1 %v4562_v57 }
 0x4ad   :  { %1707 = vmatpush1.bf16.msra.mxu0 %v4565_v58  ;;  %1750 = vmatpush1.bf16.msra.mxu1 %v4568_v59 }
 0x4ae   :  { %1708 = vmatprep.subr.bf16.mxu0 %v4571_v60  ;;  %1751 = vmatprep.subr.bf16.mxu1 %v4574_v62 }
 0x4b1   :  { %1709 = vmatpush1.bf16.msra.mxu0 %v4577_v63  ;;  %1752 = vmatpush1.bf16.msra.mxu1 %v4580_v1 }
 0x4b2   :  { %1710 = vmatprep.subr.bf16.mxu0 %v4583_v2  ;;  %1753 = vmatprep.subr.bf16.mxu1 %v4586_v3 }
 0x4b5   :  { %1711 = vmatpush1.bf16.msra.mxu0 %v4589_v4  ;;  %1754 = vmatpush1.bf16.msra.mxu1 %v4592_v5 }
 0x4b6   :  { %1712 = vmatprep.subr.bf16.mxu0 %v4595_v32  ;;  %1755 = vmatprep.subr.bf16.mxu1 %v4598_v8 }
 0x4b9   :  { %1713 = vmatpush1.bf16.msra.mxu0 %v4601_v9  ;;  %1756 = vmatpush1.bf16.msra.mxu1 %v4604_v17 }
 0x4ba   :  { %1862 = vmatprep.subr.bf16.mxu0 %v4497_v38  ;;  %1905 = vmatprep.subr.bf16.mxu1 %v4500_v39 }
 0x55c   :  { %v1568_v52 = vpop.f32.mrf.mxu0  ;;  %v1611_v7 = vpop.f32.mrf.mxu1 }
 0x55d   :  { %v1620_v6 = vadd.f32 %v1568_v52, %v5016_v15  ;;  %v1622_v40 = vadd.f32 %v1611_v7, %v5021_v22 }
 0x55e   :  { %v1570_v36 = vpop.f32.mrf.mxu0  ;;  %v1613_v20 = vpop.f32.mrf.mxu1 }
 0x55f   :  { %v3080_v37 = vmul.f32 -1.442695, %v1620_v6  ;;  %v1621_v61 = vadd.f32 %v1570_v36, %v5017_v12  ;;  %v1623_v23 = vadd.f32 %v1613_v20, %v5020_v25 }
 0x560   :  { %v1572_v24 = vpop.f32.mrf.mxu0  ;;  %v1615_v43 = vpop.f32.mrf.mxu1 }
 0x561   :  { %3566 = vpow2.f32 %v3080_v37  ;;  %v3082_v30 = vmul.f32 -1.442695, %v1621_v61  ;;  %v1624_v16 = vadd.f32 %v1572_v24, %v5018_v26  ;;  %v3084_v34 = vmul.f32 -1.442695, %v1623_v23 }
 0x562   :  { %v1574_v18 = vpop.f32.mrf.mxu0  ;;  %v1617_v10 = vpop.f32.mrf.mxu1  ;;  %v1626_v52 = vadd.f32 %v1615_v43, %v5023_v35 }
 0x563   :  { %3568 = vpow2.f32 %v3082_v30  ;;  %v3081_v27 = vmul.f32 -1.442695, %v1624_v16  ;;  %v1625_v33 = vadd.f32 %v1574_v18, %v5019_v0  ;;  %v1627_v42 = vadd.f32 %v1617_v10, %v5022_v41 }
 0x565   :  { %3570 = vpow2.f32 %v3081_v27  ;;  %v3083_v21 = vmul.f32 -1.442695, %v1625_v33  ;;  %v3085_v36 = vmul.f32 -1.442695, %v1627_v42 }
 0x567   :  { %3572 = vpow2.f32 %v3083_v21 }
 0x568   :  { %3574 = vtanh.f32 %v1622_v40 }
 0x569   :  { %3576 = vpow2.f32 %v3084_v34 }
 0x56e   :  { %v3567_v28 = vpop.eup %3566 }
 0x56f   :  { %v1634_v15 = vadd.f32 1.0, %v3567_v28 }
 0x570   :  { %v3569_v6 = vpop.eup %3568 }
 0x571   :  { %3578 = vrcp.f32 %v1634_v15  ;;  %v1646_v37 = vadd.f32 1.0, %v3569_v6  ;;  %v5024_v6 = vld [vmem:[#allocation49_spill] sm:$0xff] }
 0x572   :  { %v3571_v12 = vpop.eup %3570  ;;  %3580 = vtanh.f32 %v1626_v52 }
 0x573   :  { %3582 = vrcp.f32 %v1646_v37  ;;  %v1635_v61 = vadd.f32 1.0, %v3571_v12 }
 0x574   :  { %v3573_v24 = vpop.eup %3572  ;;  %3584 = vpow2.f32 %v3085_v36 }
 0x575   :  { %3586 = vrcp.f32 %v1635_v61  ;;  %v1647_v7 = vadd.f32 1.0, %v3573_v24  ;;  %v3575_v30 = vpop.eup %3574  ;;  %v5025_v24 = vld [vmem:[#allocation51_spill] sm:$0xff] }
 0x576   :  { %v3577_v20 = vpop.eup %3576 }
 0x577   :  { %3588 = vrcp.f32 %v1647_v7  ;;  %v1660_v21 = vadd.f32 1.0, %v3577_v20 }
 0x579   :  { %3590 = vrcp.f32 %v1660_v21  ;;  %v5028_v21 = vld [vmem:[#allocation52_spill] sm:$0xff] }
 0x57e   :  { %v3579_v26 = vpop.eup %3578 }
 0x57f   :  { %v3581_v16 = vpop.eup %3580  ;;  %v1668_v18 = vmul.f32 %v3579_v26, %v3575_v30 }
 0x580   :  { %v3583_v27 = vpop.eup %3582 }
 0x581   :  { %v3585_v0 = vpop.eup %3584  ;;  %v1666_v33 = vmul.f32 %v3583_v27, %v4618_v19 }
 0x582   :  { %v3587_v43 = vpop.eup %3586  ;;  %v1661_v22 = vadd.f32 1.0, %v3585_v0 }
 0x583   :  { %v4668_v25 = vadd.f32 %v1668_v18, %v1666_v33  ;;  %v1669_v23 = vmul.f32 %v3587_v43, %v3581_v16  ;;  %v5026_v16 = vld [vmem:[#allocation53_spill] sm:$0xff] }
 0x584   :  { %v3589_v10 = vpop.eup %3588 }
 0x585   :  { %v1667_v40 = vmul.f32 %v3589_v10, %v4621_v14  ;;  %3592 = vtanh.f32 %v4668_v25 }
 0x586   :  { %3594 = vrcp.f32 %v1661_v22  ;;  %v3591_v41 = vpop.eup %3590  ;;  %v5029_v22 = vld [vmem:[#allocation50_spill] sm:$0xff] }
 0x587   :  { %v4671_v34 = vadd.f32 %v1669_v23, %v1667_v40 }
 0x589   :  { %3596 = vtanh.f32 %v4671_v34 }
 0x592   :  { %v3593_v42 = vpop.eup %3592 }
 0x593   :  { %v3595_v19 = vpop.eup %3594  ;;  %v1674_v35 = vmul.f32 %v3593_v42, %v3591_v41  ;;  %v5030_v42 = vld [vmem:[#allocation56_spill] sm:$0xff] }
 0x596   :  { %v3597_v28 = vpop.eup %3596 }
 0x597   :  { %v1675_v52 = vmul.f32 %v3597_v28, %v3595_v19 }
 0x599   :  { %v1676_v15 = vpack.c.bf16 %v1675_v52, %v1674_v35  ;;  %v5031_v35 = vld [vmem:[#allocation54_spill] sm:$0xff] }
 0x59b   :  { %3187 = vst [vmem:[#allocation3 + $0x20] sm:$0xff] %v1676_v15   ;;  %1731 = vmatmul.mubr.bf16.vlgmr.msra.gmra.mxu0 %v1676_v15  ;;  %1774 = vmatmul.mubr.bf16.vlgmr.msra.gmra.mxu1 %v1676_v15 }
 0x59c   :  { %1863 = vmatpush1.bf16.msra.mxu0 %v4461_v29  ;;  %1906 = vmatpush1.bf16.msra.mxu1 %v4520_v31 }
 0x59d   :  { %1864 = vmatprep.subr.bf16.mxu0 %v4465_v11  ;;  %1907 = vmatprep.subr.bf16.mxu1 %v4524_v44 }
 0x59e   :  { %1894 = vmatprep.mubr.bf16.mxu0 %v4996_v13  ;;  %1937 = vmatprep.mubr.bf16.mxu1 %v4996_v13 }
 0x5a0   :  { %1865 = vmatpush1.bf16.msra.mxu0 %v4529_v45  ;;  %1908 = vmatpush1.bf16.msra.mxu1 %v4532_v46 }
 0x5a1   :  { %1866 = vmatprep.subr.bf16.mxu0 %v4535_v47  ;;  %1909 = vmatprep.subr.bf16.mxu1 %v4538_v48 }
 0x5a4   :  { %1867 = vmatpush1.bf16.msra.mxu0 %v4541_v49  ;;  %1910 = vmatpush1.bf16.msra.mxu1 %v4544_v50 }
 0x5a5   :  { %1868 = vmatprep.subr.bf16.mxu0 %v4547_v51  ;;  %1911 = vmatprep.subr.bf16.mxu1 %v4550_v53 }
 0x5a8   :  { %1869 = vmatpush1.bf16.msra.mxu0 %v4553_v54  ;;  %1912 = vmatpush1.bf16.msra.mxu1 %v4556_v55 }
 0x5a9   :  { %1870 = vmatprep.subr.bf16.mxu0 %v4559_v56  ;;  %1913 = vmatprep.subr.bf16.mxu1 %v4562_v57 }
 0x5ac   :  { %1871 = vmatpush1.bf16.msra.mxu0 %v4565_v58  ;;  %1914 = vmatpush1.bf16.msra.mxu1 %v4568_v59 }
 0x5ad   :  { %1872 = vmatprep.subr.bf16.mxu0 %v4571_v60  ;;  %1915 = vmatprep.subr.bf16.mxu1 %v4574_v62 }
 0x5b0   :  { %1873 = vmatpush1.bf16.msra.mxu0 %v4577_v63  ;;  %1916 = vmatpush1.bf16.msra.mxu1 %v4580_v1 }
 0x5b1   :  { %1874 = vmatprep.subr.bf16.mxu0 %v4583_v2  ;;  %1917 = vmatprep.subr.bf16.mxu1 %v4586_v3 }
 0x5b4   :  { %1875 = vmatpush1.bf16.msra.mxu0 %v4589_v4  ;;  %1918 = vmatpush1.bf16.msra.mxu1 %v4592_v5 }
 0x5b5   :  { %1876 = vmatprep.subr.bf16.mxu0 %v4595_v32  ;;  %1919 = vmatprep.subr.bf16.mxu1 %v4598_v8 }
 0x5b8   :  { %1877 = vmatpush1.bf16.msra.mxu0 %v4601_v9  ;;  %1920 = vmatpush1.bf16.msra.mxu1 %v4604_v17 }
 0x5b9   :  { %2026 = vmatprep.subr.bf16.mxu0 %v4497_v38  ;;  %2069 = vmatprep.subr.bf16.mxu1 %v4500_v39  ;;  %v5027_v38 = vld [vmem:[#allocation55_spill] sm:$0xff] }
 0x65b   :  { %v1732_v14 = vpop.f32.mrf.mxu0  ;;  %v1775_v37 = vpop.f32.mrf.mxu1 }
 0x65c   :  { %v1784_v36 = vadd.f32 %v1732_v14, %v5024_v6  ;;  %v1786_v40 = vadd.f32 %v1775_v37, %v5029_v22 }
 0x65d   :  { %v1734_v12 = vpop.f32.mrf.mxu0  ;;  %v1777_v26 = vpop.f32.mrf.mxu1 }
 0x65e   :  { %v3088_v61 = vmul.f32 -1.442695, %v1784_v36  ;;  %v1785_v7 = vadd.f32 %v1734_v12, %v5025_v24  ;;  %v1787_v23 = vadd.f32 %v1777_v26, %v5028_v21 }
 0x65f   :  { %v1736_v30 = vpop.f32.mrf.mxu0  ;;  %v1779_v39 = vpop.f32.mrf.mxu1 }
 0x660   :  { %3598 = vpow2.f32 %v3088_v61  ;;  %v3090_v20 = vmul.f32 -1.442695, %v1785_v7  ;;  %v1788_v18 = vadd.f32 %v1736_v30, %v5026_v16  ;;  %v3092_v41 = vmul.f32 -1.442695, %v1787_v23 }
 0x661   :  { %v1738_v27 = vpop.f32.mrf.mxu0  ;;  %v1781_v10 = vpop.f32.mrf.mxu1  ;;  %v1790_v52 = vadd.f32 %v1779_v39, %v5031_v35 }
 0x662   :  { %3600 = vpow2.f32 %v3090_v20  ;;  %v3089_v0 = vmul.f32 -1.442695, %v1788_v18  ;;  %v1789_v33 = vadd.f32 %v1738_v27, %v5027_v38  ;;  %v1791_v19 = vadd.f32 %v1781_v10, %v5030_v42 }
 0x664   :  { %3602 = vpow2.f32 %v3089_v0  ;;  %v3091_v43 = vmul.f32 -1.442695, %v1789_v33  ;;  %v3093_v6 = vmul.f32 -1.442695, %v1791_v19 }
 0x666   :  { %3604 = vpow2.f32 %v3091_v43 }
 0x667   :  { %3606 = vtanh.f32 %v1786_v40 }
 0x668   :  { %3608 = vpow2.f32 %v3092_v41 }
 0x66d   :  { %v3599_v28 = vpop.eup %3598 }
 0x66e   :  { %v1798_v15 = vadd.f32 1.0, %v3599_v28 }
 0x66f   :  { %v3601_v14 = vpop.eup %3600 }
 0x670   :  { %3610 = vrcp.f32 %v1798_v15  ;;  %v1810_v36 = vadd.f32 1.0, %v3601_v14 }
 0x671   :  { %v3603_v12 = vpop.eup %3602  ;;  %3612 = vtanh.f32 %v1790_v52 }
 0x672   :  { %3614 = vrcp.f32 %v1810_v36  ;;  %v1799_v61 = vadd.f32 1.0, %v3603_v12 }
 0x673   :  { %v3605_v24 = vpop.eup %3604  ;;  %3616 = vpow2.f32 %v3093_v6 }
 0x674   :  { %3618 = vrcp.f32 %v1799_v61  ;;  %v1811_v37 = vadd.f32 1.0, %v3605_v24  ;;  %v3607_v7 = vpop.eup %3606 }
 0x675   :  { %v3609_v30 = vpop.eup %3608 }
 0x676   :  { %3620 = vrcp.f32 %v1811_v37  ;;  %v1824_v33 = vadd.f32 1.0, %v3609_v30 }
 0x678   :  { %3622 = vrcp.f32 %v1824_v33 }
 0x67d   :  { %v3611_v20 = vpop.eup %3610 }
 0x67e   :  { %v3613_v26 = vpop.eup %3612  ;;  %v1832_v16 = vmul.f32 %v3611_v20, %v3607_v7 }
 0x67f   :  { %v3615_v18 = vpop.eup %3614 }
 0x680   :  { %v3617_v27 = vpop.eup %3616  ;;  %v1830_v0 = vmul.f32 %v3615_v18, %v4668_v25 }
 0x681   :  { %v3619_v38 = vpop.eup %3618  ;;  %v1825_v23 = vadd.f32 1.0, %v3617_v27 }
 0x682   :  { %v4718_v39 = vadd.f32 %v1832_v16, %v1830_v0  ;;  %v1833_v43 = vmul.f32 %v3619_v38, %v3613_v26 }
 0x683   :  { %v3621_v21 = vpop.eup %3620 }
 0x684   :  { %v1831_v10 = vmul.f32 %v3621_v21, %v4671_v34  ;;  %3624 = vtanh.f32 %v4718_v39 }
 0x685   :  { %3626 = vrcp.f32 %v1825_v23  ;;  %v3623_v40 = vpop.eup %3622 }
 0x686   :  { %v4721_v22 = vadd.f32 %v1833_v43, %v1831_v10 }
 0x688   :  { %3628 = vtanh.f32 %v4721_v22 }
 0x691   :  { %v3625_v41 = vpop.eup %3624 }
 0x692   :  { %v3627_v25 = vpop.eup %3626  ;;  %v1838_v19 = vmul.f32 %v3625_v41, %v3623_v40 }
 0x695   :  { %v3629_v42 = vpop.eup %3628 }
 0x696   :  { %v1839_v28 = vmul.f32 %v3629_v42, %v3627_v25 }
 0x698   :  { %v1840_v35 = vpack.c.bf16 %v1839_v28, %v1838_v19  ;;  %v4776_v28 = vld [vmem:[#allocation3] sm:$0xff]  }
 0x69a   :  { %3192 = vst [vmem:[#allocation3 + $0x28] sm:$0xff] %v1840_v35   ;;  %1895 = vmatmul.mubr.bf16.vlgmr.msra.gmra.mxu0 %v1840_v35  ;;  %1938 = vmatmul.mubr.bf16.vlgmr.msra.gmra.mxu1 %v1840_v35 }
 0x69b   :  { %2027 = vmatpush1.bf16.msra.mxu0 %v4461_v29  ;;  %2070 = vmatpush1.bf16.msra.mxu1 %v4520_v31 }
 0x69c   :  { %2028 = vmatprep.subr.bf16.mxu0 %v4465_v11  ;;  %2071 = vmatprep.subr.bf16.mxu1 %v4524_v44  ;;  %v5032_v11 = vld [vmem:[#allocation57_spill] sm:$0xff] }
 0x69d   :  { %2058 = vmatprep.mubr.bf16.mxu0 %v4996_v13  ;;  %2101 = vmatprep.mubr.bf16.mxu1 %v4996_v13  ;;  %v4757_v13 = vld [vmem:[#allocation10 + $0x38] sm:$0xff]  }
 0x69f   :  { %2029 = vmatpush1.bf16.msra.mxu0 %v4529_v45  ;;  %2072 = vmatpush1.bf16.msra.mxu1 %v4532_v46 }
 0x6a0   :  { %2030 = vmatprep.subr.bf16.mxu0 %v4535_v47  ;;  %2073 = vmatprep.subr.bf16.mxu1 %v4538_v48  ;;  %v5033_v47 = vld [vmem:[#allocation59_spill] sm:$0xff] }
 0x6a3   :  { %2031 = vmatpush1.bf16.msra.mxu0 %v4541_v49  ;;  %2074 = vmatpush1.bf16.msra.mxu1 %v4544_v50 }
 0x6a4   :  { %2032 = vmatprep.subr.bf16.mxu0 %v4547_v51  ;;  %2075 = vmatprep.subr.bf16.mxu1 %v4550_v53  ;;  %v5034_v53 = vld [vmem:[#allocation61_spill] sm:$0xff] }
 0x6a7   :  { %2033 = vmatpush1.bf16.msra.mxu0 %v4553_v54  ;;  %2076 = vmatpush1.bf16.msra.mxu1 %v4556_v55 }
 0x6a8   :  { %2034 = vmatprep.subr.bf16.mxu0 %v4559_v56  ;;  %2077 = vmatprep.subr.bf16.mxu1 %v4562_v57  ;;  %v5035_v57 = vld [vmem:[#allocation63_spill] sm:$0xff] }
 0x6ab   :  { %2035 = vmatpush1.bf16.msra.mxu0 %v4565_v58  ;;  %2078 = vmatpush1.bf16.msra.mxu1 %v4568_v59 }
 0x6ac   :  { %2036 = vmatprep.subr.bf16.mxu0 %v4571_v60  ;;  %2079 = vmatprep.subr.bf16.mxu1 %v4574_v62  ;;  %v5036_v62 = vld [vmem:[#allocation60_spill] sm:$0xff] }
 0x6af   :  { %2037 = vmatpush1.bf16.msra.mxu0 %v4577_v63  ;;  %2080 = vmatpush1.bf16.msra.mxu1 %v4580_v1 }
 0x6b0   :  { %2038 = vmatprep.subr.bf16.mxu0 %v4583_v2  ;;  %2081 = vmatprep.subr.bf16.mxu1 %v4586_v3  ;;  %v5037_v2 = vld [vmem:[#allocation58_spill] sm:$0xff] }
 0x6b3   :  { %2039 = vmatpush1.bf16.msra.mxu0 %v4589_v4  ;;  %2082 = vmatpush1.bf16.msra.mxu1 %v4592_v5  ;;  %v5038_v5 = vld [vmem:[#allocation64_spill] sm:$0xff] }
 0x6b4   :  { %2040 = vmatprep.subr.bf16.mxu0 %v4595_v32  ;;  %2083 = vmatprep.subr.bf16.mxu1 %v4598_v8 }
 0x6b7   :  { %2041 = vmatpush1.bf16.msra.mxu0 %v4601_v9  ;;  %2084 = vmatpush1.bf16.msra.mxu1 %v4604_v17  ;;  %v5039_v9 = vld [vmem:[#allocation62_spill] sm:$0xff] }
 0x6b8   :  { %3233 = vmatprep.subr.bf16.mxu0 %v4757_v13 }
 0x75a   :  { %v1896_v29 = vpop.f32.mrf.mxu0  ;;  %v1939_v44 = vpop.f32.mrf.mxu1 }
 0x75b   :  { %v1948_v31 = vadd.f32 %v1896_v29, %v5032_v11  ;;  %v1950_v3 = vadd.f32 %v1939_v44, %v5037_v2  ;;  %v3408_v29 = vld [vmem:[#allocation10 + $0x30] sm:$0xff]   ;;  %v3410_v11 = vld [vmem:[#allocation10 + $0x20] sm:$0xff]  }
 0x75c   :  { %v1898_v45 = vpop.f32.mrf.mxu0  ;;  %v1941_v51 = vpop.f32.mrf.mxu1  ;;  %v3412_v44 = vld [vmem:[#allocation10 + $0x10] sm:$0xff]  }
 0x75d   :  { %v3096_v46 = vmul.f32 -1.442695, %v1948_v31  ;;  %v1949_v48 = vadd.f32 %v1898_v45, %v5033_v47  ;;  %v1951_v63 = vadd.f32 %v1941_v51, %v5036_v62  ;;  %v3411_v31 = vld [vmem:[#allocation10 + $0x18] sm:$0xff]   ;;  %v3413_v45 = vld [vmem:[#allocation10 + $0x8] sm:$0xff]   ;;  %v4782_v47 = vld [vmem:[#allocation3 + $0x10] sm:$0xff]  }
 0x75e   :  { %v1900_v49 = vpop.f32.mrf.mxu0  ;;  %v1943_v59 = vpop.f32.mrf.mxu1 }
 0x75f   :  { %3630 = vpow2.f32 %v3096_v46  ;;  %v3098_v50 = vmul.f32 -1.442695, %v1949_v48  ;;  %v1952_v54 = vadd.f32 %v1900_v49, %v5034_v53  ;;  %v3100_v4 = vmul.f32 -1.442695, %v1951_v63  ;;  %v3414_v46 = vld [vmem:[#allocation10] sm:$0xff]   ;;  %v4786_v48 = vld [vmem:[#allocation3 + $0x18] sm:$0xff]  }
 0x760   :  { %v1902_v55 = vpop.f32.mrf.mxu0  ;;  %v1945_v1 = vpop.f32.mrf.mxu1  ;;  %v1954_v17 = vadd.f32 %v1943_v59, %v5039_v9  ;;  %v4788_v49 = vld [vmem:[#allocation3 + $0x20] sm:$0xff]   ;;  %v5041_v63 = vld [vmem:[#allocation67_spill] sm:$0xff] }
 0x761   :  { %3632 = vpow2.f32 %v3098_v50  ;;  %v3097_v56 = vmul.f32 -1.442695, %v1952_v54  ;;  %v1953_v58 = vadd.f32 %v1902_v55, %v5035_v57  ;;  %v1955_v32 = vadd.f32 %v1945_v1, %v5038_v5  ;;  %v4792_v50 = vld [vmem:[#allocation3 + $0x28] sm:$0xff]   ;;  %v2485_v53 = vld [vmem:[%s4924_s1] sm:$0xff]  ;;  %v5040_v57 = vld [vmem:[#allocation65_spill] sm:$0xff] }
 0x762   :  { %2489 = vperm.xlu0 %3301, %v2485_v53   ;;  %v2486_v54 = vld [vmem:[%s4924_s1 + $0x8] sm:$0xff]  ;;  %v3930_v55 = vmov 0.0   ;;  %v5042_v5 = vld [vmem:[#allocation69_spill] sm:$0xff] }
 0x763   :  { %3634 = vpow2.f32 %v3097_v56  ;;  %v3099_v60 = vmul.f32 -1.442695, %v1953_v58  ;;  %v3101_v15 = vmul.f32 -1.442695, %v1955_v32  ;;  %3265 = vmatprep.subr.bf16.mxu1 %v3930_v55 }
 0x765   :  { %3636 = vpow2.f32 %v3099_v60 }
 0x766   :  { %3638 = vtanh.f32 %v1950_v3  ;;  %2494 = vperm.xlu0 %3301, %v2486_v54  }
 0x767   :  { %3640 = vpow2.f32 %v3100_v4 }
 0x76c   :  { %v3631_v8 = vpop.eup %3630 }
 0x76d   :  { %v1962_v34 = vadd.f32 1.0, %v3631_v8 }
 0x76e   :  { %v3633_v52 = vpop.eup %3632 }
 0x76f   :  { %3642 = vrcp.f32 %v1962_v34  ;;  %v1974_v14 = vadd.f32 1.0, %v3633_v52 }
 0x770   :  { %v3635_v6 = vpop.eup %3634  ;;  %3644 = vtanh.f32 %v1954_v17  ;;  %v5043_v17 = vld [vmem:[#allocation71_spill] sm:$0xff] }
 0x771   :  { %3646 = vrcp.f32 %v1974_v14  ;;  %v1963_v36 = vadd.f32 1.0, %v3635_v6  ;;  %v5044_v14 = vld [vmem:[#allocation68_spill] sm:$0xff] }
 0x772   :  { %v3637_v12 = vpop.eup %3636  ;;  %3648 = vpow2.f32 %v3101_v15 }
 0x773   :  { %3650 = vrcp.f32 %v1963_v36  ;;  %v1975_v61 = vadd.f32 1.0, %v3637_v12  ;;  %v3639_v24 = vpop.eup %3638  ;;  %v5045_v12 = vld [vmem:[#allocation66_spill] sm:$0xff] }
 0x774   :  { %v3641_v37 = vpop.eup %3640 }
 0x775   :  { %3652 = vrcp.f32 %v1975_v61  ;;  %v1988_v0 = vadd.f32 1.0, %v3641_v37  ;;  %v5046_v37 = vld [vmem:[#allocation72_spill] sm:$0xff] }
 0x777   :  { %3654 = vrcp.f32 %v1988_v0 }
 0x77c   :  { %v3643_v7 = vpop.eup %3642 }
 0x77d   :  { %v3645_v30 = vpop.eup %3644  ;;  %v1996_v20 = vmul.f32 %v3643_v7, %v3639_v24 }
 0x77e   :  { %v3647_v26 = vpop.eup %3646 }
 0x77f   :  { %v3649_v16 = vpop.eup %3648  ;;  %v1994_v18 = vmul.f32 %v3647_v26, %v4718_v39 }
 0x780   :  { %v3651_v27 = vpop.eup %3650  ;;  %v1989_v21 = vadd.f32 1.0, %v3649_v16 }
 0x781   :  { %v4769_v38 = vadd.f32 %v1996_v20, %v1994_v18  ;;  %v1997_v33 = vmul.f32 %v3651_v27, %v3645_v30  ;;  %v5047_v20 = vld [vmem:[#allocation70_spill] sm:$0xff] }
 0x782   :  { %v3653_v43 = vpop.eup %3652 }
 0x783   :  { %v1995_v23 = vmul.f32 %v3653_v43, %v4721_v22  ;;  %3656 = vtanh.f32 %v4769_v38  ;;  %v3409_v22 = vld [vmem:[#allocation10 + $0x28] sm:$0xff]  }
 0x784   :  { %3658 = vrcp.f32 %v1989_v21  ;;  %v3655_v40 = vpop.eup %3654 }
 0x785   :  { %v4772_v10 = vadd.f32 %v1997_v33, %v1995_v23 }
 0x787   :  { %3660 = vtanh.f32 %v4772_v10 }
 0x790   :  { %v3657_v41 = vpop.eup %3656 }
 0x791   :  { %v3659_v39 = vpop.eup %3658  ;;  %v2002_v42 = vmul.f32 %v3657_v41, %v3655_v40  ;;  %v4816_v40 = vld [vmem:[%s4929_s6] ss:$0 sm:$0xff] }
 0x794   :  { %v3661_v25 = vpop.eup %3660 }
 0x795   :  { %v2003_v19 = vmul.f32 %v3661_v25, %v3659_v39 }
 0x797   :  { %v2004_v35 = vpack.c.bf16 %v2003_v19, %v2002_v42 }
 0x799   :  { %3197 = vst [vmem:[#allocation3 + $0x30] sm:$0xff] %v2004_v35   ;;  %2059 = vmatmul.mubr.bf16.vlgmr.msra.gmra.mxu0 %v2004_v35  ;;  %2102 = vmatmul.mubr.bf16.vlgmr.msra.gmra.mxu1 %v2004_v35 }
 0x79a   :  { %3234 = vmatpush3.bf16.msra.mxu0 %v4757_v13  ;;  %3249 = vmatprep.mubr.bf16.mxu0 %v4776_v28  ;;  %v4780_v13 = vld [vmem:[#allocation3 + $0x8] sm:$0xff]  }
 0x79b   :  { %3235 = vmatprep.subr.bf16.mxu0 %v3408_v29  ;;  %3281 = vmatprep.mubr.msk.bf16.mxu1 %vm3931_vm12, %v3930_v55 }
 0x79e   :  { %3236 = vmatpush3.bf16.msra.mxu0 %v3408_v29 }
 0x79f   :  { %3237 = vmatprep.subr.bf16.mxu0 %v3409_v22 }
 0x7a0   :  { %v4794_v51 = vld [vmem:[#allocation3 + $0x30] sm:$0xff]  }
 0x7a2   :  { %3238 = vmatpush3.bf16.msra.mxu0 %v3409_v22 }
 0x7a3   :  { %3239 = vmatprep.subr.bf16.mxu0 %v3410_v11 }
 0x7a6   :  { %3240 = vmatpush3.bf16.msra.mxu0 %v3410_v11 }
 0x7a7   :  { %3241 = vmatprep.subr.bf16.mxu0 %v3411_v31 }
 0x7aa   :  { %3242 = vmatpush3.bf16.msra.mxu0 %v3411_v31 }
 0x7ab   :  { %3243 = vmatprep.subr.bf16.mxu0 %v3412_v44 }
 0x7ae   :  { %3244 = vmatpush3.bf16.msra.mxu0 %v3412_v44 }
 0x7af   :  { %3245 = vmatprep.subr.bf16.mxu0 %v3413_v45 }
 0x7b2   :  { %3246 = vmatpush3.bf16.msra.mxu0 %v3413_v45 }
 0x7b3   :  { %3247 = vmatprep.subr.bf16.mxu0 %v3414_v46 }
 0x7b6   :  { %3248 = vmatpush3.bf16.msra.mxu0 %v3414_v46 }
 0x7b9   :  { %3250 = vmatmul.mubr.bf16.vlgmr.msra.gmra.mxu0 %v4780_v13 }
 0x7ba   :  { %3253 = vmatprep.mubr.bf16.mxu0 %v4782_v47 }
 0x7c1   :  { %3254 = vmatmul.mubr.bf16.gmra.mxu0 %v4786_v48 }
 0x7c2   :  { %3257 = vmatprep.mubr.bf16.mxu0 %v4788_v49 }
 0x7c9   :  { %3258 = vmatmul.mubr.bf16.gmra.mxu0 %v4792_v50 }
 0x7ca   :  { %3261 = vmatprep.mubr.bf16.mxu0 %v4794_v51 }
 0x859   :  { %v2060_v56 = vpop.f32.mrf.mxu0  ;;  %v2103_v59 = vpop.f32.mrf.mxu1 }
 0x85a   :  { %v2112_v58 = vadd.f32 %v2060_v56, %v5040_v57  ;;  %v2114_v61 = vadd.f32 %v2103_v59, %v5045_v12 }
 0x85b   :  { %v2062_v60 = vpop.f32.mrf.mxu0  ;;  %v2105_v4 = vpop.f32.mrf.mxu1 }
 0x85c   :  { %v3104_v62 = vmul.f32 -1.442695, %v2112_v58  ;;  %v2113_v1 = vadd.f32 %v2062_v60, %v5041_v63  ;;  %v2115_v6 = vadd.f32 %v2105_v4, %v5044_v14 }
 0x85d   :  { %v2064_v2 = vpop.f32.mrf.mxu0  ;;  %v2107_v52 = vpop.f32.mrf.mxu1 }
 0x85e   :  { %3662 = vpow2.f32 %v3104_v62  ;;  %v3106_v3 = vmul.f32 -1.442695, %v2113_v1  ;;  %v2116_v32 = vadd.f32 %v2064_v2, %v5042_v5  ;;  %v3108_v24 = vmul.f32 -1.442695, %v2115_v6 }
 0x85f   :  { %v2066_v8 = vpop.f32.mrf.mxu0  ;;  %v2109_v36 = vpop.f32.mrf.mxu1  ;;  %v2118_v26 = vadd.f32 %v2107_v52, %v5047_v20 }
 0x860   :  { %3664 = vpow2.f32 %v3106_v3  ;;  %v3105_v9 = vmul.f32 -1.442695, %v2116_v32  ;;  %v2117_v34 = vadd.f32 %v2066_v8, %v5043_v17  ;;  %v2119_v7 = vadd.f32 %v2109_v36, %v5046_v37  ;;  %v4828_v8 = vld [vmem:[%s4930_s7] ss:$0 sm:$0xff]  ;;  %s3932_s7 = smov [#allocation13]  }
 0x861   :  { %s2939_s12 = sshll.u32 %s3932_s7, 4  ;;  %s2940_s12 = int_to_ptr.vmem [resolvable:$true] %s2939_s12 }
 0x862   :  { %3666 = vpow2.f32 %v3105_v9  ;;  %v3107_v15 = vmul.f32 -1.442695, %v2117_v34  ;;  %v3109_v27 = vmul.f32 -1.442695, %v2119_v7  ;;  %s3870_s13 = scalar_lea.vmem %s2940_s12, 128  ;;  %p3875_p12 = scmp.lt.s32.totalorder %s2940_s12, %s2940_s12 }
 0x863   :  { %p3871_p11 = scmp.ne.s32.totalorder %s2940_s12, %s3870_s13  ;;  %p3876_p13 = scmp.lt.s32.totalorder %s3870_s13, %s3870_s13 }
 0x864   :  { %3668 = vpow2.f32 %v3107_v15 }
 0x865   :  { %3670 = vtanh.f32 %v2114_v61  ;;  %p3877_p0 = por %p3876_p13, %p3875_p12 }
 0x866   :  { %3672 = vpow2.f32 %v3108_v24 }
 0x867   :  { %p3878_p1 = pnand %p3877_p0, %p3871_p11 }
 0x86b   :  { %v3663_v30 = vpop.eup %3662 }
 0x86c   :  { %v2126_v16 = vadd.f32 1.0, %v3663_v30 }
 0x86d   :  { %v3665_v18 = vpop.eup %3664 }
 0x86e   :  { %3674 = vrcp.f32 %v2126_v16  ;;  %v2138_v0 = vadd.f32 1.0, %v3665_v18 }
 0x86f   :  { %v3667_v33 = vpop.eup %3666  ;;  %3676 = vtanh.f32 %v2118_v26 }
 0x870   :  { %3678 = vrcp.f32 %v2138_v0  ;;  %v2127_v43 = vadd.f32 1.0, %v3667_v33 }
 0x871   :  { %v3669_v21 = vpop.eup %3668  ;;  %3680 = vpow2.f32 %v3109_v27 }
 0x872   :  { %3682 = vrcp.f32 %v2127_v43  ;;  %v2139_v23 = vadd.f32 1.0, %v3669_v21  ;;  %v3671_v41 = vpop.eup %3670 }
 0x873   :  { %v3673_v25 = vpop.eup %3672 }
 0x874   :  { %3684 = vrcp.f32 %v2139_v23  ;;  %v2152_v44 = vadd.f32 1.0, %v3673_v25 }
 0x879   :  { %v3251_v39 = vpop.f32.mrf.mxu0 }
 0x87a   :  { %v2357_v42 = vadd.f32 %v3251_v39, %v4816_v40 }
 0x87b   :  { %v3675_v19 = vpop.eup %3674  ;;  %v2348_v35 = vpop.f32.mrf.mxu0 }
 0x87c   :  { %v3677_v29 = vpop.eup %3676  ;;  %v2160_v22 = vmul.f32 %v3675_v19, %v3671_v41  ;;  %3686 = vtanh.f32 %v2357_v42  ;;  %v2349_v11 = vadd.f32 %v4816_v40, %v2348_v35 }
 0x87d   :  { %v3679_v31 = vpop.eup %3678  ;;  %v3252_v45 = vpop.f32.mrf.mxu0 }
 0x87e   :  { %v3681_v46 = vpop.eup %3680  ;;  %v2158_v53 = vmul.f32 %v3679_v31, %v4769_v38  ;;  %3688 = vtanh.f32 %v2349_v11  ;;  %v2360_v54 = vadd.f32 %v3252_v45, %v4816_v40 }
 0x87f   :  { %v3683_v56 = vpop.eup %3682  ;;  %v2351_v57 = vpop.f32.mrf.mxu0  ;;  %v2153_v63 = vadd.f32 1.0, %v3681_v46 }
 0x880   :  { %v2162_v58 = vadd.f32 %v2160_v22, %v2158_v53  ;;  %v2161_v59 = vmul.f32 %v3683_v56, %v3677_v29  ;;  %3690 = vtanh.f32 %v2360_v54  ;;  %v2352_v60 = vadd.f32 %v4816_v40, %v2351_v57 }
 0x881   :  { %v3685_v62 = vpop.eup %3684  ;;  %3692 = vrcp.f32 %v2152_v44  ;;  %v3255_v1 = vpop.f32.mrf.mxu0 }
 0x882   :  { %3694 = vtanh.f32 %v2162_v58  ;;  %v2159_v2 = vmul.f32 %v3685_v62, %v4772_v10  ;;  %v2373_v38 = vadd.f32 %v3255_v1, %v4816_v40 }
 0x883   :  { %v2364_v3 = vpop.f32.mrf.mxu0  ;;  %3696 = vtanh.f32 %v2352_v60 }
 0x884   :  { %v2163_v4 = vadd.f32 %v2161_v59, %v2159_v2  ;;  %3698 = vrcp.f32 %v2153_v63  ;;  %v2365_v9 = vadd.f32 %v4816_v40, %v2364_v3 }
 0x885   :  { %v3256_v5 = vpop.f32.mrf.mxu0 }
 0x886   :  { %3700 = vtanh.f32 %v2163_v4  ;;  %v2376_v15 = vadd.f32 %v3256_v5, %v4816_v40 }
 0x887   :  { %v2367_v32 = vpop.f32.mrf.mxu0  ;;  %3702 = vtanh.f32 %v2373_v38 }
 0x888   :  { %3704 = vtanh.f32 %v2365_v9  ;;  %v2368_v30 = vadd.f32 %v4816_v40, %v2367_v32 }
 0x889   :  { %v3687_v17 = vpop.eup %3686  ;;  %v3259_v34 = vpop.f32.mrf.mxu0  ;;  %3706 = vtanh.f32 %v2376_v15  ;;  %v5048_v15 = vlaneseq }
 0x88a   :  { %v2436_v10 = vmul.f32 %v3687_v17, %v4828_v8  ;;  %v2389_v0 = vadd.f32 %v3259_v34, %v4816_v40 }
 0x88b   :  { %v3689_v52 = vpop.eup %3688  ;;  %v2380_v14 = vpop.f32.mrf.mxu0 }
 0x88c   :  { %2454 = vadd.xlane.f32.xlu0 %v2436_v10  ;;  %v2434_v6 = vmul.f32 %v3689_v52, %v4828_v8  ;;  %v2381_v23 = vadd.f32 %v4816_v40, %v2380_v14 }
 0x88d   :  { %v3691_v36 = vpop.eup %3690  ;;  %v3260_v12 = vpop.f32.mrf.mxu0 }
 0x88e   :  { %v3693_v61 = vpop.eup %3692  ;;  %v2392_v24 = vadd.f32 %v3260_v12, %v4816_v40  ;;  %2450 = vadd.xlane.f32.xlu1 %v2434_v6  ;;  %v2437_v20 = vmul.f32 %v3691_v36, %v4828_v8  ;;  %v2490_v6 = vpop.permute.xlu0 %2489 }
 0x88f   :  { %v3695_v37 = vpop.eup %3694  ;;  %v2383_v25 = vpop.f32.mrf.mxu0 }
 0x890   :  { %v2166_v7 = vmul.f32 %v3695_v37, %v3693_v61  ;;  %3708 = vtanh.f32 %v2392_v24  ;;  %v3697_v26 = vpop.eup %3696  ;;  %v2384_v19 = vadd.f32 %v4816_v40, %v2383_v25 }
 0x891   :  { %v3699_v16 = vpop.eup %3698  ;;  %3710 = vtanh.f32 %v2368_v30  ;;  %v2435_v33 = vmul.f32 %v3697_v26, %v4828_v8 }
 0x892   :  { %2456 = vadd.xlane.f32.xlu1 %v2437_v20  ;;  %3712 = vtanh.f32 %v2389_v0  ;;  %v2495_v12 = vpop.permute.xlu0 %2494 }
 0x893   :  { %v3701_v18 = vpop.eup %3700  ;;  %3714 = vtanh.f32 %v2381_v23 }
 0x894   :  { %v2167_v27 = vmul.f32 %v3701_v18, %v3699_v16  ;;  %v3703_v43 = vpop.eup %3702  ;;  %3716 = vtanh.f32 %v2384_v19 }
 0x895   :  { %v2440_v41 = vmul.f32 %v3703_v43, %v4828_v8  ;;  %v3705_v39 = vpop.eup %3704  ;;  %v5049_v43 = vld [vmem:[#allocation21_spill] sm:$0xff] }
 0x896   :  { %v3201_v21 = vpack.c.bf16 %v2167_v27, %v2166_v7  ;;  %2452 = vadd.xlane.f32.xlu1 %v2435_v33  ;;  %v3707_v42 = vpop.eup %3706  ;;  %v2438_v35 = vmul.f32 %v3705_v39, %v4828_v8 }
 0x897   :  { %v2441_v31 = vmul.f32 %v3707_v42, %v4828_v8 }
 0x898   :  { %3202 = vst [vmem:[#allocation3 + $0x38] sm:$0xff] %v3201_v21  }
 0x89a   :  { %2462 = vadd.xlane.f32.xlu1 %v2440_v41 }
 0x89d   :  { %v3709_v29 = vpop.eup %3708 }
 0x89e   :  { %2458 = vadd.xlane.f32.xlu1 %v2438_v35  ;;  %v2445_v22 = vmul.f32 %v3709_v29, %v4828_v8  ;;  %v3711_v44 = vpop.eup %3710 }
 0x89f   :  { %v4844_v11 = vld [vmem:[#allocation3 + $0x38] sm:$0xff]   ;;  %v2439_v45 = vmul.f32 %v3711_v44, %v4828_v8  ;;  %v3713_v46 = vpop.eup %3712 }
 0x8a0   :  { %2472 = vadd.xlane.f32.xlu0 %v2445_v22  ;;  %3262 = vmatmul.mubr.bf16.gmra.mxu0 %v4844_v11  ;;  %v2444_v53 = vmul.f32 %v3713_v46, %v4828_v8  ;;  %v3715_v54 = vpop.eup %3714 }
 0x8a1   :  { %v2442_v56 = vmul.f32 %v3715_v54, %v4828_v8  ;;  %v3717_v57 = vpop.eup %3716 }
 0x8a2   :  { %2464 = vadd.xlane.f32.xlu1 %v2441_v31  ;;  %v2443_v58 = vmul.f32 %v3717_v57, %v4828_v8 }
 0x8a6   :  { %2460 = vadd.xlane.f32.xlu1 %v2439_v45 }
 0x8aa   :  { %2470 = vadd.xlane.f32.xlu1 %v2444_v53 }
 0x8ae   :  { %2466 = vadd.xlane.f32.xlu1 %v2442_v56 }
 0x8b2   :  { %2468 = vadd.xlane.f32.xlu1 %v2443_v58 }
 0x915   :  { %v2455_v27 = vpop.xlane.xlu0 %2454 }
 0x917   :  { %v2451_v24 = vpop.xlane.xlu1 %2450 }
 0x91b   :  { %v2457_v37 = vpop.xlane.xlu1 %2456 }
 0x91f   :  { %v2453_v7 = vpop.xlane.xlu1 %2452 }
 0x923   :  { %v2463_v30 = vpop.xlane.xlu1 %2462 }
 0x927   :  { %v2459_v20 = vpop.xlane.xlu1 %2458 }
 0x929   :  { %v2473_v33 = vpop.xlane.xlu0 %2472 }
 0x960   :  { %v3263_v59 = vpop.f32.mrf.mxu0 }
 0x961   :  { %v2405_v60 = vadd.f32 %v3263_v59, %v4816_v40 }
 0x962   :  { %v2396_v62 = vpop.f32.mrf.mxu0 }
 0x963   :  { %3718 = vtanh.f32 %v2405_v60  ;;  %v2397_v63 = vadd.f32 %v4816_v40, %v2396_v62 }
 0x964   :  { %v3264_v1 = vpop.f32.mrf.mxu0 }
 0x965   :  { %3720 = vtanh.f32 %v2397_v63  ;;  %v2408_v3 = vadd.f32 %v3264_v1, %v4816_v40 }
 0x966   :  { %v2399_v2 = vpop.f32.mrf.mxu0 }
 0x967   :  { %v2400_v4 = vadd.f32 %v4816_v40, %v2399_v2  ;;  %v2483_v40 = vand.u32 127, %v5048_v15 }
 0x969   :  { %3722 = vtanh.f32 %v2400_v4  ;;  %v2484_v14 = vcvt.s32.f32 %v2483_v40  ;;  %v2556_v0 = vadd.s32 4294967288, %v2483_v40  ;;  %v2554_v41 = vsub.s32 %v2483_v40, %v5049_v43 }
 0x96a   :  { %3724 = vtanh.f32 %v2408_v3 }
 0x96b   :  { %vm2497_vm0 = vcmp.lt.f32.partialorder %v2484_v14, %v2490_v6  ;;  %vm2498_vm1 = vcmp.lt.f32.partialorder %v2484_v14, %v2495_v12  ;;  %v2559_v21 = vsub.s32 %v2556_v0, %v5049_v43  ;;  %v2555_v19 = vrot.slane %v2451_v24, %v2554_v41 }
 0x96c   :  { %v3130_v36 = vsel %vm2497_vm0, 1.0, %v3930_v55  ;;  %v3131_v61 = vsel %vm2498_vm1, 1.0, %v3930_v55  ;;  %v2575_v22 = vrot.slane %v2459_v20, %v2554_v41  ;;  %v2566_v31 = vrot.slane %v2455_v27, %v2554_v41 }
 0x96d   :  { %v2560_v39 = vrot.slane %v2453_v7, %v2559_v21  ;;  %v2570_v35 = vrot.slane %v2457_v37, %v2559_v21  ;;  %v2584_v59 = vrot.slane %v2463_v30, %v2554_v41 }
 0x96f   :  { %v2562_v44 = vsel %vm2561_vm2, %v2560_v39, %v2555_v19  ;;  %v2571_v53 = vsel %vm2561_vm2, %v2570_v35, %v2566_v31 }
 0x970   :  { %v3719_v38 = vpop.eup %3718  ;;  %v2627_v56 = vsel %vm2626_vm3, %v2571_v53, %v2562_v44  ;;  %v5051_v44 = vsub.s32 1, %v5049_v43 }
 0x971   :  { %v2448_v5 = vmul.f32 %v3719_v38, %v4828_v8 }
 0x972   :  { %v3721_v32 = vpop.eup %3720 }
 0x973   :  { %2478 = vadd.xlane.f32.xlu1 %v2448_v5  ;;  %v2446_v9 = vmul.f32 %v3721_v32, %v4828_v8  ;;  %v2606_v32 = vrot.slane %v2473_v33, %v2559_v21 }
 0x976   :  { %v3723_v17 = vpop.eup %3722 }
 0x977   :  { %2474 = vadd.xlane.f32.xlu1 %v2446_v9  ;;  %v2447_v34 = vmul.f32 %v3723_v17, %v4828_v8  ;;  %v3725_v10 = vpop.eup %3724 }
 0x978   :  { %v2449_v52 = vmul.f32 %v3725_v10, %v4828_v8  ;;  %v2465_v8 = vpop.xlane.xlu1 %2464 }
 0x979   :  { %2476 = vadd.xlane.f32.xlu0 %v2447_v34  ;;  %v2588_v54 = vrot.slane %v2465_v8, %v2559_v21 }
 0x97b   :  { %v2589_v2 = vsel %vm2561_vm2, %v2588_v54, %v2584_v59  ;;  %v3422_v54 = vld [vmem:[#allocation12 + $0x38] sm:$0xff]   ;;  %v3424_v59 = vld [vmem:[#allocation12 + $0x28] sm:$0xff]  }
 0x97c   :  { %v2461_v26 = vpop.xlane.xlu1 %2460  ;;  %3266 = vmatpush3.bf16.msra.mxu1 %v3422_v54 }
 0x97d   :  { %2480 = vadd.xlane.f32.xlu0 %v2449_v52  ;;  %v2579_v25 = vrot.slane %v2461_v26, %v2559_v21  ;;  %3267 = vmatprep.subr.bf16.mxu1 %v3930_v55 }
 0x97f   :  { %v2580_v45 = vsel %vm2561_vm2, %v2579_v25, %v2575_v22  ;;  %v5050_v22 = vsub.s32 0, %v5049_v43 }
 0x980   :  { %v2471_v16 = vpop.xlane.xlu1 %2470  ;;  %v2629_v60 = vsel %vm2628_vm4, %v2580_v45, %v2627_v56  ;;  %v3423_v56 = vld [vmem:[#allocation12 + $0x30] sm:$0xff]  }
 0x981   :  { %v2602_v3 = vrot.slane %v2471_v16, %v2554_v41  ;;  %v2631_v38 = vsel %vm2630_vm5, %v2589_v2, %v2629_v60  ;;  %3268 = vmatpush3.bf16.msra.mxu1 %v3423_v56  ;;  %v3425_v60 = vld [vmem:[#allocation12 + $0x20] sm:$0xff]   ;;  %v3427_v2 = vld [vmem:[#allocation12 + $0x10] sm:$0xff]  }
 0x982   :  { %3269 = vmatprep.subr.bf16.mxu1 %v3930_v55 }
 0x983   :  { %v2607_v10 = vsel %vm2561_vm2, %v2606_v32, %v2602_v3  ;;  %v2732_v3 = vsub.s32 6, %v5049_v43  ;;  %v3429_v32 = vld [vmem:[#allocation12] sm:$0xff]  }
 0x984   :  { %v2467_v18 = vpop.xlane.xlu1 %2466 }
 0x985   :  { %v2593_v57 = vrot.slane %v2467_v18, %v2554_v41  ;;  %3270 = vmatpush3.bf16.msra.mxu1 %v3424_v59 }
 0x986   :  { %3271 = vmatprep.subr.bf16.mxu1 %v3930_v55 }
 0x988   :  { %v2469_v23 = vpop.xlane.xlu1 %2468 }
 0x989   :  { %v2597_v46 = vrot.slane %v2469_v23, %v2559_v21  ;;  %3272 = vmatpush3.bf16.msra.mxu1 %v3425_v60 }
 0x98a   :  { %3273 = vmatprep.subr.bf16.mxu1 %v3930_v55 }
 0x98b   :  { %v2598_v63 = vsel %vm2561_vm2, %v2597_v46, %v2593_v57  ;;  %v5052_v46 = vsub.s32 2, %v5049_v43  ;;  %v5053_v57 = vsub.s32 3, %v5049_v43 }
 0x98c   :  { %v2633_v9 = vsel %vm2632_vm6, %v2598_v63, %v2631_v38  ;;  %v3426_v63 = vld [vmem:[#allocation12 + $0x18] sm:$0xff]  }
 0x98d   :  { %v2635_v15 = vsel %vm2634_vm7, %v2607_v10, %v2633_v9  ;;  %3274 = vmatpush3.bf16.msra.mxu1 %v3426_v63  ;;  %v2752_v10 = vunpack.c.l.bf16 %v4776_v28 }
 0x98e   :  { %3275 = vmatprep.subr.bf16.mxu1 %v3930_v55 }
 0x991   :  { %3276 = vmatpush3.bf16.msra.mxu1 %v3427_v2  ;;  %v2766_v2 = vunpack.c.l.bf16 %v4844_v11 }
 0x992   :  { %3277 = vmatprep.subr.bf16.mxu1 %v3930_v55 }
 0x9aa   :  { %2503 = vxpose.xlu1.b32.start [1/2] (short) (narrow) %v3130_v36, 8 }
 0x9ae   :  { %2504 = vxpose.xlu1.b32.end [2/2] (short) (narrow) %v3131_v61, 8 }
 0x9fc   :  { %v2479_v29 = vpop.xlane.xlu1 %2478 }
 0x9fd   :  { %v2620_v17 = vrot.slane %v2479_v29, %v2554_v41 }
 0xa00   :  { %v2475_v62 = vpop.xlane.xlu1 %2474 }
 0xa01   :  { %v2611_v5 = vrot.slane %v2475_v62, %v2554_v41  ;;  %v2721_v62 = vsub.s32 5, %v5049_v43 }
 0xa02   :  { %v2477_v42 = vpop.xlane.xlu0 %2476 }
 0xa03   :  { %v2615_v1 = vrot.slane %v2477_v42, %v2559_v21  ;;  %v2710_v42 = vsub.s32 4, %v5049_v43 }
 0xa05   :  { %v2616_v34 = vsel %vm2561_vm2, %v2615_v1, %v2611_v5  ;;  %v2743_v5 = vsub.s32 7, %v5049_v43  ;;  %v2753_v43 = vunpack.c.h.bf16 %v4776_v28 }
 0xa06   :  { %v2481_v58 = vpop.xlane.xlu0 %2480  ;;  %v2637_v40 = vsel %vm2636_vm8, %v2616_v34, %v2635_v15 }
 0xa07   :  { %v2624_v4 = vrot.slane %v2481_v58, %v2559_v21 }
 0xa09   :  { %v2625_v52 = vsel %vm2561_vm2, %v2624_v4, %v2620_v17  ;;  %v3428_v4 = vld [vmem:[#allocation12 + $0x8] sm:$0xff]  }
 0xa0a   :  { %v2639_v6 = vsel %vm2638_vm9, %v2625_v52, %v2637_v40  ;;  %3278 = vmatpush3.bf16.msra.mxu1 %v3428_v4  ;;  %v2754_v52 = vunpack.c.l.bf16 %v4780_v13 }
 0xa0b   :  { %3279 = vmatprep.subr.bf16.mxu1 %v3930_v55 }
 0xa0e   :  { %3280 = vmatpush3.bf16.msra.mxu1 %v3429_v32 }
 0xa26   :  { %v2519_v14 = vpop.trf.xlu1 }
 0xa27   :  { %vm2535_vm11 = vcmp.gt.f32.partialorder %v2519_v14, 0.5 }
 0xa28   :  { %v2641_v36 = vsel %vm2535_vm11, %v2639_v6, -1e+30 }
 0xa29   :  { %v2643_v12 = vsel %vm2642_vm10, %v2641_v36, -inf }
 0xa2a   :  { %v2644_v61 = vrot.slane %v2643_v12, 4 }
 0xa2c   :  { %v2645_v24 = vmax.f32 %v2643_v12, %v2644_v61 }
 0xa2e   :  { %v2646_v37 = vrot.slane %v2645_v24, 2 }
 0xa30   :  { %v2647_v7 = vmax.f32 %v2645_v24, %v2646_v37  ;;  %v2756_v37 = vunpack.c.l.bf16 %v4782_v47 }
 0xa32   :  { %v2648_v30 = vrot.slane %v2647_v7, 1 }
 0xa34   :  { %v2649_v20 = vmax.f32 %v2647_v7, %v2648_v30 }
 0xa36   :  { %v2650_v8 = vsub.f32 %v2641_v36, %v2649_v20  ;;  %v2755_v36 = vunpack.c.h.bf16 %v4780_v13  ;;  %v2759_v13 = vunpack.c.h.bf16 %v4786_v48 }
 0xa38   :  { %v2651_v26 = vmul.f32 1.442695, %v2650_v8  ;;  %v2757_v8 = vunpack.c.h.bf16 %v4782_v47 }
 0xa3a   :  { %3726 = vpow2.f32 %v2651_v26 }
 0xa47   :  { %v3727_v16 = vpop.eup %3726 }
 0xa48   :  { %v2653_v18 = vsel %vm2535_vm11, %v3727_v16, 0.0 }
 0xa49   :  { %v2654_v27 = vsel %vm2642_vm10, %v2653_v18, 0.0 }
 0xa4a   :  { %v2655_v0 = vrot.slane %v2654_v27, 4 }
 0xa4c   :  { %v2656_v33 = vadd.f32 %v2655_v0, %v2654_v27  ;;  %v2758_v27 = vunpack.c.l.bf16 %v4786_v48  ;;  %v2763_v48 = vunpack.c.h.bf16 %v4792_v50 }
 0xa4e   :  { %v2657_v21 = vrot.slane %v2656_v33, 2 }
 0xa50   :  { %v2658_v23 = vadd.f32 %v2657_v21, %v2656_v33 }
 0xa52   :  { %v2659_v41 = vrot.slane %v2658_v23, 1 }
 0xa54   :  { %v2660_v39 = vadd.f32 %v2659_v41, %v2658_v23  ;;  %v2761_v41 = vunpack.c.h.bf16 %v4788_v49 }
 0xa56   :  { %v2661_v25 = vadd.f32 1e-20, %v2660_v39 }
 0xa58   :  { %3728 = vrcp.f32 %v2661_v25 }
 0xa65   :  { %v3729_v19 = vpop.eup %3728 }
 0xa66   :  { %v2663_v35 = vmul.f32 %v3729_v19, %v2653_v18  ;;  %v2760_v19 = vunpack.c.l.bf16 %v4788_v49  ;;  %v2765_v49 = vunpack.c.h.bf16 %v4794_v51 }
 0xa68   :  { %v2711_v29 = vrot.slane %v2663_v35, %v2710_v42  ;;  %v2667_v31 = vrot.slane %v2663_v35, %v5050_v22  ;;  %v2678_v45 = vrot.slane %v2663_v35, %v5051_v44  ;;  %v2689_v53 = vrot.slane %v2663_v35, %v5052_v46 }
 0xa69   :  { %v2700_v58 = vrot.slane %v2663_v35, %v5053_v57  ;;  %v2722_v1 = vrot.slane %v2663_v35, %v2721_v62  ;;  %v2733_v38 = vrot.slane %v2663_v35, %v2732_v3  ;;  %v2744_v9 = vrot.slane %v2663_v35, %v2743_v5 }
 0xa6a   :  { %2717 = vbcast.lane.b32.xlu1 %v2711_v29, 264  ;;  %2669 = vbcast.lane.b32.xlu0 %v2667_v31, 256  ;;  %v2764_v57 = vunpack.c.l.bf16 %v4794_v51 }
 0xa6e   :  { %2673 = vbcast.lane.b32.xlu0 %v2667_v31, 264  ;;  %v2762_v31 = vunpack.c.l.bf16 %v4792_v50  ;;  %v2767_v50 = vunpack.c.h.bf16 %v4844_v11 }
 0xa72   :  { %2680 = vbcast.lane.b32.xlu0 %v2678_v45, 256 }
 0xa76   :  { %2684 = vbcast.lane.b32.xlu0 %v2678_v45, 264 }
 0xa7a   :  { %2691 = vbcast.lane.b32.xlu0 %v2689_v53, 256 }
 0xa7e   :  { %2695 = vbcast.lane.b32.xlu0 %v2689_v53, 264 }
 0xa82   :  { %2702 = vbcast.lane.b32.xlu0 %v2700_v58, 256 }
 0xa86   :  { %2706 = vbcast.lane.b32.xlu0 %v2700_v58, 264 }
 0xa8a   :  { %2713 = vbcast.lane.b32.xlu0 %v2711_v29, 256 }
 0xa8e   :  { %2724 = vbcast.lane.b32.xlu0 %v2722_v1, 256 }
 0xa92   :  { %2728 = vbcast.lane.b32.xlu0 %v2722_v1, 264 }
 0xa96   :  { %2735 = vbcast.lane.b32.xlu0 %v2733_v38, 256 }
 0xa9a   :  { %2739 = vbcast.lane.b32.xlu0 %v2733_v38, 264 }
 0xa9e   :  { %2746 = vbcast.lane.b32.xlu0 %v2744_v9, 256 }
 0xaa2   :  { %2750 = vbcast.lane.b32.xlu0 %v2744_v9, 264 }
 0xadc   :  { %v2670_v17 = vpop.permute.xlu0 %2669  ;;  %v2718_v21 = vpop.permute.xlu1 %2717 }
 0xadd   :  { %v2768_v40 = vmul.f32 %v2752_v10, %v2670_v17  ;;  %v2777_v25 = vmul.f32 %v2761_v41, %v2718_v21 }
 0xae0   :  { %v2674_v34 = vpop.permute.xlu0 %2673 }
 0xae1   :  { %v2769_v61 = vmul.f32 %v2753_v43, %v2674_v34 }
 0xae4   :  { %v2681_v15 = vpop.permute.xlu0 %2680 }
 0xae5   :  { %v2770_v14 = vmul.f32 %v2754_v52, %v2681_v15 }
 0xae7   :  { %v2784_v6 = vadd.f32 %v2770_v14, %v2768_v40 }
 0xae8   :  { %v2685_v12 = vpop.permute.xlu0 %2684 }
 0xae9   :  { %v2771_v24 = vmul.f32 %v2755_v36, %v2685_v12 }
 0xaeb   :  { %v2791_v55 = vadd.f32 %v2771_v24, %v2769_v61 }
 0xaec   :  { %v2692_v7 = vpop.permute.xlu0 %2691 }
 0xaed   :  { %v2772_v30 = vmul.f32 %v2756_v37, %v2692_v7 }
 0xaef   :  { %v2785_v20 = vadd.f32 %v2784_v6, %v2772_v30 }
 0xaf0   :  { %v2696_v26 = vpop.permute.xlu0 %2695 }
 0xaf1   :  { %v2773_v16 = vmul.f32 %v2757_v8, %v2696_v26 }
 0xaf3   :  { %v2792_v18 = vadd.f32 %v2791_v55, %v2773_v16 }
 0xaf4   :  { %v2703_v28 = vpop.permute.xlu0 %2702 }
 0xaf5   :  { %v2774_v0 = vmul.f32 %v2758_v27, %v2703_v28 }
 0xaf7   :  { %v2786_v33 = vadd.f32 %v2785_v20, %v2774_v0 }
 0xaf8   :  { %v2707_v23 = vpop.permute.xlu0 %2706 }
 0xaf9   :  { %v2775_v39 = vmul.f32 %v2759_v13, %v2707_v23 }
 0xafb   :  { %v2793_v42 = vadd.f32 %v2792_v18, %v2775_v39 }
 0xafc   :  { %v2714_v47 = vpop.permute.xlu0 %2713 }
 0xafd   :  { %v2776_v35 = vmul.f32 %v2760_v19, %v2714_v47  ;;  %v2794_v29 = vadd.f32 %v2793_v42, %v2777_v25 }
 0xaff   :  { %v2787_v22 = vadd.f32 %v2786_v33, %v2776_v35 }
 0xb00   :  { %v2725_v44 = vpop.permute.xlu0 %2724 }
 0xb01   :  { %v2778_v45 = vmul.f32 %v2762_v31, %v2725_v44 }
 0xb03   :  { %v2788_v46 = vadd.f32 %v2787_v22, %v2778_v45 }
 0xb04   :  { %v2729_v53 = vpop.permute.xlu0 %2728 }
 0xb05   :  { %v2779_v54 = vmul.f32 %v2763_v48, %v2729_v53 }
 0xb07   :  { %v2795_v56 = vadd.f32 %v2794_v29, %v2779_v54 }
 0xb08   :  { %v2736_v58 = vpop.permute.xlu0 %2735 }
 0xb09   :  { %v2780_v59 = vmul.f32 %v2764_v57, %v2736_v58 }
 0xb0b   :  { %v2789_v60 = vadd.f32 %v2788_v46, %v2780_v59 }
 0xb0c   :  { %v2740_v62 = vpop.permute.xlu0 %2739 }
 0xb0d   :  { %v2781_v63 = vmul.f32 %v2765_v49, %v2740_v62 }
 0xb0f   :  { %v2796_v1 = vadd.f32 %v2795_v56, %v2781_v63 }
 0xb10   :  { %v2747_v3 = vpop.permute.xlu0 %2746 }
 0xb11   :  { %v2782_v4 = vmul.f32 %v2766_v2, %v2747_v3 }
 0xb13   :  { %v2790_v38 = vadd.f32 %v2789_v60, %v2782_v4 }
 0xb14   :  { %v2751_v5 = vpop.permute.xlu0 %2750 }
 0xb15   :  { %v2783_v32 = vmul.f32 %v2767_v50, %v2751_v5 }
 0xb17   :  { %v2797_v9 = vadd.f32 %v2796_v1, %v2783_v32 }
 0xb19   :  { %v2798_v17 = vpack.c.bf16 %v2797_v9, %v2790_v38 }
 0xb1b   :  { %3207 = vst [vmem:[#allocation13] sm:$0xff] %v2798_v17   ;;  %3282 = vmatmul.mubr.bf16.vlgmr.msra.gmra.mxu1 %v2798_v17 }
 0xb1c   :  { %3881 = shalt.err (!%p3878_p1)
}
 0xb1d   :  { %2945 = dma.vmem_to_hbm [thread:$0]  %s2940_s12, 128, %s4933_s10, [#allocation6], %s3925_s29, %s3925_s29, %s3926_s30  }
 0xb1e   :  { %v3134_v51 = vld [vmem:[%s4932_s9] ss:$0 sm:$0xff]  ;;  %s3933_s10 = smov [#allocation14]  }
 0xb1f   :  { %s2951_s29 = sshll.u32 %s3933_s10, 4  ;;  %s2952_s29 = int_to_ptr.vmem [resolvable:$true] %s2951_s29 }
 0xb20   :  { %s3890_s9 = scalar_lea.vmem %s2952_s29, 256  ;;  %p3895_p3 = scmp.lt.s32.totalorder %s2952_s29, %s2952_s29 }
 0xb21   :  { %p3891_p2 = scmp.ne.s32.totalorder %s2952_s29, %s3890_s9  ;;  %p3896_p4 = scmp.lt.s32.totalorder %s3890_s9, %s3890_s9 }
 0xb23   :  { %p3897_p5 = por %p3896_p4, %p3895_p3 }
 0xb25   :  { %p3898_p6 = pnand %p3897_p5, %p3891_p2 }
 0xbdb   :  { %v2913_v11 = vpop.f32.mrf.mxu1 }
 0xbdc   :  { %v2914_v34 = vadd.f32 %v3134_v51, %v2913_v11 }
 0xbdd   :  { %v3283_v10 = vpop.f32.mrf.mxu1 }
 0xbde   :  { %v3143_v52 = vmul.f32 -1.442695, %v2914_v34 }
 0xbdf   :  { %v2916_v15 = vpop.f32.mrf.mxu1 }
 0xbe0   :  { %3730 = vpow2.f32 %v3143_v52  ;;  %v2917_v40 = vadd.f32 %v3134_v51, %v2916_v15 }
 0xbe1   :  { %v3284_v14 = vpop.f32.mrf.mxu1 }
 0xbe2   :  { %v3144_v43 = vmul.f32 -1.442695, %v2917_v40 }
 0xbe4   :  { %3732 = vpow2.f32 %v3144_v43 }
 0xbed   :  { %v3731_v6 = vpop.eup %3730 }
 0xbee   :  { %v2926_v36 = vadd.f32 1.0, %v3731_v6 }
 0xbf0   :  { %3734 = vrcp.f32 %v2926_v36 }
 0xbf1   :  { %v3733_v12 = vpop.eup %3732 }
 0xbf2   :  { %v2927_v61 = vadd.f32 1.0, %v3733_v12 }
 0xbf4   :  { %3736 = vrcp.f32 %v2927_v61 }
 0xbfd   :  { %v3735_v24 = vpop.eup %3734 }
 0xbfe   :  { %2932 = vst [vmem:[#allocation14] sm:$0xff] %v3735_v24 }
 0xc01   :  { %v3737_v55 = vpop.eup %3736 }
 0xc02   :  { %2933 = vst [vmem:[#allocation14 + $0x8] sm:$0xff] %v3737_v55 }
 0xc03   :  { %3901 = shalt.err (!%p3898_p6)
}
 0xc04   :  { %s3934_s30 = smov 128   ;;  %s3935_s17 = smov 8  }
 0xc05   :  { %2957 = dma.vmem_to_hbm [thread:$0]  %s2952_s29, 256, %s4934_s11, [#allocation15], %s3934_s30, %s3934_s30, %s3935_s17  }
 0xc06   :  { %3916 = dma.done.wait [#allocation6], 128  }
 0xc07   :  { %3917 = vsyncadd [#allocation6], 4294967168 }
 0xc08   :  { %3918 = dma.done.wait [#allocation15], 256  }
 0xc09   :  { %3919 = vsyncadd [#allocation15], 4294967040 }
 0xc0a   :  { %2964 = vsyncpa [#allocation5], 1 }
 0xc0b   :  { %2965 = vsyncpa [#allocation8], 1 }
 0xc0c   :  { %2966 = vsyncpa [#allocation11], 1 }
 0xc0d   :  { %2967 = vsyncpa [#allocation6], 1 }
 0xc0e   :  { %2968 = vsyncpa [#allocation15], 1 }

</bundles_post_ra>
